<compile_context>
chip_gen: v7x
topology: tpu7x:2x2x1
jax: 0.10.0
libtpu: 0.0.40
codegen_flags: <defaults>
</compile_context>

<pallas_src>
import jax
import jax.numpy as jnp
from jax import lax
from jax.experimental import pallas as pl
from jax.experimental.pallas import tpu as pltpu

GCN_INPUT_DIM = 1024
GCN_HIDDEN_DIM = 256
GCN_OUTPUT_DIM = 63
ATTN_DIM = 64            # Attention_output_dim (= GCN_output_dim + 1 for centrality)
NUM_CLASSES = 1
LN_EPS = 1e-5
MASK_NEG = -1e9
SCALE = 1.0 / (ATTN_DIM ** 0.5)


# ----------------------------------------------------------------------------
# Pallas kernel: full forward for one block of `block_b` batch elements.
# All per-sample math is expressed on stacked (block_b*N) rows with a
# block-diagonal adjacency / bias, so every matmul and the softmax are lane-dense.
# ----------------------------------------------------------------------------
def model_kernel(x_ref, adj_ref, bias_ref, cent_ref,
                 w1_ref, b1_ref, w2_ref, b2_ref,
                 wqkv_ref, bqkv_ref,
                 ln_g_ref, ln_b_ref, fcw_ref, fcb_ref,
                 out_ref):
    BbN = adj_ref.shape[0]          # block_b * N stacked rows
    Bb = out_ref.shape[0]           # block_b samples
    N = BbN // Bb

    adjb = adj_ref[...]             # (BbN, BbN) bf16 block-diagonal adjacency

    # ---- GCN layer 1: relu(adj_bd @ (x @ W1 + b1)) ------------------------------
    s1 = jnp.dot(x_ref[...], w1_ref[...],
                 preferred_element_type=jnp.float32) + b1_ref[...]        # (BbN, 256)
    h = jnp.dot(adjb, s1.astype(jnp.bfloat16),
                preferred_element_type=jnp.float32)
    h = jnp.maximum(h, 0.0).astype(jnp.bfloat16)                          # (BbN, 256) bf16

    # ---- GCN layer 2: adj_bd @ (h @ W2 + b2); W2/b2 padded to 64 cols (col 63 == 0)
    s2 = jnp.dot(h, w2_ref[...],
                 preferred_element_type=jnp.float32) + b2_ref[...]        # (BbN, 64)
    g = jnp.dot(adjb, s2.astype(jnp.bfloat16),
                preferred_element_type=jnp.float32)                       # (BbN, 64)

    # ---- padding mask over keys (PyTorch: gcn_output[:, :, 0] == 0) -------------
    key0_t = jnp.transpose(g[:, 0:1])                                     # (1, BbN)

    # ---- inject centrality into column 63 (replaces concat; g[:, 63] == 0) ------
    lane = lax.broadcasted_iota(jnp.int32, (1, ATTN_DIM), 1)
    col63 = (lane == ATTN_DIM - 1).astype(jnp.float32)                    # (1, 64)
    xa = g + cent_ref[...] * col63                                        # (BbN, 64)

    # ---- single-head graph attention, fused QKV ----------------------------------
    qkv = jnp.dot(xa, wqkv_ref[...],
                  preferred_element_type=jnp.float32) + bqkv_ref[...]     # (BbN, 192)
    q = qkv[:, 0:ATTN_DIM]
    k = qkv[:, ATTN_DIM:2 * ATTN_DIM]
    v = qkv[:, 2 * ATTN_DIM:3 * ATTN_DIM]

    scores = lax.dot_general(q, k, dimension_numbers=(((1,), (1,)), ((), ())),
                             preferred_element_type=jnp.float32)          # (BbN, BbN)
    # bias_ref already contains MASK_NEG on all off-block (cross-sample) entries.
    scores = scores * SCALE + bias_ref[...]
    scores = jnp.where(key0_t == 0.0, MASK_NEG, scores)                   # mask padded keys

    scores = scores - jnp.max(scores, axis=-1, keepdims=True)
    e = jnp.exp(scores)
    attn = e * pl.reciprocal(jnp.sum(e, axis=-1, keepdims=True), approx=True)
    ctx = jnp.dot(attn.astype(jnp.bfloat16), v.astype(jnp.bfloat16),
                  preferred_element_type=jnp.float32)                     # (BbN, 64)

    # ---- mean over nodes, LayerNorm(64), FC, sigmoid -----------------------------
    avg = jnp.mean(ctx.reshape(Bb, N, ATTN_DIM), axis=1)                  # (Bb, 64)
    mu = jnp.mean(avg, axis=-1, keepdims=True)
    var = jnp.mean((avg - mu) * (avg - mu), axis=-1, keepdims=True)
    ln = (avg - mu) * lax.rsqrt(var + LN_EPS) * ln_g_ref[...] + ln_b_ref[...]

    y = jnp.dot(ln, fcw_ref[...], preferred_element_type=jnp.float32) + fcb_ref[...]
    out_ref[...] = 1.0 / (1.0 + jnp.exp(-y))                              # (Bb, 1)


# ----------------------------------------------------------------------------
# Wrapper
# ----------------------------------------------------------------------------
def model_forward(x, adj, attn_bias, centrality, params, block_b=None):
    B, N, F = x.shape
    assert F == GCN_INPUT_DIM
    (w1, b1, w2, b2, wq, bq, wk, bk, wv, bv, ln_g, ln_b, fcw, fcb) = params

    if block_b is None:
        # ~128 stacked rows per grid step: fills the v5e MXU, keeps >=2 grid steps
        # on v7x (2 TCs) for typical batches.  Pass block_b=32 on v6e for 256 rows.
        block_b = -(-128 // N)
        block_b = -(-block_b // 8) * 8     # multiple of 8 keeps (block_b, 1) out tile legal
        block_b = min(block_b, 32)

    # pad the batch to a multiple of block_b (padded samples are numerically benign
    # and sliced off afterwards)
    Bp = -(-B // block_b) * block_b
    if Bp != B:
        pad = Bp - B
        x = jnp.pad(x, ((0, pad), (0, 0), (0, 0)))
        adj = jnp.pad(adj, ((0, pad), (0, 0), (0, 0)))
        attn_bias = jnp.pad(attn_bias, ((0, pad), (0, 0), (0, 0)))
        centrality = jnp.pad(centrality, ((0, pad), (0, 0)))

    nb = Bp // block_b
    BbN = block_b * N

    # ---- bf16 ingest for the heavy matmuls; fp32 MXU accumulation everywhere -----
    x2d = x.reshape(Bp * N, GCN_INPUT_DIM).astype(jnp.bfloat16)
    cent2 = centrality.reshape(Bp * N, 1).astype(jnp.float32)
    w1b = w1.astype(jnp.bfloat16)
    # pad GCN-2 weights 63 -> 64 output columns (zero column 63 -> centrality slot)
    w2p = jnp.pad(w2, ((0, 0), (0, ATTN_DIM - GCN_OUTPUT_DIM))).astype(jnp.bfloat16)
    b2p = jnp.pad(b2, ((0, 0), (0, ATTN_DIM - GCN_OUTPUT_DIM)))
    # fused QKV weights
    wqkv = jnp.concatenate([wq, wk, wv], axis=1)      # (64, 192)
    bqkv = jnp.concatenate([bq, bk, bv], axis=1)      # (1, 192)

    # ---- block-diagonal adjacency / attn_bias per grid block --------------------
    eye = jnp.eye(block_b, dtype=jnp.float32)
    adj_bd = jnp.einsum('gipq,ij->gipjq', adj.reshape(nb, block_b, N, N), eye)
    adj_bd = adj_bd.reshape(nb * BbN, BbN).astype(jnp.bfloat16)
    block_mask = jnp.kron(eye, jnp.ones((N, N), jnp.float32))             # (BbN, BbN)
    bias_bd = jnp.einsum('gipq,ij->gipjq', attn_bias.reshape(nb, block_b, N, N), eye)
    bias_bd = (bias_bd.reshape(nb * BbN, BbN)
               + (1.0 - block_mask)[None].reshape(1, BbN, BbN).repeat(nb, axis=0)
                 .reshape(nb * BbN, BbN) * MASK_NEG)

    grid = (nb,)

    def const_spec(shape):
        return pl.BlockSpec(shape, lambda b: (0,) * len(shape))

    in_specs = [
        pl.BlockSpec((BbN, GCN_INPUT_DIM), lambda b: (b, 0)),   # x (stacked rows)
        pl.BlockSpec((BbN, BbN), lambda b: (b, 0)),             # block-diag adjacency
        pl.BlockSpec((BbN, BbN), lambda b: (b, 0)),             # block-diag attn_bias
        pl.BlockSpec((BbN, 1), lambda b: (b, 0)),               # centrality (stacked)
        const_spec(w1b.shape), const_spec(b1.shape),
        const_spec(w2p.shape), const_spec(b2p.shape),
        const_spec(wqkv.shape), const_spec(bqkv.shape),
        const_spec(ln_g.shape), const_spec(ln_b.shape),
        const_spec(fcw.shape), const_spec(fcb.shape),
    ]

    # advisory cost estimate so XLA schedules the custom call sensibly
    flops = int(2 * Bp * N * (GCN_INPUT_DIM * GCN_HIDDEN_DIM
                              + GCN_HIDDEN_DIM * ATTN_DIM
                              + 3 * ATTN_DIM * ATTN_DIM
                              + ATTN_DIM)
                + 2 * nb * BbN * BbN * (GCN_HIDDEN_DIM + 3 * ATTN_DIM))
    transcendentals = int(nb * BbN * BbN + 2 * Bp)
    bytes_accessed = int(
        x2d.size * 2 + adj_bd.size * 2 + bias_bd.size * 4 + cent2.size * 4
        + w1b.size * 2 + w2p.size * 2
        + (b1.size + b2p.size + wqkv.size + bqkv.size
           + ln_g.size + ln_b.size + fcw.size + fcb.size) * 4
        + Bp * 4)

    out = pl.pallas_call(
        model_kernel,
        out_shape=jax.ShapeDtypeStruct((Bp, NUM_CLASSES), jnp.float32),
        grid_spec=pltpu.PrefetchScalarGridSpec(
            num_scalar_prefetch=0,
            grid=grid,
            in_specs=in_specs,
            out_specs=pl.BlockSpec((block_b, NUM_CLASSES), lambda b: (b, 0)),
        ),
        compiler_params=pltpu.CompilerParams(
            dimension_semantics=("parallel",),   # independent samples -> megacore-shardable
            vmem_limit_bytes=32 * 1024 * 1024,
        ),
        cost_estimate=pl.CostEstimate(flops=flops,
                                      transcendentals=transcendentals,
                                      bytes_accessed=bytes_accessed),
    )(x2d, adj_bd, bias_bd, cent2,
      w1b, b1, w2p, b2p, wqkv, bqkv, ln_g, ln_b, fcw, fcb)

    out = out[:B]
    # torch .squeeze(0): only squeezes if the leading dim is 1
    if out.shape[0] == 1:
        out = out[0]
    return out


# ----------------------------------------------------------------------------
# Pure-JAX reference (same math, incl. all bf16 matmul casts, used to validate)
# ----------------------------------------------------------------------------
def reference_forward(x, adj, attn_bias, centrality, params):
    (w1, b1, w2, b2, wq, bq, wk, bk, wv, bv, ln_g, ln_b, fcw, fcb) = params
    adjb = adj.astype(jnp.bfloat16)
    s1 = jnp.einsum('bnf,fh->bnh', x.astype(jnp.bfloat16), w1.astype(jnp.bfloat16),
                    preferred_element_type=jnp.float32) + b1
    h = jnp.maximum(jnp.einsum('bij,bjk->bik', adjb, s1.astype(jnp.bfloat16),
                               preferred_element_type=jnp.float32), 0.0)
    h = h.astype(jnp.bfloat16)
    s2 = jnp.einsum('bnh,hk->bnk', h, w2.astype(jnp.bfloat16),
                    preferred_element_type=jnp.float32) + b2
    g = jnp.einsum('bij,bjk->bik', adjb, s2.astype(jnp.bfloat16),
                   preferred_element_type=jnp.float32)               # (B, N, 63)
    pad = (g[:, :, 0] == 0.0)                                        # (B, N)
    xa = jnp.concatenate([g, centrality[..., None]], axis=-1)        # (B, N, 64)
    q = xa @ wq + bq
    k = xa @ wk + bk
    v = xa @ wv + bv
    scores = jnp.einsum('bid,bjd->bij', q, k) * SCALE + attn_bias
    scores = jnp.where(pad[:, None, :], MASK_NEG, scores)
    attn = jax.nn.softmax(scores, axis=-1)
    ctx = jnp.einsum('bij,bjd->bid', attn.astype(jnp.bfloat16), v.astype(jnp.bfloat16),
                     preferred_element_type=jnp.float32)
    avg = ctx.mean(axis=1)
    mu = avg.mean(axis=-1, keepdims=True)
    var = ((avg - mu) ** 2).mean(axis=-1, keepdims=True)
    ln = (avg - mu) / jnp.sqrt(var + LN_EPS) * ln_g + ln_b
    y = jax.nn.sigmoid(ln @ fcw + fcb)
    if y.shape[0] == 1:
        y = y[0]
    return y


# ----------------------------------------------------------------------------
# Deterministic parameter init (shapes come from the module's __init__)
# ----------------------------------------------------------------------------
def init_params(key):
    ks = jax.random.split(key, 14)

    def lin(kw, fan_in, shape_w, shape_b):
        bound = 1.0 / jnp.sqrt(jnp.float32(fan_in))
        kw1, kw2 = jax.random.split(kw)
        w = jax.random.uniform(kw1, shape_w, jnp.float32, -bound, bound)
        b = jax.random.uniform(kw2, shape_b, jnp.float32, -bound, bound)
        return w, b

    w1, b1 = lin(ks[0], GCN_INPUT_DIM, (GCN_INPUT_DIM, GCN_HIDDEN_DIM), (1, GCN_HIDDEN_DIM))
    w2, b2 = lin(ks[1], GCN_HIDDEN_DIM, (GCN_HIDDEN_DIM, GCN_OUTPUT_DIM), (1, GCN_OUTPUT_DIM))
    wq, bq = lin(ks[2], ATTN_DIM, (ATTN_DIM, ATTN_DIM), (1, ATTN_DIM))
    wk, bk = lin(ks[3], ATTN_DIM, (ATTN_DIM, ATTN_DIM), (1, ATTN_DIM))
    wv, bv = lin(ks[4], ATTN_DIM, (ATTN_DIM, ATTN_DIM), (1, ATTN_DIM))
    ln_g = jnp.ones((1, ATTN_DIM), jnp.float32)
    ln_b = jnp.zeros((1, ATTN_DIM), jnp.float32)
    fcw, fcb = lin(ks[5], ATTN_DIM, (ATTN_DIM, NUM_CLASSES), (1, NUM_CLASSES))
    return (w1, b1, w2, b2, wq, bq, wk, bk, wv, bv, ln_g, ln_b, fcw, fcb)


if __name__ == "__main__":
    # 32 graphs x 8 nodes: grid has 2 steps of 16 stacked samples (128 MXU rows/step)
    B, N = 32, 8

    key = jax.random.PRNGKey(0)
    kx, ka, kb, kc, kp = jax.random.split(key, 5)

    x = jax.random.normal(kx, (B, N, GCN_INPUT_DIM), jnp.float32)
    a = jax.random.uniform(ka, (B, N, N), jnp.float32, 0.0, 1.0)
    adj = a / jnp.sum(a, axis=-1, keepdims=True)            # row-normalized adjacency
    attn_bias = 0.1 * jax.random.normal(kb, (B, N, N), jnp.float32)
    centrality = jax.random.normal(kc, (B, N), jnp.float32)

    params = init_params(kp)

    out = model_forward(x, adj, attn_bias, centrality, params)
    out = jax.block_until_ready(out)

    ref = reference_forward(x, adj, attn_bias, centrality, params)
    assert out.shape == ref.shape, (out.shape, ref.shape)
    assert jnp.allclose(out, ref, rtol=2e-3, atol=2e-3), (out, ref)

    print("KERNEL_OK")
</pallas_src>

<mosaic_0001>
module attributes {stable_mosaic.version = 11 : i64} {
  func.func @model_kernel(%arg0: i32, %arg1: memref<128x1024xbf16, #tpu.memory_space<vmem>>, %arg2: memref<128x128xbf16, #tpu.memory_space<vmem>>, %arg3: memref<128x128xf32, #tpu.memory_space<vmem>>, %arg4: memref<128x1xf32, #tpu.memory_space<vmem>>, %arg5: memref<1024x256xbf16, #tpu.memory_space<vmem>>, %arg6: memref<1x256xf32, #tpu.memory_space<vmem>>, %arg7: memref<256x64xbf16, #tpu.memory_space<vmem>>, %arg8: memref<1x64xf32, #tpu.memory_space<vmem>>, %arg9: memref<64x192xf32, #tpu.memory_space<vmem>>, %arg10: memref<1x192xf32, #tpu.memory_space<vmem>>, %arg11: memref<1x64xf32, #tpu.memory_space<vmem>>, %arg12: memref<1x64xf32, #tpu.memory_space<vmem>>, %arg13: memref<64x1xf32, #tpu.memory_space<vmem>>, %arg14: memref<1x1xf32, #tpu.memory_space<vmem>>, %arg15: memref<16x1xf32, #tpu.memory_space<vmem>>) attributes {dimension_semantics = [#tpu.dimension_semantics<parallel>], iteration_bounds = array<i64: 2>, scalar_prefetch = 0 : i64, scratch_operands = 0 : i64, tpu.core_type = #tpu.core_type<tc>, window_params = [{transform_indices = @transform_0, window_bounds = array<i64: 128, 1024>}, {transform_indices = @transform_1, window_bounds = array<i64: 128, 128>}, {transform_indices = @transform_2, window_bounds = array<i64: 128, 128>}, {transform_indices = @transform_3, window_bounds = array<i64: 128, 1>}, {pipeline_mode = #tpu.pipeline_mode<synchronous>, transform_indices = @transform_4, window_bounds = array<i64: 1024, 256>}, {pipeline_mode = #tpu.pipeline_mode<synchronous>, transform_indices = @transform_5, window_bounds = array<i64: 1, 256>}, {pipeline_mode = #tpu.pipeline_mode<synchronous>, transform_indices = @transform_6, window_bounds = array<i64: 256, 64>}, {pipeline_mode = #tpu.pipeline_mode<synchronous>, transform_indices = @transform_7, window_bounds = array<i64: 1, 64>}, {pipeline_mode = #tpu.pipeline_mode<synchronous>, transform_indices = @transform_8, window_bounds = array<i64: 64, 192>}, {pipeline_mode = #tpu.pipeline_mode<synchronous>, transform_indices = @transform_9, window_bounds = array<i64: 1, 192>}, {pipeline_mode = #tpu.pipeline_mode<synchronous>, transform_indices = @transform_10, window_bounds = array<i64: 1, 64>}, {pipeline_mode = #tpu.pipeline_mode<synchronous>, transform_indices = @transform_11, window_bounds = array<i64: 1, 64>}, {pipeline_mode = #tpu.pipeline_mode<synchronous>, transform_indices = @transform_12, window_bounds = array<i64: 64, 1>}, {pipeline_mode = #tpu.pipeline_mode<synchronous>, transform_indices = @transform_13, window_bounds = array<i64: 1, 1>}, {transform_indices = @transform_14, window_bounds = array<i64: 16, 1>}]} {
    %c0 = arith.constant 0 : index
    %c0_0 = arith.constant 0 : index
    %0 = vector.load %arg2[%c0, %c0_0] : memref<128x128xbf16, #tpu.memory_space<vmem>>, vector<128x128xbf16>
    %c0_1 = arith.constant 0 : index
    %c0_2 = arith.constant 0 : index
    %1 = vector.load %arg1[%c0_1, %c0_2] : memref<128x1024xbf16, #tpu.memory_space<vmem>>, vector<128x1024xbf16>
    %c0_3 = arith.constant 0 : index
    %c0_4 = arith.constant 0 : index
    %2 = vector.load %arg5[%c0_3, %c0_4] : memref<1024x256xbf16, #tpu.memory_space<vmem>>, vector<1024x256xbf16>
    %cst = arith.constant dense<0.000000e+00> : vector<128x256xf32>
    %3 = tpu.matmul %1, %2, %cst {dimension_numbers = #tpu.dot_dimension_numbers<[1], [0], [0], [1], [0, 0, 1, 1], [], []>} : vector<128x1024xbf16>, vector<1024x256xbf16>, vector<128x256xf32> -> vector<128x256xf32>
    %c0_5 = arith.constant 0 : index
    %c0_6 = arith.constant 0 : index
    %4 = vector.load %arg6[%c0_5, %c0_6] : memref<1x256xf32, #tpu.memory_space<vmem>>, vector<1x256xf32>
    %5 = vector.broadcast %4 : vector<1x256xf32> to vector<128x256xf32>
    %6 = arith.addf %3, %5 : vector<128x256xf32>
    %7 = arith.truncf %6 : vector<128x256xf32> to vector<128x256xbf16>
    %cst_7 = arith.constant dense<0.000000e+00> : vector<128x256xf32>
    %8 = tpu.matmul %0, %7, %cst_7 {dimension_numbers = #tpu.dot_dimension_numbers<[1], [0], [0], [1], [0, 0, 1, 1], [], []>} : vector<128x128xbf16>, vector<128x256xbf16>, vector<128x256xf32> -> vector<128x256xf32>
    %cst_8 = arith.constant 0.000000e+00 : f32
    %9 = vector.broadcast %cst_8 : f32 to vector<128x256xf32>
    %10 = arith.maximumf %8, %9 : vector<128x256xf32>
    %11 = arith.truncf %10 : vector<128x256xf32> to vector<128x256xbf16>
    %c0_9 = arith.constant 0 : index
    %c0_10 = arith.constant 0 : index
    %12 = vector.load %arg7[%c0_9, %c0_10] : memref<256x64xbf16, #tpu.memory_space<vmem>>, vector<256x64xbf16>
    %cst_11 = arith.constant dense<0.000000e+00> : vector<128x64xf32>
    %13 = tpu.matmul %11, %12, %cst_11 {dimension_numbers = #tpu.dot_dimension_numbers<[1], [0], [0], [1], [0, 0, 1, 1], [], []>} : vector<128x256xbf16>, vector<256x64xbf16>, vector<128x64xf32> -> vector<128x64xf32>
    %c0_12 = arith.constant 0 : index
    %c0_13 = arith.constant 0 : index
    %14 = vector.load %arg8[%c0_12, %c0_13] : memref<1x64xf32, #tpu.memory_space<vmem>>, vector<1x64xf32>
    %15 = vector.broadcast %14 : vector<1x64xf32> to vector<128x64xf32>
    %16 = arith.addf %13, %15 : vector<128x64xf32>
    %17 = arith.truncf %16 : vector<128x64xf32> to vector<128x64xbf16>
    %cst_14 = arith.constant dense<0.000000e+00> : vector<128x64xf32>
    %18 = tpu.matmul %0, %17, %cst_14 {dimension_numbers = #tpu.dot_dimension_numbers<[1], [0], [0], [1], [0, 0, 1, 1], [], []>} : vector<128x128xbf16>, vector<128x64xbf16>, vector<128x64xf32> -> vector<128x64xf32>
    %19 = vector.extract_strided_slice %18 {offsets = [0, 0], sizes = [128, 1], strides = [1, 1]} : vector<128x64xf32> to vector<128x1xf32>
    %20 = tpu.transpose %19, [1, 0] : vector<128x1xf32> -> vector<1x128xf32>
    %21 = tpu.iota {dimensions = array<i32: 1>} : vector<1x64xi32>
    %c63_i32 = arith.constant 63 : i32
    %22 = vector.broadcast %c63_i32 : i32 to vector<1x64xi32>
    %23 = arith.cmpi eq, %21, %22 : vector<1x64xi32>
    %24 = arith.extui %23 : vector<1x64xi1> to vector<1x64xi32>
    %25 = arith.sitofp %24 : vector<1x64xi32> to vector<1x64xf32>
    %c0_15 = arith.constant 0 : index
    %c0_16 = arith.constant 0 : index
    %26 = vector.load %arg4[%c0_15, %c0_16] : memref<128x1xf32, #tpu.memory_space<vmem>>, vector<128x1xf32>
    %27 = vector.broadcast %26 : vector<128x1xf32> to vector<128x64xf32>
    %28 = vector.broadcast %25 : vector<1x64xf32> to vector<128x64xf32>
    %29 = arith.mulf %27, %28 : vector<128x64xf32>
    %30 = arith.addf %18, %29 : vector<128x64xf32>
    %c0_17 = arith.constant 0 : index
    %c0_18 = arith.constant 0 : index
    %31 = vector.load %arg9[%c0_17, %c0_18] : memref<64x192xf32, #tpu.memory_space<vmem>>, vector<64x192xf32>
    %cst_19 = arith.constant dense<0.000000e+00> : vector<128x192xf32>
    %32 = tpu.matmul %30, %31, %cst_19 {dimension_numbers = #tpu.dot_dimension_numbers<[1], [0], [0], [1], [0, 0, 1, 1], [], []>} : vector<128x64xf32>, vector<64x192xf32>, vector<128x192xf32> -> vector<128x192xf32>
    %c0_20 = arith.constant 0 : index
    %c0_21 = arith.constant 0 : index
    %33 = vector.load %arg10[%c0_20, %c0_21] : memref<1x192xf32, #tpu.memory_space<vmem>>, vector<1x192xf32>
    %34 = vector.broadcast %33 : vector<1x192xf32> to vector<128x192xf32>
    %35 = arith.addf %32, %34 : vector<128x192xf32>
    %36 = vector.extract_strided_slice %35 {offsets = [0, 0], sizes = [128, 64], strides = [1, 1]} : vector<128x192xf32> to vector<128x64xf32>
    %37 = vector.extract_strided_slice %35 {offsets = [0, 64], sizes = [128, 64], strides = [1, 1]} : vector<128x192xf32> to vector<128x64xf32>
    %38 = vector.extract_strided_slice %35 {offsets = [0, 128], sizes = [128, 64], strides = [1, 1]} : vector<128x192xf32> to vector<128x64xf32>
    %cst_22 = arith.constant dense<0.000000e+00> : vector<128x128xf32>
    %39 = tpu.matmul %36, %37, %cst_22 {dimension_numbers = #tpu.dot_dimension_numbers<[1], [1], [0], [0], [0, 0, 1, 0], [], []>} : vector<128x64xf32>, vector<128x64xf32>, vector<128x128xf32> -> vector<128x128xf32>
    %cst_23 = arith.constant 1.250000e-01 : f32
    %40 = vector.broadcast %cst_23 : f32 to vector<128x128xf32>
    %41 = arith.mulf %39, %40 : vector<128x128xf32>
    %c0_24 = arith.constant 0 : index
    %c0_25 = arith.constant 0 : index
    %42 = vector.load %arg3[%c0_24, %c0_25] : memref<128x128xf32, #tpu.memory_space<vmem>>, vector<128x128xf32>
    %43 = arith.addf %41, %42 : vector<128x128xf32>
    %cst_26 = arith.constant 0.000000e+00 : f32
    %44 = vector.broadcast %cst_26 : f32 to vector<1x128xf32>
    %45 = arith.cmpf oeq, %20, %44 : vector<1x128xf32>
    %cst_27 = arith.constant -1.000000e+09 : f32
    %46 = vector.shape_cast %45 : vector<1x128xi1> to vector<1x128xi1>
    %47 = vector.broadcast %46 : vector<1x128xi1> to vector<128x128xi1>
    %48 = vector.broadcast %cst_27 : f32 to vector<128x128xf32>
    %49 = arith.select %47, %48, %43 : vector<128x128xi1>, vector<128x128xf32>
    %cst_28 = arith.constant dense<0xFF800000> : vector<128xf32>
    %50 = vector.multi_reduction <maximumf>, %49, %cst_28 [1] : vector<128x128xf32> to vector<128xf32>
    %51 = vector.shape_cast %50 : vector<128xf32> to vector<128x1xf32>
    %52 = vector.broadcast %51 : vector<128x1xf32> to vector<128x128xf32>
    %53 = arith.subf %49, %52 : vector<128x128xf32>
    %54 = math.exp %53 : vector<128x128xf32>
    %cst_29 = arith.constant dense<0.000000e+00> : vector<128xf32>
    %55 = vector.multi_reduction <add>, %54, %cst_29 [1] : vector<128x128xf32> to vector<128xf32>
    %56 = vector.shape_cast %55 : vector<128xf32> to vector<128x1xf32>
    %57 = tpu.reciprocal %56 {approx = true} : vector<128x1xf32> -> vector<128x1xf32>
    %58 = vector.broadcast %57 : vector<128x1xf32> to vector<128x128xf32>
    %59 = arith.mulf %54, %58 : vector<128x128xf32>
    %60 = arith.truncf %59 : vector<128x128xf32> to vector<128x128xbf16>
    %61 = arith.truncf %38 : vector<128x64xf32> to vector<128x64xbf16>
    %cst_30 = arith.constant dense<0.000000e+00> : vector<128x64xf32>
    %62 = tpu.matmul %60, %61, %cst_30 {dimension_numbers = #tpu.dot_dimension_numbers<[1], [0], [0], [1], [0, 0, 1, 1], [], []>} : vector<128x128xbf16>, vector<128x64xbf16>, vector<128x64xf32> -> vector<128x64xf32>
    %63 = vector.shape_cast %62 : vector<128x64xf32> to vector<16x8x64xf32>
    %cst_31 = arith.constant dense<0.000000e+00> : vector<16x64xf32>
    %64 = vector.multi_reduction <add>, %63, %cst_31 [1] : vector<16x8x64xf32> to vector<16x64xf32>
    %cst_32 = arith.constant 8.000000e+00 : f32
    %65 = vector.broadcast %cst_32 : f32 to vector<16x64xf32>
    %66 = arith.divf %64, %65 : vector<16x64xf32>
    %cst_33 = arith.constant dense<0.000000e+00> : vector<16xf32>
    %67 = vector.multi_reduction <add>, %66, %cst_33 [1] : vector<16x64xf32> to vector<16xf32>
    %68 = vector.shape_cast %67 : vector<16xf32> to vector<16x1xf32>
    %cst_34 = arith.constant 6.400000e+01 : f32
    %69 = vector.broadcast %cst_34 : f32 to vector<16x1xf32>
    %70 = arith.divf %68, %69 : vector<16x1xf32>
    %71 = vector.broadcast %70 : vector<16x1xf32> to vector<16x64xf32>
    %72 = arith.subf %66, %71 : vector<16x64xf32>
    %73 = vector.broadcast %70 : vector<16x1xf32> to vector<16x64xf32>
    %74 = arith.subf %66, %73 : vector<16x64xf32>
    %75 = arith.mulf %72, %74 : vector<16x64xf32>
    %cst_35 = arith.constant dense<0.000000e+00> : vector<16xf32>
    %76 = vector.multi_reduction <add>, %75, %cst_35 [1] : vector<16x64xf32> to vector<16xf32>
    %77 = vector.shape_cast %76 : vector<16xf32> to vector<16x1xf32>
    %cst_36 = arith.constant 6.400000e+01 : f32
    %78 = vector.broadcast %cst_36 : f32 to vector<16x1xf32>
    %79 = arith.divf %77, %78 : vector<16x1xf32>
    %80 = vector.broadcast %70 : vector<16x1xf32> to vector<16x64xf32>
    %81 = arith.subf %66, %80 : vector<16x64xf32>
    %cst_37 = arith.constant 9.99999974E-6 : f32
    %82 = vector.broadcast %cst_37 : f32 to vector<16x1xf32>
    %83 = arith.addf %79, %82 : vector<16x1xf32>
    %84 = math.rsqrt %83 : vector<16x1xf32>
    %85 = vector.broadcast %84 : vector<16x1xf32> to vector<16x64xf32>
    %86 = arith.mulf %81, %85 : vector<16x64xf32>
    %c0_38 = arith.constant 0 : index
    %c0_39 = arith.constant 0 : index
    %87 = vector.load %arg11[%c0_38, %c0_39] : memref<1x64xf32, #tpu.memory_space<vmem>>, vector<1x64xf32>
    %88 = vector.broadcast %87 : vector<1x64xf32> to vector<16x64xf32>
    %89 = arith.mulf %86, %88 : vector<16x64xf32>
    %c0_40 = arith.constant 0 : index
    %c0_41 = arith.constant 0 : index
    %90 = vector.load %arg12[%c0_40, %c0_41] : memref<1x64xf32, #tpu.memory_space<vmem>>, vector<1x64xf32>
    %91 = vector.broadcast %90 : vector<1x64xf32> to vector<16x64xf32>
    %92 = arith.addf %89, %91 : vector<16x64xf32>
    %c0_42 = arith.constant 0 : index
    %c0_43 = arith.constant 0 : index
    %93 = vector.load %arg13[%c0_42, %c0_43] : memref<64x1xf32, #tpu.memory_space<vmem>>, vector<64x1xf32>
    %cst_44 = arith.constant dense<0.000000e+00> : vector<16x1xf32>
    %94 = tpu.matmul %92, %93, %cst_44 {dimension_numbers = #tpu.dot_dimension_numbers<[1], [0], [0], [1], [0, 0, 1, 1], [], []>} : vector<16x64xf32>, vector<64x1xf32>, vector<16x1xf32> -> vector<16x1xf32>
    %c0_45 = arith.constant 0 : index
    %c0_46 = arith.constant 0 : index
    %95 = vector.load %arg14[%c0_45, %c0_46] : memref<1x1xf32, #tpu.memory_space<vmem>>, vector<1x1xf32>
    %96 = vector.broadcast %95 : vector<1x1xf32> to vector<16x1xf32>
    %97 = arith.addf %94, %96 : vector<16x1xf32>
    %cst_47 = arith.constant 0.000000e+00 : f32
    %98 = vector.broadcast %cst_47 : f32 to vector<16x1xf32>
    %99 = arith.subf %98, %97 : vector<16x1xf32>
    %100 = math.exp %99 : vector<16x1xf32>
    %cst_48 = arith.constant 1.000000e+00 : f32
    %101 = vector.broadcast %cst_48 : f32 to vector<16x1xf32>
    %102 = arith.addf %101, %100 : vector<16x1xf32>
    %cst_49 = arith.constant 1.000000e+00 : f32
    %103 = vector.broadcast %cst_49 : f32 to vector<16x1xf32>
    %104 = arith.divf %103, %102 : vector<16x1xf32>
    %c0_50 = arith.constant 0 : index
    %c0_51 = arith.constant 0 : index
    %105 = vector.load %arg15[%c0_50, %c0_51] : memref<16x1xf32, #tpu.memory_space<vmem>>, vector<16x1xf32>
    tpu.vector_store %arg15[%c0_50, %c0_51], %104 {strides = array<i32>} : memref<16x1xf32, #tpu.memory_space<vmem>>, vector<16x1xf32>,
    return
  }
  func.func @transform_0(%arg0: i32) -> (i32, i32) {
    %c0_i32 = arith.constant 0 : i32
    %c0_i32_0 = arith.constant 0 : i32
    return %arg0, %c0_i32 : i32, i32
  }
  func.func @transform_1(%arg0: i32) -> (i32, i32) {
    %c0_i32 = arith.constant 0 : i32
    %c0_i32_0 = arith.constant 0 : i32
    return %arg0, %c0_i32 : i32, i32
  }
  func.func @transform_2(%arg0: i32) -> (i32, i32) {
    %c0_i32 = arith.constant 0 : i32
    %c0_i32_0 = arith.constant 0 : i32
    return %arg0, %c0_i32 : i32, i32
  }
  func.func @transform_3(%arg0: i32) -> (i32, i32) {
    %c0_i32 = arith.constant 0 : i32
    %c0_i32_0 = arith.constant 0 : i32
    return %arg0, %c0_i32 : i32, i32
  }
  func.func @transform_4(%arg0: i32) -> (i32, i32) {
    %c0_i32 = arith.constant 0 : i32
    %c0_i32_0 = arith.constant 0 : i32
    %c0_i32_1 = arith.constant 0 : i32
    return %c0_i32, %c0_i32_0 : i32, i32
  }
  func.func @transform_5(%arg0: i32) -> (i32, i32) {
    %c0_i32 = arith.constant 0 : i32
    %c0_i32_0 = arith.constant 0 : i32
    %c0_i32_1 = arith.constant 0 : i32
    return %c0_i32, %c0_i32_0 : i32, i32
  }
  func.func @transform_6(%arg0: i32) -> (i32, i32) {
    %c0_i32 = arith.constant 0 : i32
    %c0_i32_0 = arith.constant 0 : i32
    %c0_i32_1 = arith.constant 0 : i32
    return %c0_i32, %c0_i32_0 : i32, i32
  }
  func.func @transform_7(%arg0: i32) -> (i32, i32) {
    %c0_i32 = arith.constant 0 : i32
    %c0_i32_0 = arith.constant 0 : i32
    %c0_i32_1 = arith.constant 0 : i32
    return %c0_i32, %c0_i32_0 : i32, i32
  }
  func.func @transform_8(%arg0: i32) -> (i32, i32) {
    %c0_i32 = arith.constant 0 : i32
    %c0_i32_0 = arith.constant 0 : i32
    %c0_i32_1 = arith.constant 0 : i32
    return %c0_i32, %c0_i32_0 : i32, i32
  }
  func.func @transform_9(%arg0: i32) -> (i32, i32) {
    %c0_i32 = arith.constant 0 : i32
    %c0_i32_0 = arith.constant 0 : i32
    %c0_i32_1 = arith.constant 0 : i32
    return %c0_i32, %c0_i32_0 : i32, i32
  }
  func.func @transform_10(%arg0: i32) -> (i32, i32) {
    %c0_i32 = arith.constant 0 : i32
    %c0_i32_0 = arith.constant 0 : i32
    %c0_i32_1 = arith.constant 0 : i32
    return %c0_i32, %c0_i32_0 : i32, i32
  }
  func.func @transform_11(%arg0: i32) -> (i32, i32) {
    %c0_i32 = arith.constant 0 : i32
    %c0_i32_0 = arith.constant 0 : i32
    %c0_i32_1 = arith.constant 0 : i32
    return %c0_i32, %c0_i32_0 : i32, i32
  }
  func.func @transform_12(%arg0: i32) -> (i32, i32) {
    %c0_i32 = arith.constant 0 : i32
    %c0_i32_0 = arith.constant 0 : i32
    %c0_i32_1 = arith.constant 0 : i32
    return %c0_i32, %c0_i32_0 : i32, i32
  }
  func.func @transform_13(%arg0: i32) -> (i32, i32) {
    %c0_i32 = arith.constant 0 : i32
    %c0_i32_0 = arith.constant 0 : i32
    %c0_i32_1 = arith.constant 0 : i32
    return %c0_i32, %c0_i32_0 : i32, i32
  }
  func.func @transform_14(%arg0: i32) -> (i32, i32) {
    %c0_i32 = arith.constant 0 : i32
    %c0_i32_0 = arith.constant 0 : i32
    return %arg0, %c0_i32 : i32, i32
  }
}

</mosaic_0001>

<bundles_post_ra>
// kernel: tpu_custom_call.1
= control target key start
LH: loop header
LB: loop body
LE: loop exit
PB: predicated region body
PF: predicated region fallthrough
CT: control target
= control target key end

     0   :  { %s6951_s0 = inlined_call_operand.hbm [shape: bf16[256,1024], index: 0, kind: input, shape index: {}]   ;;  %s6952_s1 = inlined_call_operand.vmem [shape: bf16[256,128], index: 1, kind: input, shape index: {}]   ;;  %s6953_s2 = inlined_call_operand.vmem [shape: f32[256,128], index: 2, kind: input, shape index: {}]   ;;  %s6954_s3 = inlined_call_operand.vmem [shape: f32[256,1], index: 3, kind: input, shape index: {}]   ;;  %s6955_s4 = inlined_call_operand.hbm [shape: bf16[1024,256], index: 4, kind: input, shape index: {}]   ;;  %s6956_s5 = inlined_call_operand.vmem [shape: f32[1,256], index: 5, kind: input, shape index: {}]   ;;  %s6957_s6 = inlined_call_operand.vmem [shape: bf16[256,64], index: 6, kind: input, shape index: {}]   ;;  %s6958_s7 = inlined_call_operand.vmem [shape: f32[1,64], index: 7, kind: input, shape index: {}]   ;;  %s6959_s8 = inlined_call_operand.vmem [shape: f32[64,192], index: 8, kind: input, shape index: {}]   ;;  %s6960_s9 = inlined_call_operand.vmem [shape: f32[1,192], index: 9, kind: input, shape index: {}]   ;;  %s6961_s10 = inlined_call_operand.vmem [shape: f32[1,64], index: 10, kind: input, shape index: {}]   ;;  %s6962_s11 = inlined_call_operand.vmem [shape: f32[1,64], index: 11, kind: input, shape index: {}]   ;;  %s6963_s12 = inlined_call_operand.vmem [shape: f32[64,1], index: 12, kind: input, shape index: {}]   ;;  %s6964_s13 = inlined_call_operand.<no memory space> [shape: f32[1,1], index: 13, kind: input, shape index: {}]   ;;  %s6965_s14 = inlined_call_operand.vmem [shape: f32[32,1], index: 14, kind: output, shape index: {}]  }
   0x1   :  { %6972 = sst [smem:[#allocation10_spill]] %s6961_s10  ;;  %v19_v0 = vstv %s6964_s13 }
   0x2   :  { %6973 = sst [smem:[#allocation11_spill]] %s6962_s11  ;;  %20 = vst [vmem:[#allocation2] sm:$0x1] %v19_v0 }
   0x3   :  { %6974 = sst [smem:[#allocation12_spill]] %s6963_s12 }
   0x4   :  { %6975 = sst [smem:[#allocation13_spill]] %s6965_s14 }
   0x5   :  { %21 = vsyncpa [#allocation4], 0 }
   0x6   :  { %23 = vsyncpa [#allocation4 + $0x1], 0 }
   0x7   :  { %24 = vsyncpa [#allocation6], 0  ;;  %s5772_s15 = smov 0   ;;  %s5774_s16 = smov 0  }
   0x8   :  { %s5776_s17 = smov 0   ;;  %s5778_s18 = smov 0  }
   0x9 LB: > { %s5791_s13 = sadd.s32 4294967295, %s5683_s18   ;;  %p50_p0 = scmp.ne.s32.totalorder %s5675_s16, %s5671_s15  ;;  %s5683_s18 = sphi %s5778_s18, %s6993_s18   ;;  %s5679_s17 = sphi %s5776_s17, %s6996_s17   ;;  %s5675_s16 = sphi %s5774_s16, %s6995_s16   ;;  %s5671_s15 = sphi %s5772_s15, %s6994_s15  }
   0xa   : > { %p6966_p1 = scmp.eq.s32.totalorder %s5791_s13, 0  ;;  %p4418_p2 = scmp.ge.s32.totalorder %s5683_s18, 1 }
   0xb   : > { %p375_p3 = scmp.lt.s32.totalorder %s5683_s18, 3  ;;  %s5685_s21 = smov [#allocation5]  }
   0xc   : > { %p5799_p4 = por %p6966_p1, %p50_p0  ;;  %s387_s22 = sshll.u32 %s5685_s21, 4  ;;  %s388_s22 = int_to_ptr.vmem [resolvable:$true] %s387_s22 }
   0xd   : > { %p5803_p5 = pnand %p4418_p2, %p375_p3  ;;  %s5816_s24 = sadd.s32 1, %s5683_s18  }
   0xe   : > { %s6976_s19 = scalar_select %p5799_p4, 1, 0 }
   0xf   : > { %s6977_s20 = scalar_select %p5803_p5, 1, 0 }
  0x10   : > { %p5202_p6 = pneg %p5803_p5  ;;  %6979 = sst [smem:[#allocation9_spill]] %s5816_s24 }
  0x11   : > { %s37_s25 = sadd.s32 1, %s5679_s17  ;;  %s34_s26 = ssub.s32 %s5683_s18, %s5816_s24 }
  0x12   : > { %p5811_p7 = pnand %p5202_p6, %p6966_p1  ;;  %s5587_s29 = scalar_lea.hbm %s6955_s4, 16384 }
  0x13   : > { %p5588_p8 = scmp.ne.s32.totalorder %s6955_s4, %s5587_s29  ;;  %p5594_p12 = scmp.lt.u32.totalorder %s5587_s29, %s6955_s4 }
  0x14   : > { %p5589_p9 = pneg %p5811_p7 }
  0x16   : > { %p5590_p10 = pnand %p5589_p9, %p5588_p8 }
  0x18   : > { %p5591_p11 = pneg %p5590_p10 }
  0x1a   : > { %p5596_p13 = pnand %p5594_p12, %p5591_p11 }
  0x1c   : > { %5599 = shalt.err (!%p5596_p13)
}
  0x1d   : > { %s5600_s11 = scalar_lea.vmem %s388_s22, 16384  ;;  %p5608_p6 = scmp.lt.s32.totalorder %s388_s22, %s388_s22 }
  0x1e   : > { %p5601_p0 = scmp.ne.s32.totalorder %s388_s22, %s5600_s11  ;;  %p5609_p1 = scmp.lt.s32.totalorder %s5600_s11, %s5600_s11 }
  0x20   : > { %p5603_p2 = pnand %p5601_p0, %p5589_p9  ;;  %p5610_p4 = por %p5609_p1, %p5608_p6 }
  0x22   : > { %p5604_p3 = pneg %p5603_p2 }
  0x24   : > { %p5611_p5 = pnand %p5610_p4, %p5604_p3 }
  0x26   : > { %5614 = shalt.err (!%p5611_p5)
}
  0x27   : > { %s5686_s27 = smov 128   ;;  %s5687_s14 = smov 8  }
  0x28   : > { %5205 = dma.hbm_to_vmem [thread:$0]  (!%p5811_p7), %s6955_s4, 16384, %s388_s22, [#allocation6], %s5686_s27, %s5686_s27, %s5687_s14  }
  0x29   : > { %p35_p8 = scmp.eq.s32.totalorder %s34_s26, 0  ;;  %p44_p9 = scmp.ne.s32.totalorder %s5679_s17, %s5675_s16 }
  0x2a   : > { %p45_p1 = scmp.eq.s32.totalorder %s5683_s18, 0  ;;  %p5211_p4 = scmp.lt.s32.totalorder %s5683_s18, 2 }
  0x2b   : > { %s5842_s11 = scalar_select %p35_p8, %s5679_s17, %s37_s25  }
  0x2c   : > { %p46_p5 = por %p45_p1, %p44_p9  ;;  %s428_s30 = sand.u32 1, %s5679_s17  }
  0x2d   : > { %s4421_s15 = sshll.u32 %s428_s30, 9  ;;  %s4710_s21 = sshll.u32 %s5683_s18, 13 }
  0x2e   : > { %s5849_s12 = scalar_lea.hbm %s6951_s0, %s4710_s21  ;;  %s432_s22 = scalar_lea.vmem [#allocation3], %s4421_s15 }
  0x2f   : > { %s440_s23 = sshll.u32 %s432_s22, 4  ;;  %p5853_p7 = pnand %p5211_p4, %p46_p5  ;;  %s5851_s23 = int_to_ptr.vmem [resolvable:$true] %s440_s23 }
  0x30   : > { %s5857_s18 = scalar_lea.sflag [#allocation4], %s428_s30  ;;  %s5615_s26 = scalar_lea.hbm %s5849_s12, 8192 }
  0x31   : > { %p5616_p10 = scmp.ne.s32.totalorder %s5849_s12, %s5615_s26  ;;  %p5617_p11 = pneg %p5853_p7 }
  0x32   : > { %s5620_s27 = scalar_lea.hbm %s6951_s0, 16384  ;;  %p5621_p0 = scmp.lt.u32.totalorder %s5849_s12, %s6951_s0 }
  0x33   : > { %p5618_p12 = pnand %p5617_p11, %p5616_p10  ;;  %p5622_p2 = scmp.lt.u32.totalorder %s5620_s27, %s5615_s26 }
  0x34   : > { %p5624_p6 = scmp.lt.u32.totalorder %s5615_s26, %s5849_s12 }
  0x35   : > { %p5619_p13 = pneg %p5618_p12  ;;  %p5623_p3 = por %p5622_p2, %p5621_p0 }
  0x37   : > { %p5625_p8 = por %p5624_p6, %p5623_p3 }
  0x39   : > { %p5626_p9 = pnand %p5625_p8, %p5619_p13 }
  0x3b   : > { %5629 = shalt.err (!%p5626_p9)
}
  0x3c   : > { %s5630_s29 = scalar_lea.vmem %s5851_s23, 8192  ;;  %s5688_s30 = smov [#allocation3]  }
  0x3d   : > { %p5631_p1 = scmp.ne.s32.totalorder %s5851_s23, %s5630_s29  ;;  %s5635_s15 = sshll.u32 %s5688_s30, 4  ;;  %s5636_s15 = int_to_ptr.vmem [resolvable:$false] %s5635_s15 }
  0x3e   : > { %s5637_s21 = scalar_lea.vmem %s5636_s15, 16384  ;;  %p5638_p10 = scmp.lt.s32.totalorder %s5851_s23, %s5636_s15 }
  0x3f   : > { %p5633_p4 = pnand %p5631_p1, %p5617_p11  ;;  %p5639_p12 = scmp.lt.s32.totalorder %s5637_s21, %s5630_s29 }
  0x41   : > { %p5634_p5 = pneg %p5633_p4  ;;  %p5640_p0 = por %p5639_p12, %p5638_p10 }
  0x43   : > { %p5641_p2 = pnand %p5640_p0, %p5634_p5 }
  0x45   : > { %5644 = shalt.err (!%p5641_p2)
}
  0x46   : > { %s5689_s22 = smov 512   ;;  %s5690_s26 = smov 32  }
  0x47   : > { %5209 = dma.hbm_to_vmem [thread:$0]  (!%p5853_p7), %s5849_s12, 8192, %s5851_s23, %s5857_s18, %s5689_s22, %s5689_s22, %s5690_s26  }
  0x48   : > { %p6981_p11 = scmp.ne.s32.totalorder %s6977_s20, 0 }
  0x49   : > { %s481_s10 = sand.u32 (!%p6981_p11), 1, %s5675_s16   ;;  %p6982_p13 = scmp.ne.s32.totalorder (!%p6981_p11), %s6976_s19, 0 }
  0x4a   : > { %479 = sbr.rel (%p6981_p11) target bundleno = 3140 (0xc44), region = 76  ;;  %s4426_s24 = sshll.u32 (!%p6981_p11), %s481_s10, 9 }
  0x4b   : > { %s482_s27 = scalar_lea.sflag (!%p6981_p11), [#allocation4], %s481_s10  ;;  %s5888_s14 = scalar_lea.vmem (!%p6981_p11), [#allocation3], %s4426_s24 }
  0x51   : > { %5662 = dma.done.wait (%p6982_p13), %s482_s27, 8192  }
  0x52   : > { %5664 = vsyncadd (%p6982_p13), %s482_s27, 4294959104  ;;  %p6983_p3 = scmp.eq.s32.totalorder %s5791_s13, 0 }
  0x54   : > { %5666 = dma.done.wait (%p6983_p3), [#allocation6], 16384   ;;  %p6984_p7 = pmov %p6983_p3 }
  0x55   : > { %v5295_v1 = vld [vmem:[#allocation5 + $0x4] ss:$8 sps:$4 sm:$0xff]   ;;  %v5297_v2 = vld [vmem:[#allocation5] ss:$8 sps:$4 sm:$0xff]   ;;  %v5298_v3 = vld [vmem:[#allocation5 + $0x14] ss:$8 sps:$4 sm:$0xff]  }
  0x56   : > { %5668 = vsyncadd (%p6984_p7), [#allocation6], 4294950912  ;;  %1755 = vmatprep.subr.bf16.mxu0 %v5295_v1  ;;  %v5300_v4 = vld [vmem:[#allocation5 + $0x10] ss:$8 sps:$4 sm:$0xff]   ;;  %v5301_v5 = vld [vmem:[#allocation5 + $0x24] ss:$8 sps:$4 sm:$0xff]  }
  0x57   : > { %1756 = vmatpush1.bf16.msra.mxu0 %v5297_v2  ;;  %v5303_v6 = vld [vmem:[#allocation5 + $0x20] ss:$8 sps:$4 sm:$0xff]   ;;  %v5304_v7 = vld [vmem:[#allocation5 + $0x34] ss:$8 sps:$4 sm:$0xff]   ;;  %v5306_v8 = vld [vmem:[#allocation5 + $0x30] ss:$8 sps:$4 sm:$0xff]  }
  0x58   : > { %1757 = vmatprep.subr.bf16.mxu0 %v5298_v3  ;;  %v5307_v9 = vld [vmem:[#allocation5 + $0x44] ss:$8 sps:$4 sm:$0xff]   ;;  %v5309_v10 = vld [vmem:[#allocation5 + $0x40] ss:$8 sps:$4 sm:$0xff]   ;;  %v5310_v11 = vld [vmem:[#allocation5 + $0x54] ss:$8 sps:$4 sm:$0xff]  }
  0x59   : > { %v5312_v12 = vld [vmem:[#allocation5 + $0x50] ss:$8 sps:$4 sm:$0xff]   ;;  %v5313_v13 = vld [vmem:[#allocation5 + $0x64] ss:$8 sps:$4 sm:$0xff]   ;;  %v5315_v17 = vld [vmem:[#allocation5 + $0x60] ss:$8 sps:$4 sm:$0xff]  }
  0x5a   : > { %v591_v14 = vld [vmem:[%s5888_s14] sm:$0xff]  ;;  %v5316_v18 = vld [vmem:[#allocation5 + $0x74] ss:$8 sps:$4 sm:$0xff]   ;;  %v5318_v19 = vld [vmem:[#allocation5 + $0x70] ss:$8 sps:$4 sm:$0xff]   ;;  %s4428_s12 = sshll.u32 %s5791_s13, 4 }
  0x5b   : > { %1758 = vmatpush1.bf16.msra.mxu0 %v5300_v4  ;;  %v595_v15 = vld [vmem:[%s5888_s14 + $0x20] sm:$0xff]  ;;  %v5322_v22 = vld [vmem:[#allocation5 + $0x94] ss:$8 sps:$4 sm:$0xff]   ;;  %v5324_v23 = vld [vmem:[#allocation5 + $0x90] ss:$8 sps:$4 sm:$0xff]   ;;  %p551_p6 = scmp.lt.s32.totalorder %s4428_s12, 31 }
  0x5c   : > { %1759 = vmatprep.subr.bf16.mxu0 %v5301_v5  ;;  %v4437_v16 = vcombine.high %v591_v14, %v595_v15  ;;  %v5319_v20 = vld [vmem:[#allocation5 + $0x84] ss:$8 sps:$4 sm:$0xff]   ;;  %v5321_v21 = vld [vmem:[#allocation5 + $0x80] ss:$8 sps:$4 sm:$0xff]   ;;  %v5328_v26 = vld [vmem:[#allocation5 + $0xb4] ss:$8 sps:$4 sm:$0xff]   ;;  %v4436_v39 = vcombine.low %v591_v14, %v595_v15 }
  0x5d   : > { %v5325_v24 = vld [vmem:[#allocation5 + $0xa4] ss:$8 sps:$4 sm:$0xff]   ;;  %v5327_v25 = vld [vmem:[#allocation5 + $0xa0] ss:$8 sps:$4 sm:$0xff]   ;;  %v5330_v27 = vld [vmem:[#allocation5 + $0xb0] ss:$8 sps:$4 sm:$0xff]  }
  0x5e   : > { %1787 = vmatprep.mubr.bf16.mxu0 %v4437_v16  ;;  %v5331_v28 = vld [vmem:[#allocation5 + $0xc4] ss:$8 sps:$4 sm:$0xff]   ;;  %v5333_v29 = vld [vmem:[#allocation5 + $0xc0] ss:$8 sps:$4 sm:$0xff]   ;;  %v5334_v30 = vld [vmem:[#allocation5 + $0xd4] ss:$8 sps:$4 sm:$0xff]  }
  0x5f   : > { %1760 = vmatpush1.bf16.msra.mxu0 %v5303_v6  ;;  %v5336_v31 = vld [vmem:[#allocation5 + $0xd0] ss:$8 sps:$4 sm:$0xff]   ;;  %v5337_v32 = vld [vmem:[#allocation5 + $0xe4] ss:$8 sps:$4 sm:$0xff]   ;;  %v5339_v33 = vld [vmem:[#allocation5 + $0xe0] ss:$8 sps:$4 sm:$0xff]  }
  0x60   : > { %1761 = vmatprep.subr.bf16.mxu0 %v5304_v7  ;;  %v5340_v34 = vld [vmem:[#allocation5 + $0xf4] ss:$8 sps:$4 sm:$0xff]   ;;  %v5342_v35 = vld [vmem:[#allocation5 + $0xf0] ss:$8 sps:$4 sm:$0xff]   ;;  %v5345_v36 = vld [vmem:[#allocation5 + $0x104] ss:$8 sps:$4 sm:$0xff]  }
  0x61   : > { %v599_v37 = vld [vmem:[%s5888_s14 + $0x40] sm:$0xff]  ;;  %v5348_v42 = vld [vmem:[#allocation5 + $0x114] ss:$8 sps:$4 sm:$0xff]   ;;  %v5346_v43 = vld [vmem:[#allocation5 + $0x110] ss:$8 sps:$4 sm:$0xff]   ;;  %s6998_s12 = smov (!%p551_p6, %s4428_s12), 31 }
  0x62   : > { %v603_v38 = vld [vmem:[%s5888_s14 + $0x60] sm:$0xff]  ;;  %v5354_v50 = vld [vmem:[#allocation5 + $0x134] ss:$8 sps:$4 sm:$0xff]   ;;  %v5352_v51 = vld [vmem:[#allocation5 + $0x130] ss:$8 sps:$4 sm:$0xff]   ;;  %s4429_s19 = sshll.u32 %s6998_s12, 2 }
  0x63   : > { %1762 = vmatpush1.bf16.msra.mxu0 %v5306_v8  ;;  %v5343_v40 = vld [vmem:[#allocation5 + $0x100] ss:$8 sps:$4 sm:$0xff]   ;;  %v4445_v41 = vcombine.high %v599_v37, %v603_v38  ;;  %v5351_v44 = vld [vmem:[#allocation5 + $0x124] ss:$8 sps:$4 sm:$0xff]   ;;  %v4444_v47 = vcombine.low %v599_v37, %v603_v38  ;;  %v5360_v58 = vld [vmem:[#allocation5 + $0x154] ss:$8 sps:$4 sm:$0xff]   ;;  %s5969_s25 = scalar_lea.vmem %s6952_s1, %s4429_s19 }
  0x64   : > { %1763 = vmatprep.subr.bf16.mxu0 %v5307_v9  ;;  %v607_v45 = vld [vmem:[%s5888_s14 + $0x80] sm:$0xff]  ;;  %v5358_v59 = vld [vmem:[#allocation5 + $0x150] ss:$8 sps:$4 sm:$0xff]   ;;  %v5366_v2 = vld [vmem:[#allocation5 + $0x174] ss:$8 sps:$4 sm:$0xff]   ;;  %vm2962_vm1 = vcmask 523264  }
  0x65   : > { %v611_v46 = vld [vmem:[%s5888_s14 + $0xa0] sm:$0xff]  ;;  %v5364_v3 = vld [vmem:[#allocation5 + $0x170] ss:$8 sps:$4 sm:$0xff]   ;;  %v600_v37 = vld [vmem:[%s5888_s14 + $0x48] sm:$0xff]  ;;  %s5693_s20 = smov 64   ;;  %vm3902_vm5 = vcmask 1041409  }
  0x66   : > { %v5349_v48 = vld [vmem:[#allocation5 + $0x120] ss:$8 sps:$4 sm:$0xff]   ;;  %v4453_v49 = vcombine.high %v607_v45, %v611_v46  ;;  %v5357_v52 = vld [vmem:[#allocation5 + $0x144] ss:$8 sps:$4 sm:$0xff]   ;;  %v4452_v55 = vcombine.low %v607_v45, %v611_v46  ;;  %vm6417_vm2 = vmpackc.low %vm2962_vm1, %vm2962_vm1  ;;  %vm3904_vm6 = vcmask 1042434   ;;  %vm3906_vm7 = vcmask 1043459  }
  0x67   : > { %1764 = vmatpush1.bf16.msra.mxu0 %v5309_v10  ;;  %v615_v53 = vld [vmem:[%s5888_s14 + $0xc0] sm:$0xff]  ;;  %v5372_v10 = vld [vmem:[#allocation5 + $0x194] ss:$8 sps:$4 sm:$0xff]   ;;  %v604_v38 = vld [vmem:[%s5888_s14 + $0x68] sm:$0xff]  ;;  %vm3908_vm8 = vcmask 1044484   ;;  %vm3910_vm9 = vcmask 1045509  }
  0x68   : > { %1765 = vmatprep.subr.bf16.mxu0 %v5310_v11  ;;  %v619_v54 = vld [vmem:[%s5888_s14 + $0xe0] sm:$0xff]  ;;  %v5370_v11 = vld [vmem:[#allocation5 + $0x190] ss:$8 sps:$4 sm:$0xff]   ;;  %v608_v45 = vld [vmem:[%s5888_s14 + $0x88] sm:$0xff]  ;;  %vm3912_vm10 = vcmask 1046534   ;;  %vm3914_vm11 = vcmask 1047559  }
  0x69   : > { %v5355_v56 = vld [vmem:[#allocation5 + $0x140] ss:$8 sps:$4 sm:$0xff]   ;;  %v4461_v57 = vcombine.high %v615_v53, %v619_v54  ;;  %v5363_v60 = vld [vmem:[#allocation5 + $0x164] ss:$8 sps:$4 sm:$0xff]   ;;  %v4460_v63 = vcombine.low %v615_v53, %v619_v54  ;;  %s6989_s29 = sld [smem:[#allocation12_spill]]  ;;  %s6990_s30 = sld [smem:[#allocation10_spill]] }
  0x6a   : > { %v623_v61 = vld [vmem:[%s5888_s14 + $0x100] sm:$0xff]  ;;  %v612_v46 = vld [vmem:[%s5888_s14 + $0xa8] sm:$0xff]  ;;  %s4434_s26 = sshll.u32 %s5791_s13, 1  ;;  %vm4300_vm12 = vcmask 7168  }
  0x6b   : > { %1766 = vmatpush1.bf16.msra.mxu0 %v5312_v12  ;;  %v627_v62 = vld [vmem:[%s5888_s14 + $0x120] sm:$0xff]  ;;  %v616_v53 = vld [vmem:[%s5888_s14 + $0xc8] sm:$0xff]  ;;  %p569_p8 = scmp.lt.s32.totalorder %s4434_s26, 3 }
  0x6c   : > { %1767 = vmatprep.subr.bf16.mxu0 %v5313_v13  ;;  %v5361_v0 = vld [vmem:[#allocation5 + $0x160] ss:$8 sps:$4 sm:$0xff]   ;;  %v4469_v1 = vcombine.high %v623_v61, %v627_v62  ;;  %v5369_v4 = vld [vmem:[#allocation5 + $0x184] ss:$8 sps:$4 sm:$0xff]   ;;  %v4468_v7 = vcombine.low %v623_v61, %v627_v62 }
  0x6d   : > { %v631_v5 = vld [vmem:[%s5888_s14 + $0x140] sm:$0xff]  ;;  %v620_v54 = vld [vmem:[%s5888_s14 + $0xe8] sm:$0xff]  ;;  %s7000_s26 = smov (!%p569_p8, %s4434_s26), 3 }
  0x6e   : > { %v635_v6 = vld [vmem:[%s5888_s14 + $0x160] sm:$0xff]  ;;  %v624_v61 = vld [vmem:[%s5888_s14 + $0x108] sm:$0xff]  ;;  %s4435_s10 = sshll.u32 %s7000_s26, 3 }
  0x6f   : > { %1768 = vmatpush1.bf16.msra.mxu0 %v5315_v17  ;;  %v5367_v8 = vld [vmem:[#allocation5 + $0x180] ss:$8 sps:$4 sm:$0xff]   ;;  %v4477_v9 = vcombine.high %v631_v5, %v635_v6  ;;  %v5375_v12 = vld [vmem:[#allocation5 + $0x1a4] ss:$8 sps:$4 sm:$0xff]   ;;  %v4476_v15 = vcombine.low %v631_v5, %v635_v6 }
  0x70   : > { %1769 = vmatprep.subr.bf16.mxu0 %v5316_v18  ;;  %v639_v13 = vld [vmem:[%s5888_s14 + $0x180] sm:$0xff]  ;;  %v5378_v18 = vld [vmem:[#allocation5 + $0x1b4] ss:$8 sps:$4 sm:$0xff]   ;;  %v628_v62 = vld [vmem:[%s5888_s14 + $0x128] sm:$0xff] }
  0x71   : > { %v643_v14 = vld [vmem:[%s5888_s14 + $0x1a0] sm:$0xff]  ;;  %v632_v5 = vld [vmem:[%s5888_s14 + $0x148] sm:$0xff] }
  0x72   : > { %v5373_v16 = vld [vmem:[#allocation5 + $0x1a0] ss:$8 sps:$4 sm:$0xff]   ;;  %v4485_v17 = vcombine.high %v639_v13, %v643_v14 }
  0x73   : > { %1770 = vmatpush1.bf16.msra.mxu0 %v5318_v19  ;;  %v5376_v19 = vld [vmem:[#allocation5 + $0x1b0] ss:$8 sps:$4 sm:$0xff]   ;;  %v636_v6 = vld [vmem:[%s5888_s14 + $0x168] sm:$0xff] }
  0x74   : > { %1771 = vmatprep.subr.bf16.mxu0 %v5319_v20  ;;  %v5381_v20 = vld [vmem:[#allocation5 + $0x1c4] ss:$8 sps:$4 sm:$0xff]  }
  0x77   : > { %1772 = vmatpush1.bf16.msra.mxu0 %v5321_v21  ;;  %v647_v21 = vld [vmem:[%s5888_s14 + $0x1c0] sm:$0xff] }
  0x78   : > { %1773 = vmatprep.subr.bf16.mxu0 %v5322_v22  ;;  %v651_v22 = vld [vmem:[%s5888_s14 + $0x1e0] sm:$0xff] }
  0x7b   : > { %1774 = vmatpush1.bf16.msra.mxu0 %v5324_v23  ;;  %v4484_v23 = vcombine.low %v639_v13, %v643_v14  ;;  %v640_v13 = vld [vmem:[%s5888_s14 + $0x188] sm:$0xff] }
  0x7c   : > { %1775 = vmatprep.subr.bf16.mxu0 %v5325_v24  ;;  %v5379_v24 = vld [vmem:[#allocation5 + $0x1c0] ss:$8 sps:$4 sm:$0xff]  }
  0x7d   : > { %v644_v14 = vld [vmem:[%s5888_s14 + $0x1a8] sm:$0xff] }
  0x7f   : > { %1776 = vmatpush1.bf16.msra.mxu0 %v5327_v25  ;;  %v4493_v25 = vcombine.high %v647_v21, %v651_v22 }
  0x80   : > { %1777 = vmatprep.subr.bf16.mxu0 %v5328_v26  ;;  %v5384_v26 = vld [vmem:[#allocation5 + $0x1d4] ss:$8 sps:$4 sm:$0xff]  }
  0x83   : > { %1778 = vmatpush1.bf16.msra.mxu0 %v5330_v27  ;;  %v5382_v27 = vld [vmem:[#allocation5 + $0x1d0] ss:$8 sps:$4 sm:$0xff]  }
  0x84   : > { %1779 = vmatprep.subr.bf16.mxu0 %v5331_v28  ;;  %v5387_v28 = vld [vmem:[#allocation5 + $0x1e4] ss:$8 sps:$4 sm:$0xff]  }
  0x87   : > { %1780 = vmatpush1.bf16.msra.mxu0 %v5333_v29  ;;  %v592_v29 = vld [vmem:[%s5888_s14 + $0x8] sm:$0xff] }
  0x88   : > { %1781 = vmatprep.subr.bf16.mxu0 %v5334_v30  ;;  %v596_v30 = vld [vmem:[%s5888_s14 + $0x28] sm:$0xff] }
  0x8b   : > { %1782 = vmatpush1.bf16.msra.mxu0 %v5336_v31  ;;  %v4492_v31 = vcombine.low %v647_v21, %v651_v22  ;;  %v648_v21 = vld [vmem:[%s5888_s14 + $0x1c8] sm:$0xff] }
  0x8c   : > { %1783 = vmatprep.subr.bf16.mxu0 %v5337_v32  ;;  %v5385_v32 = vld [vmem:[#allocation5 + $0x1e0] ss:$8 sps:$4 sm:$0xff]  }
  0x8d   : > { %v652_v22 = vld [vmem:[%s5888_s14 + $0x1e8] sm:$0xff] }
  0x8f   : > { %1784 = vmatpush1.bf16.msra.mxu0 %v5339_v33  ;;  %v4439_v33 = vcombine.high %v592_v29, %v596_v30 }
  0x90   : > { %1785 = vmatprep.subr.bf16.mxu0 %v5340_v34  ;;  %v5390_v34 = vld [vmem:[#allocation5 + $0x1f4] ss:$8 sps:$4 sm:$0xff]  }
  0x93   : > { %1786 = vmatpush1.bf16.msra.mxu0 %v5342_v35  ;;  %v5388_v35 = vld [vmem:[#allocation5 + $0x1f0] ss:$8 sps:$4 sm:$0xff]  }
  0x94   : > { %1868 = vmatprep.subr.bf16.mxu0 %v5345_v36  ;;  %v5393_v36 = vld [vmem:[#allocation5 + $0x204] ss:$8 sps:$4 sm:$0xff]  }
  0x96   : > { %1788 = vmatmul.mubr.bf16.vlgmr.msra.gmra.mrb[0].mxu0 %v4436_v39  ;;  %v4438_v39 = vcombine.low %v592_v29, %v596_v30  ;;  %v593_v29 = vld [vmem:[%s5888_s14 + $0x10] sm:$0xff] }
  0x97   : > { %1869 = vmatpush1.bf16.msra.mxu0 %v5343_v40  ;;  %1797 = vmatprep.mubr.bf16.mxu0 %v4445_v41  ;;  %v5391_v40 = vld [vmem:[#allocation5 + $0x200] ss:$8 sps:$4 sm:$0xff]   ;;  %v4447_v41 = vcombine.high %v600_v37, %v604_v38  ;;  %v597_v30 = vld [vmem:[%s5888_s14 + $0x30] sm:$0xff] }
  0x98   : > { %1870 = vmatprep.subr.bf16.mxu0 %v5348_v42  ;;  %v5396_v42 = vld [vmem:[#allocation5 + $0x214] ss:$8 sps:$4 sm:$0xff]  }
  0x9b   : > { %1871 = vmatpush1.bf16.msra.mxu0 %v5346_v43  ;;  %v5394_v43 = vld [vmem:[#allocation5 + $0x210] ss:$8 sps:$4 sm:$0xff]  }
  0x9c   : > { %1872 = vmatprep.subr.bf16.mxu0 %v5351_v44  ;;  %v5399_v44 = vld [vmem:[#allocation5 + $0x224] ss:$8 sps:$4 sm:$0xff]  }
  0x9e   : > { %1798 = vmatmul.mubr.bf16.gmra.mrb[4].mxu0 %v4444_v47  ;;  %v4446_v47 = vcombine.low %v600_v37, %v604_v38  ;;  %v601_v37 = vld [vmem:[%s5888_s14 + $0x50] sm:$0xff] }
  0x9f   : > { %1873 = vmatpush1.bf16.msra.mxu0 %v5349_v48  ;;  %1807 = vmatprep.mubr.bf16.mxu0 %v4453_v49  ;;  %v5397_v48 = vld [vmem:[#allocation5 + $0x220] ss:$8 sps:$4 sm:$0xff]   ;;  %v4455_v49 = vcombine.high %v608_v45, %v612_v46  ;;  %v605_v38 = vld [vmem:[%s5888_s14 + $0x70] sm:$0xff] }
  0xa0   : > { %1874 = vmatprep.subr.bf16.mxu0 %v5354_v50  ;;  %v5402_v50 = vld [vmem:[#allocation5 + $0x234] ss:$8 sps:$4 sm:$0xff]  }
  0xa3   : > { %1875 = vmatpush1.bf16.msra.mxu0 %v5352_v51  ;;  %v5400_v51 = vld [vmem:[#allocation5 + $0x230] ss:$8 sps:$4 sm:$0xff]  }
  0xa4   : > { %1876 = vmatprep.subr.bf16.mxu0 %v5357_v52  ;;  %v5405_v52 = vld [vmem:[#allocation5 + $0x244] ss:$8 sps:$4 sm:$0xff]  }
  0xa6   : > { %1808 = vmatmul.mubr.bf16.gmra.mrb[8].mxu0 %v4452_v55  ;;  %v4454_v55 = vcombine.low %v608_v45, %v612_v46  ;;  %v609_v45 = vld [vmem:[%s5888_s14 + $0x90] sm:$0xff] }
  0xa7   : > { %1877 = vmatpush1.bf16.msra.mxu0 %v5355_v56  ;;  %1817 = vmatprep.mubr.bf16.mxu0 %v4461_v57  ;;  %v5403_v56 = vld [vmem:[#allocation5 + $0x240] ss:$8 sps:$4 sm:$0xff]   ;;  %v4463_v57 = vcombine.high %v616_v53, %v620_v54  ;;  %v613_v46 = vld [vmem:[%s5888_s14 + $0xb0] sm:$0xff] }
  0xa8   : > { %1878 = vmatprep.subr.bf16.mxu0 %v5360_v58  ;;  %v5408_v58 = vld [vmem:[#allocation5 + $0x254] ss:$8 sps:$4 sm:$0xff]  }
  0xab   : > { %1879 = vmatpush1.bf16.msra.mxu0 %v5358_v59  ;;  %v5406_v59 = vld [vmem:[#allocation5 + $0x250] ss:$8 sps:$4 sm:$0xff]  }
  0xac   : > { %1880 = vmatprep.subr.bf16.mxu0 %v5363_v60  ;;  %v5411_v60 = vld [vmem:[#allocation5 + $0x264] ss:$8 sps:$4 sm:$0xff]  }
  0xae   : > { %1818 = vmatmul.mubr.bf16.gmra.mrb[12].mxu0 %v4460_v63  ;;  %v4462_v63 = vcombine.low %v616_v53, %v620_v54  ;;  %v617_v53 = vld [vmem:[%s5888_s14 + $0xd0] sm:$0xff] }
  0xaf   : > { %1881 = vmatpush1.bf16.msra.mxu0 %v5361_v0  ;;  %1827 = vmatprep.mubr.bf16.mxu0 %v4469_v1  ;;  %v5409_v0 = vld [vmem:[#allocation5 + $0x260] ss:$8 sps:$4 sm:$0xff]   ;;  %v4471_v1 = vcombine.high %v624_v61, %v628_v62  ;;  %v621_v54 = vld [vmem:[%s5888_s14 + $0xf0] sm:$0xff] }
  0xb0   : > { %1882 = vmatprep.subr.bf16.mxu0 %v5366_v2  ;;  %v5414_v2 = vld [vmem:[#allocation5 + $0x274] ss:$8 sps:$4 sm:$0xff]  }
  0xb3   : > { %1883 = vmatpush1.bf16.msra.mxu0 %v5364_v3  ;;  %v5412_v3 = vld [vmem:[#allocation5 + $0x270] ss:$8 sps:$4 sm:$0xff]  }
  0xb4   : > { %1884 = vmatprep.subr.bf16.mxu0 %v5369_v4  ;;  %v5417_v4 = vld [vmem:[#allocation5 + $0x284] ss:$8 sps:$4 sm:$0xff]  }
  0xb6   : > { %1828 = vmatmul.mubr.bf16.gmra.mrb[16].mxu0 %v4468_v7  ;;  %v4470_v7 = vcombine.low %v624_v61, %v628_v62  ;;  %v625_v61 = vld [vmem:[%s5888_s14 + $0x110] sm:$0xff] }
  0xb7   : > { %1885 = vmatpush1.bf16.msra.mxu0 %v5367_v8  ;;  %1837 = vmatprep.mubr.bf16.mxu0 %v4477_v9  ;;  %v5415_v8 = vld [vmem:[#allocation5 + $0x280] ss:$8 sps:$4 sm:$0xff]   ;;  %v4479_v9 = vcombine.high %v632_v5, %v636_v6  ;;  %v629_v62 = vld [vmem:[%s5888_s14 + $0x130] sm:$0xff] }
  0xb8   : > { %1886 = vmatprep.subr.bf16.mxu0 %v5372_v10  ;;  %v5420_v10 = vld [vmem:[#allocation5 + $0x294] ss:$8 sps:$4 sm:$0xff]  }
  0xbb   : > { %1887 = vmatpush1.bf16.msra.mxu0 %v5370_v11  ;;  %v5418_v11 = vld [vmem:[#allocation5 + $0x290] ss:$8 sps:$4 sm:$0xff]  }
  0xbc   : > { %1888 = vmatprep.subr.bf16.mxu0 %v5375_v12  ;;  %v5423_v12 = vld [vmem:[#allocation5 + $0x2a4] ss:$8 sps:$4 sm:$0xff]  }
  0xbe   : > { %1838 = vmatmul.mubr.bf16.gmra.mrb[20].mxu0 %v4476_v15  ;;  %v4478_v15 = vcombine.low %v632_v5, %v636_v6  ;;  %v633_v5 = vld [vmem:[%s5888_s14 + $0x150] sm:$0xff] }
  0xbf   : > { %1889 = vmatpush1.bf16.msra.mxu0 %v5373_v16  ;;  %1847 = vmatprep.mubr.bf16.mxu0 %v4485_v17  ;;  %v5421_v16 = vld [vmem:[#allocation5 + $0x2a0] ss:$8 sps:$4 sm:$0xff]   ;;  %v4487_v17 = vcombine.high %v640_v13, %v644_v14  ;;  %v637_v6 = vld [vmem:[%s5888_s14 + $0x170] sm:$0xff] }
  0xc0   : > { %1890 = vmatprep.subr.bf16.mxu0 %v5378_v18  ;;  %v5426_v18 = vld [vmem:[#allocation5 + $0x2b4] ss:$8 sps:$4 sm:$0xff]  }
  0xc3   : > { %1891 = vmatpush1.bf16.msra.mxu0 %v5376_v19  ;;  %v5424_v19 = vld [vmem:[#allocation5 + $0x2b0] ss:$8 sps:$4 sm:$0xff]  }
  0xc4   : > { %1892 = vmatprep.subr.bf16.mxu0 %v5381_v20  ;;  %v5429_v20 = vld [vmem:[#allocation5 + $0x2c4] ss:$8 sps:$4 sm:$0xff]  }
  0xc6   : > { %1848 = vmatmul.mubr.bf16.gmra.mrb[24].mxu0 %v4484_v23  ;;  %v4486_v23 = vcombine.low %v640_v13, %v644_v14  ;;  %v641_v13 = vld [vmem:[%s5888_s14 + $0x190] sm:$0xff] }
  0xc7   : > { %1893 = vmatpush1.bf16.msra.mxu0 %v5379_v24  ;;  %1857 = vmatprep.mubr.bf16.mxu0 %v4493_v25  ;;  %v5427_v24 = vld [vmem:[#allocation5 + $0x2c0] ss:$8 sps:$4 sm:$0xff]   ;;  %v4495_v25 = vcombine.high %v648_v21, %v652_v22  ;;  %v645_v14 = vld [vmem:[%s5888_s14 + $0x1b0] sm:$0xff] }
  0xc8   : > { %1894 = vmatprep.subr.bf16.mxu0 %v5384_v26  ;;  %v5432_v26 = vld [vmem:[#allocation5 + $0x2d4] ss:$8 sps:$4 sm:$0xff]  }
  0xcb   : > { %1895 = vmatpush1.bf16.msra.mxu0 %v5382_v27  ;;  %v5430_v27 = vld [vmem:[#allocation5 + $0x2d0] ss:$8 sps:$4 sm:$0xff]  }
  0xcc   : > { %1896 = vmatprep.subr.bf16.mxu0 %v5387_v28  ;;  %v5435_v28 = vld [vmem:[#allocation5 + $0x2e4] ss:$8 sps:$4 sm:$0xff]  }
  0xce   : > { %1858 = vmatmul.mubr.bf16.gmra.mrb[28].mxu0 %v4492_v31  ;;  %v4494_v31 = vcombine.low %v648_v21, %v652_v22  ;;  %v649_v21 = vld [vmem:[%s5888_s14 + $0x1d0] sm:$0xff] }
  0xcf   : > { %1897 = vmatpush1.bf16.msra.mxu0 %v5385_v32  ;;  %1900 = vmatprep.mubr.bf16.mxu0 %v4439_v33  ;;  %v5433_v32 = vld [vmem:[#allocation5 + $0x2e0] ss:$8 sps:$4 sm:$0xff]   ;;  %v4441_v33 = vcombine.high %v593_v29, %v597_v30  ;;  %v653_v22 = vld [vmem:[%s5888_s14 + $0x1f0] sm:$0xff] }
  0xd0   : > { %1898 = vmatprep.subr.bf16.mxu0 %v5390_v34  ;;  %v5438_v34 = vld [vmem:[#allocation5 + $0x2f4] ss:$8 sps:$4 sm:$0xff]  }
  0xd3   : > { %1899 = vmatpush1.bf16.msra.mxu0 %v5388_v35  ;;  %v5436_v35 = vld [vmem:[#allocation5 + $0x2f0] ss:$8 sps:$4 sm:$0xff]  }
  0xd4   : > { %1981 = vmatprep.subr.bf16.mxu0 %v5393_v36  ;;  %v5441_v36 = vld [vmem:[#allocation5 + $0x304] ss:$8 sps:$4 sm:$0xff]  }
  0xd6   : > { %1901 = vmatmul.mubr.bf16.vlgmr.msra.gmra.mrb[0].mxu0 %v4438_v39  ;;  %v4440_v39 = vcombine.low %v593_v29, %v597_v30  ;;  %v594_v29 = vld [vmem:[%s5888_s14 + $0x18] sm:$0xff] }
  0xd7   : > { %1982 = vmatpush1.bf16.msra.mxu0 %v5391_v40  ;;  %1910 = vmatprep.mubr.bf16.mxu0 %v4447_v41  ;;  %v5439_v40 = vld [vmem:[#allocation5 + $0x300] ss:$8 sps:$4 sm:$0xff]   ;;  %v4449_v41 = vcombine.high %v601_v37, %v605_v38  ;;  %v598_v30 = vld [vmem:[%s5888_s14 + $0x38] sm:$0xff] }
  0xd8   : > { %1983 = vmatprep.subr.bf16.mxu0 %v5396_v42  ;;  %v5444_v42 = vld [vmem:[#allocation5 + $0x314] ss:$8 sps:$4 sm:$0xff]  }
  0xdb   : > { %1984 = vmatpush1.bf16.msra.mxu0 %v5394_v43  ;;  %v5442_v43 = vld [vmem:[#allocation5 + $0x310] ss:$8 sps:$4 sm:$0xff]  }
  0xdc   : > { %1985 = vmatprep.subr.bf16.mxu0 %v5399_v44  ;;  %v5447_v44 = vld [vmem:[#allocation5 + $0x324] ss:$8 sps:$4 sm:$0xff]  }
  0xde   : > { %1911 = vmatmul.mubr.bf16.gmra.mrb[4].mxu0 %v4446_v47  ;;  %v4448_v47 = vcombine.low %v601_v37, %v605_v38  ;;  %v606_v37 = vld [vmem:[%s5888_s14 + $0x78] sm:$0xff]  ;;  %v4442_v38 = vcombine.low %v594_v29, %v598_v30 }
  0xdf   : > { %1986 = vmatpush1.bf16.msra.mxu0 %v5397_v48  ;;  %1920 = vmatprep.mubr.bf16.mxu0 %v4455_v49  ;;  %v5445_v48 = vld [vmem:[#allocation5 + $0x320] ss:$8 sps:$4 sm:$0xff]   ;;  %v4457_v49 = vcombine.high %v609_v45, %v613_v46 }
  0xe0   : > { %1987 = vmatprep.subr.bf16.mxu0 %v5402_v50  ;;  %v5450_v50 = vld [vmem:[#allocation5 + $0x334] ss:$8 sps:$4 sm:$0xff]  }
  0xe3   : > { %1988 = vmatpush1.bf16.msra.mxu0 %v5400_v51  ;;  %v5448_v51 = vld [vmem:[#allocation5 + $0x330] ss:$8 sps:$4 sm:$0xff]  }
  0xe4   : > { %1989 = vmatprep.subr.bf16.mxu0 %v5405_v52  ;;  %v5453_v52 = vld [vmem:[#allocation5 + $0x344] ss:$8 sps:$4 sm:$0xff]  }
  0xe6   : > { %1921 = vmatmul.mubr.bf16.gmra.mrb[8].mxu0 %v4454_v55  ;;  %v4456_v55 = vcombine.low %v609_v45, %v613_v46  ;;  %v622_v45 = vld [vmem:[%s5888_s14 + $0xf8] sm:$0xff] }
  0xe7   : > { %1990 = vmatpush1.bf16.msra.mxu0 %v5403_v56  ;;  %1930 = vmatprep.mubr.bf16.mxu0 %v4463_v57  ;;  %v5451_v56 = vld [vmem:[#allocation5 + $0x340] ss:$8 sps:$4 sm:$0xff]   ;;  %v4465_v57 = vcombine.high %v617_v53, %v621_v54 }
  0xe8   : > { %1991 = vmatprep.subr.bf16.mxu0 %v5408_v58  ;;  %v5456_v58 = vld [vmem:[#allocation5 + $0x354] ss:$8 sps:$4 sm:$0xff]  }
  0xeb   : > { %1992 = vmatpush1.bf16.msra.mxu0 %v5406_v59  ;;  %v5454_v59 = vld [vmem:[#allocation5 + $0x350] ss:$8 sps:$4 sm:$0xff]  }
  0xec   : > { %1993 = vmatprep.subr.bf16.mxu0 %v5411_v60  ;;  %v5459_v60 = vld [vmem:[#allocation5 + $0x364] ss:$8 sps:$4 sm:$0xff]  }
  0xee   : > { %1931 = vmatmul.mubr.bf16.gmra.mrb[12].mxu0 %v4462_v63  ;;  %v4464_v63 = vcombine.low %v617_v53, %v621_v54  ;;  %v638_v53 = vld [vmem:[%s5888_s14 + $0x178] sm:$0xff] }
  0xef   : > { %1994 = vmatpush1.bf16.msra.mxu0 %v5409_v0  ;;  %1940 = vmatprep.mubr.bf16.mxu0 %v4471_v1  ;;  %v5457_v0 = vld [vmem:[#allocation5 + $0x360] ss:$8 sps:$4 sm:$0xff]   ;;  %v4473_v1 = vcombine.high %v625_v61, %v629_v62 }
  0xf0   : > { %1995 = vmatprep.subr.bf16.mxu0 %v5414_v2  ;;  %v5462_v2 = vld [vmem:[#allocation5 + $0x374] ss:$8 sps:$4 sm:$0xff]  }
  0xf3   : > { %1996 = vmatpush1.bf16.msra.mxu0 %v5412_v3  ;;  %v5460_v3 = vld [vmem:[#allocation5 + $0x370] ss:$8 sps:$4 sm:$0xff]  }
  0xf4   : > { %1997 = vmatprep.subr.bf16.mxu0 %v5417_v4  ;;  %v5465_v4 = vld [vmem:[#allocation5 + $0x384] ss:$8 sps:$4 sm:$0xff]  }
  0xf6   : > { %1941 = vmatmul.mubr.bf16.gmra.mrb[16].mxu0 %v4470_v7  ;;  %v4472_v7 = vcombine.low %v625_v61, %v629_v62  ;;  %v654_v61 = vld [vmem:[%s5888_s14 + $0x1f8] sm:$0xff] }
  0xf7   : > { %1998 = vmatpush1.bf16.msra.mxu0 %v5415_v8  ;;  %1950 = vmatprep.mubr.bf16.mxu0 %v4479_v9  ;;  %v5463_v8 = vld [vmem:[#allocation5 + $0x380] ss:$8 sps:$4 sm:$0xff]   ;;  %v4481_v9 = vcombine.high %v633_v5, %v637_v6 }
  0xf8   : > { %1999 = vmatprep.subr.bf16.mxu0 %v5420_v10  ;;  %v5468_v10 = vld [vmem:[#allocation5 + $0x394] ss:$8 sps:$4 sm:$0xff]  }
  0xfb   : > { %2000 = vmatpush1.bf16.msra.mxu0 %v5418_v11  ;;  %v5466_v11 = vld [vmem:[#allocation5 + $0x390] ss:$8 sps:$4 sm:$0xff]  }
  0xfc   : > { %2001 = vmatprep.subr.bf16.mxu0 %v5423_v12  ;;  %v5471_v12 = vld [vmem:[#allocation5 + $0x3a4] ss:$8 sps:$4 sm:$0xff]  }
  0xfe   : > { %1951 = vmatmul.mubr.bf16.gmra.mrb[20].mxu0 %v4478_v15  ;;  %v4480_v15 = vcombine.low %v633_v5, %v637_v6  ;;  %v783_v5 = vld [vmem:[%s6956_s5] sm:$0x3] }
  0xff   : > { %2002 = vmatpush1.bf16.msra.mxu0 %v5421_v16  ;;  %1960 = vmatprep.mubr.bf16.mxu0 %v4487_v17  ;;  %v5469_v16 = vld [vmem:[#allocation5 + $0x3a0] ss:$8 sps:$4 sm:$0xff]   ;;  %v4489_v17 = vcombine.high %v641_v13, %v645_v14 }
 0x100   : > { %2003 = vmatprep.subr.bf16.mxu0 %v5426_v18  ;;  %v5474_v18 = vld [vmem:[#allocation5 + $0x3b4] ss:$8 sps:$4 sm:$0xff]  }
 0x103   : > { %2004 = vmatpush1.bf16.msra.mxu0 %v5424_v19  ;;  %v5472_v19 = vld [vmem:[#allocation5 + $0x3b0] ss:$8 sps:$4 sm:$0xff]  }
 0x104   : > { %2005 = vmatprep.subr.bf16.mxu0 %v5429_v20  ;;  %v5477_v20 = vld [vmem:[#allocation5 + $0x3c4] ss:$8 sps:$4 sm:$0xff]  }
 0x106   : > { %1961 = vmatmul.mubr.bf16.gmra.mrb[24].mxu0 %v4486_v23  ;;  %v4488_v23 = vcombine.low %v641_v13, %v645_v14 }
 0x107   : > { %2006 = vmatpush1.bf16.msra.mxu0 %v5427_v24  ;;  %1970 = vmatprep.mubr.bf16.mxu0 %v4495_v25  ;;  %v5475_v24 = vld [vmem:[#allocation5 + $0x3c0] ss:$8 sps:$4 sm:$0xff]   ;;  %v4497_v25 = vcombine.high %v649_v21, %v653_v22 }
 0x108   : > { %2007 = vmatprep.subr.bf16.mxu0 %v5432_v26  ;;  %v5480_v26 = vld [vmem:[#allocation5 + $0x3d4] ss:$8 sps:$4 sm:$0xff]  }
 0x10b   : > { %2008 = vmatpush1.bf16.msra.mxu0 %v5430_v27  ;;  %v5478_v27 = vld [vmem:[#allocation5 + $0x3d0] ss:$8 sps:$4 sm:$0xff]  }
 0x10c   : > { %2009 = vmatprep.subr.bf16.mxu0 %v5435_v28  ;;  %v5483_v28 = vld [vmem:[#allocation5 + $0x3e4] ss:$8 sps:$4 sm:$0xff]  }
 0x10e   : > { %1971 = vmatmul.mubr.bf16.gmra.mrb[28].mxu0 %v4494_v31  ;;  %v4496_v31 = vcombine.low %v649_v21, %v653_v22 }
 0x10f   : > { %2010 = vmatpush1.bf16.msra.mxu0 %v5433_v32  ;;  %2013 = vmatprep.mubr.bf16.mxu0 %v4441_v33  ;;  %v5481_v32 = vld [vmem:[#allocation5 + $0x3e0] ss:$8 sps:$4 sm:$0xff]   ;;  %v4443_v33 = vcombine.high %v594_v29, %v598_v30 }
 0x110   : > { %2011 = vmatprep.subr.bf16.mxu0 %v5438_v34  ;;  %v5486_v34 = vld [vmem:[#allocation5 + $0x3f4] ss:$8 sps:$4 sm:$0xff]  }
 0x113   : > { %2012 = vmatpush1.bf16.msra.mxu0 %v5436_v35  ;;  %v5484_v35 = vld [vmem:[#allocation5 + $0x3f0] ss:$8 sps:$4 sm:$0xff]  }
 0x114   : > { %2094 = vmatprep.subr.bf16.mxu0 %v5441_v36  ;;  %v602_v36 = vld [vmem:[%s5888_s14 + $0x58] sm:$0xff] }
 0x116   : > { %2014 = vmatmul.mubr.bf16.vlgmr.msra.gmra.mrb[0].mxu0 %v4440_v39  ;;  %v4451_v39 = vcombine.high %v602_v36, %v606_v37 }
 0x117   : > { %2095 = vmatpush1.bf16.msra.mxu0 %v5439_v40  ;;  %2023 = vmatprep.mubr.bf16.mxu0 %v4449_v41  ;;  %v610_v40 = vld [vmem:[%s5888_s14 + $0x98] sm:$0xff] }
 0x118   : > { %2096 = vmatprep.subr.bf16.mxu0 %v5444_v42  ;;  %v614_v41 = vld [vmem:[%s5888_s14 + $0xb8] sm:$0xff]  ;;  %v4450_v42 = vcombine.low %v602_v36, %v606_v37 }
 0x119   : > { %v4458_v46 = vcombine.low %v610_v40, %v614_v41 }
 0x11b   : > { %2097 = vmatpush1.bf16.msra.mxu0 %v5442_v43  ;;  %v4459_v43 = vcombine.high %v610_v40, %v614_v41 }
 0x11c   : > { %2098 = vmatprep.subr.bf16.mxu0 %v5447_v44  ;;  %v618_v44 = vld [vmem:[%s5888_s14 + $0xd8] sm:$0xff] }
 0x11e   : > { %2024 = vmatmul.mubr.bf16.gmra.mrb[4].mxu0 %v4448_v47  ;;  %v4467_v47 = vcombine.high %v618_v44, %v622_v45 }
 0x11f   : > { %2099 = vmatpush1.bf16.msra.mxu0 %v5445_v48  ;;  %2033 = vmatprep.mubr.bf16.mxu0 %v4457_v49  ;;  %v626_v48 = vld [vmem:[%s5888_s14 + $0x118] sm:$0xff] }
 0x120   : > { %2100 = vmatprep.subr.bf16.mxu0 %v5450_v50  ;;  %v630_v49 = vld [vmem:[%s5888_s14 + $0x138] sm:$0xff]  ;;  %v4466_v50 = vcombine.low %v618_v44, %v622_v45 }
 0x121   : > { %v4474_v54 = vcombine.low %v626_v48, %v630_v49 }
 0x123   : > { %2101 = vmatpush1.bf16.msra.mxu0 %v5448_v51  ;;  %v4475_v51 = vcombine.high %v626_v48, %v630_v49 }
 0x124   : > { %2102 = vmatprep.subr.bf16.mxu0 %v5453_v52  ;;  %v634_v52 = vld [vmem:[%s5888_s14 + $0x158] sm:$0xff] }
 0x126   : > { %2034 = vmatmul.mubr.bf16.gmra.mrb[8].mxu0 %v4456_v55  ;;  %v4483_v55 = vcombine.high %v634_v52, %v638_v53 }
 0x127   : > { %2103 = vmatpush1.bf16.msra.mxu0 %v5451_v56  ;;  %2043 = vmatprep.mubr.bf16.mxu0 %v4465_v57  ;;  %v642_v56 = vld [vmem:[%s5888_s14 + $0x198] sm:$0xff] }
 0x128   : > { %2104 = vmatprep.subr.bf16.mxu0 %v5456_v58  ;;  %v646_v57 = vld [vmem:[%s5888_s14 + $0x1b8] sm:$0xff]  ;;  %v4482_v58 = vcombine.low %v634_v52, %v638_v53 }
 0x129   : > { %v4490_v62 = vcombine.low %v642_v56, %v646_v57 }
 0x12b   : > { %2105 = vmatpush1.bf16.msra.mxu0 %v5454_v59  ;;  %v4491_v59 = vcombine.high %v642_v56, %v646_v57 }
 0x12c   : > { %2106 = vmatprep.subr.bf16.mxu0 %v5459_v60  ;;  %v650_v60 = vld [vmem:[%s5888_s14 + $0x1d8] sm:$0xff]  ;;  %s6992_s14 = sld [smem:[#allocation13_spill]] }
 0x12e   : > { %2044 = vmatmul.mubr.bf16.gmra.mrb[12].mxu0 %v4464_v63  ;;  %v4499_v63 = vcombine.high %v650_v60, %v654_v61 }
 0x12f   : > { %2107 = vmatpush1.bf16.msra.mxu0 %v5457_v0  ;;  %2053 = vmatprep.mubr.bf16.mxu0 %v4473_v1  ;;  %v4498_v0 = vcombine.low %v650_v60, %v654_v61  ;;  %v5691_v1 = vmov 0  }
 0x130   : > { %2108 = vmatprep.subr.bf16.mxu0 %v5462_v2  ;;  %2303 = vmatprep.mubr.bf16.mxu1 %v5691_v1  ;;  %v785_v2 = vlaneseq }
 0x131   : > { %5253 = vset.pattern.permute.xlu0 %v5691_v1  ;;  %5254 = vset.pattern.permute.xlu1 %v5691_v1 }
 0x132   : > { %s572_s19 = scalar_lea.vmem %s6992_s14, %s4435_s10 }
 0x133   : > { %2109 = vmatpush1.bf16.msra.mxu0 %v5460_v3  ;;  %v5975_v3 = vshrl.u32 %v785_v2, 7 }
 0x134   : > { %2110 = vmatprep.subr.bf16.mxu0 %v5465_v4 }
 0x135   : > { %v5978_v4 = vsub.s32 0, %v5975_v3  ;;  %v791_v6 = vsub.s32 1, %v5975_v3 }
 0x136   : > { %2054 = vmatmul.mubr.bf16.gmra.mrb[16].mxu0 %v4472_v7 }
 0x137   : > { %2111 = vmatpush1.bf16.msra.mxu0 %v5463_v8  ;;  %2063 = vmatprep.mubr.bf16.mxu0 %v4481_v9  ;;  %v5985_v7 = vrot.slane %v783_v5, %v5978_v4  ;;  %v5989_v9 = vrot.slane %v783_v5, %v791_v6 }
 0x138   : > { %2112 = vmatprep.subr.bf16.mxu0 %v5468_v10 }
 0x13b   : > { %2113 = vmatpush1.bf16.msra.mxu0 %v5466_v11 }
 0x13c   : > { %2114 = vmatprep.subr.bf16.mxu0 %v5471_v12 }
 0x13e   : > { %2064 = vmatmul.mubr.bf16.gmra.mrb[20].mxu0 %v4480_v15 }
 0x13f   : > { %2115 = vmatpush1.bf16.msra.mxu0 %v5469_v16  ;;  %2073 = vmatprep.mubr.bf16.mxu0 %v4489_v17 }
 0x140   : > { %2116 = vmatprep.subr.bf16.mxu0 %v5474_v18 }
 0x143   : > { %2117 = vmatpush1.bf16.msra.mxu0 %v5472_v19 }
 0x144   : > { %2118 = vmatprep.subr.bf16.mxu0 %v5477_v20 }
 0x146   : > { %2074 = vmatmul.mubr.bf16.gmra.mrb[24].mxu0 %v4488_v23 }
 0x147   : > { %2119 = vmatpush1.bf16.msra.mxu0 %v5475_v24  ;;  %2083 = vmatprep.mubr.bf16.mxu0 %v4497_v25 }
 0x148   : > { %2120 = vmatprep.subr.bf16.mxu0 %v5480_v26 }
 0x14b   : > { %2121 = vmatpush1.bf16.msra.mxu0 %v5478_v27 }
 0x14c   : > { %2122 = vmatprep.subr.bf16.mxu0 %v5483_v28 }
 0x14e   : > { %2084 = vmatmul.mubr.bf16.gmra.mrb[28].mxu0 %v4496_v31 }
 0x14f   : > { %2123 = vmatpush1.bf16.msra.mxu0 %v5481_v32  ;;  %2126 = vmatprep.mubr.bf16.mxu0 %v4443_v33 }
 0x150   : > { %2124 = vmatprep.subr.bf16.mxu0 %v5486_v34 }
 0x153   : > { %2125 = vmatpush1.bf16.msra.mxu0 %v5484_v35 }
 0x156   : > { %2127 = vmatmul.mubr.bf16.vlgmr.msra.gmra.mrb[0].mxu0 %v4442_v38 }
 0x157   : > { %2136 = vmatprep.mubr.bf16.mxu0 %v4451_v39 }
 0x15e   : > { %2137 = vmatmul.mubr.bf16.gmra.mrb[4].mxu0 %v4450_v42 }
 0x15f   : > { %2146 = vmatprep.mubr.bf16.mxu0 %v4459_v43 }
 0x166   : > { %2147 = vmatmul.mubr.bf16.gmra.mrb[8].mxu0 %v4458_v46 }
 0x167   : > { %2156 = vmatprep.mubr.bf16.mxu0 %v4467_v47 }
 0x16e   : > { %2157 = vmatmul.mubr.bf16.gmra.mrb[12].mxu0 %v4466_v50 }
 0x16f   : > { %2166 = vmatprep.mubr.bf16.mxu0 %v4475_v51 }
 0x176   : > { %2167 = vmatmul.mubr.bf16.gmra.mrb[16].mxu0 %v4474_v54 }
 0x177   : > { %2176 = vmatprep.mubr.bf16.mxu0 %v4483_v55 }
 0x17e   : > { %2177 = vmatmul.mubr.bf16.gmra.mrb[20].mxu0 %v4482_v58 }
 0x17f   : > { %2186 = vmatprep.mubr.bf16.mxu0 %v4491_v59 }
 0x186   : > { %2187 = vmatmul.mubr.bf16.gmra.mrb[24].mxu0 %v4490_v62 }
 0x187   : > { %2196 = vmatprep.mubr.bf16.mxu0 %v4499_v63 }
 0x18e   : > { %2197 = vmatmul.mubr.bf16.gmra.mrb[28].mxu0 %v4498_v0 }
 0x229   : > { %v2128_v8 = vpop.f32.mrb[0].mxu0 }
 0x22a   : > { %v2130_v10 = vpop.f32.mrb[1].mxu0  ;;  %v5068_v12 = vadd.f32 %v2128_v8, %v5985_v7 }
 0x22b   : > { %v2132_v11 = vpop.f32.mrb[2].mxu0  ;;  %v5069_v15 = vadd.f32 %v2130_v10, %v5989_v9 }
 0x22c   : > { %v5070_v13 = vadd.f32 %v2132_v11, %v5985_v7  ;;  %v2134_v14 = vpop.f32.mrb[3].mxu0 }
 0x22d   : > { %v5071_v16 = vadd.f32 %v2134_v14, %v5989_v9 }
 0x22e   : > { %v2207_v17 = vpack.c.bf16 %v5070_v13, %v5068_v12 }
 0x22f   : > { %v2208_v18 = vpack.c.bf16 %v5071_v16, %v5069_v15 }
 0x231   : > { %v2138_v19 = vpop.f32.mrb[4].mxu0  ;;  %2271 = vmatprep.subr.bf16.mxu1 %v2208_v18 }
 0x232   : > { %v2140_v20 = vpop.f32.mrb[5].mxu0  ;;  %2272 = vmatpush1.bf16.msra.mxu1 %v2207_v17  ;;  %v5072_v22 = vadd.f32 %v2138_v19, %v5985_v7 }
 0x233   : > { %v2142_v21 = vpop.f32.mrb[6].mxu0  ;;  %v5073_v25 = vadd.f32 %v2140_v20, %v5989_v9 }
 0x234   : > { %v5074_v23 = vadd.f32 %v2142_v21, %v5985_v7  ;;  %v2144_v24 = vpop.f32.mrb[7].mxu0 }
 0x235   : > { %v5075_v26 = vadd.f32 %v2144_v24, %v5989_v9 }
 0x236   : > { %v2209_v27 = vpack.c.bf16 %v5074_v23, %v5072_v22 }
 0x237   : > { %v2210_v28 = vpack.c.bf16 %v5075_v26, %v5073_v25 }
 0x239   : > { %v2148_v29 = vpop.f32.mrb[8].mxu0  ;;  %2273 = vmatprep.subr.bf16.mxu1 %v2210_v28 }
 0x23a   : > { %v2150_v30 = vpop.f32.mrb[9].mxu0  ;;  %2274 = vmatpush1.bf16.msra.mxu1 %v2209_v27  ;;  %v5076_v32 = vadd.f32 %v2148_v29, %v5985_v7 }
 0x23b   : > { %v2152_v31 = vpop.f32.mrb[10].mxu0  ;;  %v5077_v35 = vadd.f32 %v2150_v30, %v5989_v9 }
 0x23c   : > { %v5078_v33 = vadd.f32 %v2152_v31, %v5985_v7  ;;  %v2154_v34 = vpop.f32.mrb[11].mxu0 }
 0x23d   : > { %v5079_v36 = vadd.f32 %v2154_v34, %v5989_v9  ;;  %v5498_v34 = vld [vmem:[%s6957_s6 + $0x8] sm:$0xff]  }
 0x23e   : > { %v2211_v37 = vpack.c.bf16 %v5078_v33, %v5076_v32  ;;  %v5495_v32 = vld [vmem:[%s6957_s6 + $0x40] sm:$0xff]  }
 0x23f   : > { %v2212_v38 = vpack.c.bf16 %v5079_v36, %v5077_v35  ;;  %v6027_v33 = vld [vmem:[%s5969_s25] sm:$0xff]   ;;  %v5499_v35 = vld [vmem:[%s6957_s6 + $0x50] sm:$0xff]   ;;  %v6044_v36 = vld [vmem:[%s5969_s25 + $0x8] sm:$0xff]  }
 0x241   : > { %v2158_v39 = vpop.f32.mrb[12].mxu0  ;;  %2275 = vmatprep.subr.bf16.mxu1 %v2212_v38  ;;  %v5501_v38 = vld [vmem:[%s6957_s6 + $0x58] sm:$0xff]  }
 0x242   : > { %v2160_v40 = vpop.f32.mrb[13].mxu0  ;;  %2276 = vmatpush1.bf16.msra.mxu1 %v2211_v37  ;;  %v5080_v42 = vadd.f32 %v2158_v39, %v5985_v7  ;;  %v5500_v37 = vld [vmem:[%s6957_s6 + $0x10] sm:$0xff]   ;;  %v5502_v39 = vld [vmem:[%s6957_s6 + $0x18] sm:$0xff]  }
 0x243   : > { %v2162_v41 = vpop.f32.mrb[14].mxu0  ;;  %v5081_v45 = vadd.f32 %v2160_v40, %v5989_v9  ;;  %v5503_v40 = vld [vmem:[%s6957_s6 + $0x60] sm:$0xff]  }
 0x244   : > { %v5082_v43 = vadd.f32 %v2162_v41, %v5985_v7  ;;  %v2164_v44 = vpop.f32.mrb[15].mxu0  ;;  %v6061_v41 = vld [vmem:[%s5969_s25 + $0x10] sm:$0xff]  }
 0x245   : > { %v5083_v46 = vadd.f32 %v2164_v44, %v5989_v9  ;;  %v5506_v44 = vld [vmem:[%s6957_s6 + $0x28] sm:$0xff]  }
 0x246   : > { %v2213_v47 = vpack.c.bf16 %v5082_v43, %v5080_v42  ;;  %v5504_v42 = vld [vmem:[%s6957_s6 + $0x20] sm:$0xff]   ;;  %v5505_v43 = vld [vmem:[%s6957_s6 + $0x68] sm:$0xff]  }
 0x247   : > { %v2214_v48 = vpack.c.bf16 %v5083_v46, %v5081_v45  ;;  %v5507_v45 = vld [vmem:[%s6957_s6 + $0x70] sm:$0xff]   ;;  %v6078_v46 = vld [vmem:[%s5969_s25 + $0x18] sm:$0xff]  }
 0x249   : > { %v2168_v49 = vpop.f32.mrb[16].mxu0  ;;  %2277 = vmatprep.subr.bf16.mxu1 %v2214_v48  ;;  %v6086_v48 = vld [vmem:[%s5969_s25 + $0x20] sm:$0xff]  }
 0x24a   : > { %v2170_v50 = vpop.f32.mrb[17].mxu0  ;;  %2278 = vmatpush1.bf16.msra.mxu1 %v2213_v47  ;;  %v5084_v52 = vadd.f32 %v2168_v49, %v5985_v7  ;;  %v5508_v47 = vld [vmem:[%s6957_s6 + $0x30] sm:$0xff]   ;;  %v6091_v49 = vld [vmem:[%s5969_s25 + $0x28] sm:$0xff]  }
 0x24b   : > { %v2172_v51 = vpop.f32.mrb[18].mxu0  ;;  %v5085_v55 = vadd.f32 %v2170_v50, %v5989_v9  ;;  %v6096_v50 = vld [vmem:[%s5969_s25 + $0x30] sm:$0xff]  }
 0x24c   : > { %v5086_v53 = vadd.f32 %v2172_v51, %v5985_v7  ;;  %v2174_v54 = vpop.f32.mrb[19].mxu0  ;;  %v6101_v51 = vld [vmem:[%s5969_s25 + $0x38] sm:$0xff]   ;;  %s4431_s25 = sshll.u32 %s6998_s12, 3 }
 0x24d   : > { %v5087_v56 = vadd.f32 %v2174_v54, %v5989_v9  ;;  %s566_s22 = scalar_lea.vmem %s6954_s3, %s4431_s25  ;;  %s6511_s28 = scalar_lea.vmem %s6953_s2, %s4431_s25 }
 0x24e   : > { %v2215_v57 = vpack.c.bf16 %v5086_v53, %v5084_v52  ;;  %v5509_v52 = vld [vmem:[%s6957_s6 + $0x78] sm:$0xff]  }
 0x24f   : > { %v2216_v58 = vpack.c.bf16 %v5087_v56, %v5085_v55  ;;  %v5510_v53 = vld [vmem:[%s6957_s6 + $0x38] sm:$0xff]  }
 0x251   : > { %v2178_v59 = vpop.f32.mrb[20].mxu0  ;;  %2279 = vmatprep.subr.bf16.mxu1 %v2216_v58 }
 0x252   : > { %v2180_v60 = vpop.f32.mrb[21].mxu0  ;;  %2280 = vmatpush1.bf16.msra.mxu1 %v2215_v57  ;;  %v5088_v62 = vadd.f32 %v2178_v59, %v5985_v7 }
 0x253   : > { %v2182_v61 = vpop.f32.mrb[22].mxu0  ;;  %v5089_v5 = vadd.f32 %v2180_v60, %v5989_v9 }
 0x254   : > { %v5090_v63 = vadd.f32 %v2182_v61, %v5985_v7  ;;  %v2184_v0 = vpop.f32.mrb[23].mxu0 }
 0x255   : > { %v5091_v8 = vadd.f32 %v2184_v0, %v5989_v9 }
 0x256   : > { %v2217_v10 = vpack.c.bf16 %v5090_v63, %v5088_v62 }
 0x257   : > { %v2218_v11 = vpack.c.bf16 %v5091_v8, %v5089_v5 }
 0x259   : > { %v2188_v12 = vpop.f32.mrb[24].mxu0  ;;  %2281 = vmatprep.subr.bf16.mxu1 %v2218_v11 }
 0x25a   : > { %v2190_v13 = vpop.f32.mrb[25].mxu0  ;;  %2282 = vmatpush1.bf16.msra.mxu1 %v2217_v10  ;;  %v5092_v15 = vadd.f32 %v2188_v12, %v5985_v7 }
 0x25b   : > { %v2192_v14 = vpop.f32.mrb[26].mxu0  ;;  %v5093_v18 = vadd.f32 %v2190_v13, %v5989_v9 }
 0x25c   : > { %v5094_v16 = vadd.f32 %v2192_v14, %v5985_v7  ;;  %v2194_v17 = vpop.f32.mrb[27].mxu0 }
 0x25d   : > { %v5095_v19 = vadd.f32 %v2194_v17, %v5989_v9 }
 0x25e   : > { %v2219_v20 = vpack.c.bf16 %v5094_v16, %v5092_v15 }
 0x25f   : > { %v2220_v21 = vpack.c.bf16 %v5095_v19, %v5093_v18 }
 0x261   : > { %v2198_v22 = vpop.f32.mrb[28].mxu0  ;;  %2283 = vmatprep.subr.bf16.mxu1 %v2220_v21 }
 0x262   : > { %v2200_v23 = vpop.f32.mrb[29].mxu0  ;;  %2284 = vmatpush1.bf16.msra.mxu1 %v2219_v20  ;;  %v5096_v25 = vadd.f32 %v2198_v22, %v5985_v7 }
 0x263   : > { %v2202_v24 = vpop.f32.mrb[30].mxu0  ;;  %v5097_v28 = vadd.f32 %v2200_v23, %v5989_v9 }
 0x264   : > { %v5098_v26 = vadd.f32 %v2202_v24, %v5985_v7  ;;  %v2204_v27 = vpop.f32.mrb[31].mxu0  ;;  %v5496_v7 = vld [vmem:[%s6957_s6] sm:$0xff]  }
 0x265   : > { %v5099_v29 = vadd.f32 %v2204_v27, %v5989_v9  ;;  %v5497_v9 = vld [vmem:[%s6957_s6 + $0x48] sm:$0xff]  }
 0x266   : > { %v2221_v30 = vpack.c.bf16 %v5098_v26, %v5096_v25 }
 0x267   : > { %v2222_v31 = vpack.c.bf16 %v5099_v29, %v5097_v28 }
 0x269   : > { %2285 = vmatprep.subr.bf16.mxu1 %v2222_v31 }
 0x26a   : > { %2286 = vmatpush1.bf16.msra.mxu1 %v2221_v30 }
 0x26b   : > { %4711 = vmatprep.subr.bf16.mxu1 %v5495_v32 }
 0x26d   : > { %2304 = vmatmul.mubr.bf16.vlgmr.msra.gmra.mrb[0].mxu1 %v6027_v33 }
 0x26e   : > { %2313 = vmatprep.mubr.bf16.mxu1 %v5691_v1  ;;  %4712 = vmatpush3.bf16.msra.mxu1 %v5496_v7 }
 0x26f   : > { %4713 = vmatprep.subr.bf16.mxu1 %v5497_v9 }
 0x272   : > { %4714 = vmatpush3.bf16.msra.mxu1 %v5498_v34 }
 0x273   : > { %4715 = vmatprep.subr.bf16.mxu1 %v5499_v35 }
 0x275   : > { %2314 = vmatmul.mubr.bf16.gmra.mrb[4].mxu1 %v6044_v36 }
 0x276   : > { %2323 = vmatprep.mubr.bf16.mxu1 %v5691_v1  ;;  %4716 = vmatpush3.bf16.msra.mxu1 %v5500_v37 }
 0x277   : > { %4717 = vmatprep.subr.bf16.mxu1 %v5501_v38 }
 0x27a   : > { %4718 = vmatpush3.bf16.msra.mxu1 %v5502_v39 }
 0x27b   : > { %4719 = vmatprep.subr.bf16.mxu1 %v5503_v40 }
 0x27d   : > { %2324 = vmatmul.mubr.bf16.gmra.mrb[8].mxu1 %v6061_v41 }
 0x27e   : > { %2333 = vmatprep.mubr.bf16.mxu1 %v5691_v1  ;;  %4720 = vmatpush3.bf16.msra.mxu1 %v5504_v42 }
 0x27f   : > { %4721 = vmatprep.subr.bf16.mxu1 %v5505_v43 }
 0x282   : > { %4722 = vmatpush3.bf16.msra.mxu1 %v5506_v44 }
 0x283   : > { %4723 = vmatprep.subr.bf16.mxu1 %v5507_v45 }
 0x285   : > { %2334 = vmatmul.mubr.bf16.gmra.mrb[12].mxu1 %v6078_v46 }
 0x286   : > { %2343 = vmatprep.mubr.bf16.mxu1 %v5691_v1  ;;  %4724 = vmatpush3.bf16.msra.mxu1 %v5508_v47 }
 0x287   : > { %4725 = vmatprep.subr.bf16.mxu1 %v5509_v52 }
 0x28a   : > { %4726 = vmatpush3.bf16.msra.mxu1 %v5510_v53 }
 0x28d   : > { %2344 = vmatmul.mubr.bf16.gmra.mrb[16].mxu1 %v6086_v48 }
 0x28e   : > { %2353 = vmatprep.mubr.bf16.mxu1 %v5691_v1 }
 0x295   : > { %2354 = vmatmul.mubr.bf16.gmra.mrb[20].mxu1 %v6091_v49 }
 0x296   : > { %2363 = vmatprep.mubr.bf16.mxu1 %v5691_v1 }
 0x29d   : > { %2364 = vmatmul.mubr.bf16.gmra.mrb[24].mxu1 %v6096_v50 }
 0x29e   : > { %2373 = vmatprep.mubr.bf16.mxu1 %v5691_v1 }
 0x2a5   : > { %2374 = vmatmul.mubr.bf16.gmra.mrb[28].mxu1 %v6101_v51 }
 0x340   : > { %v2305_v54 = vpop.f32.mrb[0].mxu1 }
 0x341   : > { %v2307_v55 = vpop.f32.mrb[1].mxu1  ;;  %v2384_v57 = vmax.f32 %v2305_v54, 0.0 }
 0x342   : > { %v2309_v56 = vpop.f32.mrb[2].mxu1  ;;  %v2385_v60 = vmax.f32 %v2307_v55, 0.0 }
 0x343   : > { %v2386_v58 = vmax.f32 %v2309_v56, 0.0  ;;  %v2311_v59 = vpop.f32.mrb[3].mxu1 }
 0x344   : > { %v2387_v61 = vmax.f32 %v2311_v59, 0.0 }
 0x345   : > { %v2416_v62 = vpack.c.bf16 %v2386_v58, %v2384_v57 }
 0x346   : > { %v2417_v63 = vpack.c.bf16 %v2387_v61, %v2385_v60 }
 0x348   : > { %v2315_v0 = vpop.f32.mrb[4].mxu1  ;;  %2599 = vmatprep.mubr.bf16.mxu1 %v2417_v63 }
 0x349   : > { %v2317_v5 = vpop.f32.mrb[5].mxu1  ;;  %2600 = vmatmul.mubr.bf16.vlgmr.msra.gmra.mrb[32].mxu1 %v2416_v62  ;;  %v2388_v10 = vmax.f32 %v2315_v0, 0.0 }
 0x34a   : > { %v2319_v8 = vpop.f32.mrb[6].mxu1  ;;  %v2389_v13 = vmax.f32 %v2317_v5, 0.0 }
 0x34b   : > { %v2390_v11 = vmax.f32 %v2319_v8, 0.0  ;;  %v2321_v12 = vpop.f32.mrb[7].mxu1 }
 0x34c   : > { %v2391_v14 = vmax.f32 %v2321_v12, 0.0 }
 0x34d   : > { %v2418_v15 = vpack.c.bf16 %v2390_v11, %v2388_v10 }
 0x34e   : > { %v2419_v16 = vpack.c.bf16 %v2391_v14, %v2389_v13 }
 0x350   : > { %v2325_v17 = vpop.f32.mrb[8].mxu1  ;;  %2607 = vmatprep.mubr.bf16.mxu1 %v2419_v16 }
 0x351   : > { %v2327_v18 = vpop.f32.mrb[9].mxu1  ;;  %2608 = vmatmul.mubr.bf16.gmra.mrb[36].mxu1 %v2418_v15  ;;  %v2392_v20 = vmax.f32 %v2325_v17, 0.0 }
 0x352   : > { %v2329_v19 = vpop.f32.mrb[10].mxu1  ;;  %v2393_v23 = vmax.f32 %v2327_v18, 0.0 }
 0x353   : > { %v2394_v21 = vmax.f32 %v2329_v19, 0.0  ;;  %v2331_v22 = vpop.f32.mrb[11].mxu1 }
 0x354   : > { %v2395_v24 = vmax.f32 %v2331_v22, 0.0 }
 0x355   : > { %v2420_v25 = vpack.c.bf16 %v2394_v21, %v2392_v20 }
 0x356   : > { %v2421_v26 = vpack.c.bf16 %v2395_v24, %v2393_v23 }
 0x358   : > { %v2335_v27 = vpop.f32.mrb[12].mxu1  ;;  %2615 = vmatprep.mubr.bf16.mxu1 %v2421_v26  ;;  %v2806_v26 = vld [vmem:[%s566_s22] sm:$0xff] }
 0x359   : > { %v2337_v28 = vpop.f32.mrb[13].mxu1  ;;  %2616 = vmatmul.mubr.bf16.gmra.mrb[40].mxu1 %v2420_v25  ;;  %v2396_v30 = vmax.f32 %v2335_v27, 0.0  ;;  %v2808_v27 = vld [vmem:[%s566_s22 + $0x10] sm:$0xff]  ;;  %2824 = vperm.xlu0 %5253, %v2806_v26  }
 0x35a   : > { %v2339_v29 = vpop.f32.mrb[14].mxu1  ;;  %v2397_v7 = vmax.f32 %v2337_v28, 0.0  ;;  %2834 = vperm.xlu1 %5254, %v2808_v27   ;;  %v2807_v28 = vld [vmem:[%s566_s22 + $0x8] sm:$0xff] }
 0x35b   : > { %v2398_v31 = vmax.f32 %v2339_v29, 0.0  ;;  %v2341_v32 = vpop.f32.mrb[15].mxu1  ;;  %v2809_v29 = vld [vmem:[%s566_s22 + $0x18] sm:$0xff] }
 0x35c   : > { %v2399_v9 = vmax.f32 %v2341_v32, 0.0  ;;  %v2812_v32 = vld [vmem:[%s566_s22 + $0x30] sm:$0xff] }
 0x35d   : > { %v2422_v34 = vpack.c.bf16 %v2398_v31, %v2396_v30  ;;  %2829 = vperm.xlu0 %5253, %v2807_v28   ;;  %v2810_v30 = vld [vmem:[%s566_s22 + $0x20] sm:$0xff]  ;;  %v2811_v31 = vld [vmem:[%s566_s22 + $0x28] sm:$0xff] }
 0x35e   : > { %v2423_v35 = vpack.c.bf16 %v2399_v9, %v2397_v7  ;;  %2839 = vperm.xlu1 %5254, %v2809_v29   ;;  %v2814_v7 = vld [vmem:[%s566_s22 + $0x40] sm:$0xff]  ;;  %v2815_v9 = vld [vmem:[%s566_s22 + $0x48] sm:$0xff] }
 0x360   : > { %v2345_v37 = vpop.f32.mrb[16].mxu1  ;;  %2623 = vmatprep.mubr.bf16.mxu1 %v2423_v35  ;;  %v2817_v35 = vld [vmem:[%s566_s22 + $0x58] sm:$0xff] }
 0x361   : > { %v2347_v38 = vpop.f32.mrb[17].mxu1  ;;  %2624 = vmatmul.mubr.bf16.gmra.mrb[44].mxu1 %v2422_v34  ;;  %v2400_v40 = vmax.f32 %v2345_v37, 0.0  ;;  %2844 = vperm.xlu0 %5253, %v2810_v30   ;;  %v2816_v34 = vld [vmem:[%s566_s22 + $0x50] sm:$0xff]  ;;  %v2818_v37 = vld [vmem:[%s566_s22 + $0x60] sm:$0xff] }
 0x362   : > { %v2349_v39 = vpop.f32.mrb[18].mxu1  ;;  %v2401_v44 = vmax.f32 %v2347_v38, 0.0  ;;  %2849 = vperm.xlu1 %5254, %v2811_v31   ;;  %v2819_v38 = vld [vmem:[%s566_s22 + $0x68] sm:$0xff] }
 0x363   : > { %v2402_v42 = vmax.f32 %v2349_v39, 0.0  ;;  %v2351_v43 = vpop.f32.mrb[19].mxu1  ;;  %v2820_v39 = vld [vmem:[%s566_s22 + $0x70] sm:$0xff] }
 0x364   : > { %v2403_v45 = vmax.f32 %v2351_v43, 0.0 }
 0x365   : > { %v2424_v47 = vpack.c.bf16 %v2402_v42, %v2400_v40  ;;  %2854 = vperm.xlu0 %5253, %v2812_v32   ;;  %v2821_v40 = vld [vmem:[%s566_s22 + $0x78] sm:$0xff] }
 0x366   : > { %v2425_v52 = vpack.c.bf16 %v2403_v45, %v2401_v44 }
 0x368   : > { %v2355_v53 = vpop.f32.mrb[20].mxu1  ;;  %2631 = vmatprep.mubr.bf16.mxu1 %v2425_v52 }
 0x369   : > { %v2357_v54 = vpop.f32.mrb[21].mxu1  ;;  %2632 = vmatmul.mubr.bf16.gmra.mrb[48].mxu1 %v2424_v47  ;;  %v2404_v56 = vmax.f32 %v2355_v53, 0.0  ;;  %2864 = vperm.xlu0 %5253, %v2814_v7   ;;  %v6120_v47 = vld [vmem:[%s6958_s7] ss:$0 sm:$0xff] }
 0x36a   : > { %v2359_v55 = vpop.f32.mrb[22].mxu1  ;;  %v2405_v59 = vmax.f32 %v2357_v54, 0.0 }
 0x36b   : > { %v2406_v57 = vmax.f32 %v2359_v55, 0.0  ;;  %v2361_v58 = vpop.f32.mrb[23].mxu1 }
 0x36c   : > { %v2407_v60 = vmax.f32 %v2361_v58, 0.0 }
 0x36d   : > { %v2426_v61 = vpack.c.bf16 %v2406_v57, %v2404_v56  ;;  %2874 = vperm.xlu0 %5253, %v2816_v34  }
 0x36e   : > { %v2427_v62 = vpack.c.bf16 %v2407_v60, %v2405_v59 }
 0x370   : > { %v2365_v63 = vpop.f32.mrb[24].mxu1  ;;  %2639 = vmatprep.mubr.bf16.mxu1 %v2427_v62 }
 0x371   : > { %v2367_v0 = vpop.f32.mrb[25].mxu1  ;;  %2640 = vmatmul.mubr.bf16.gmra.mrb[52].mxu1 %v2426_v61  ;;  %v2408_v8 = vmax.f32 %v2365_v63, 0.0  ;;  %2884 = vperm.xlu0 %5253, %v2818_v37  }
 0x372   : > { %v2369_v5 = vpop.f32.mrb[26].mxu1  ;;  %v2409_v12 = vmax.f32 %v2367_v0, 0.0 }
 0x373   : > { %v2410_v10 = vmax.f32 %v2369_v5, 0.0  ;;  %v2371_v11 = vpop.f32.mrb[27].mxu1 }
 0x374   : > { %v2411_v13 = vmax.f32 %v2371_v11, 0.0 }
 0x375   : > { %v2428_v14 = vpack.c.bf16 %v2410_v10, %v2408_v8  ;;  %2894 = vperm.xlu0 %5253, %v2820_v39  }
 0x376   : > { %v2429_v15 = vpack.c.bf16 %v2411_v13, %v2409_v12 }
 0x378   : > { %v2375_v16 = vpop.f32.mrb[28].mxu1  ;;  %2647 = vmatprep.mubr.bf16.mxu1 %v2429_v15 }
 0x379   : > { %v2377_v17 = vpop.f32.mrb[29].mxu1  ;;  %2648 = vmatmul.mubr.bf16.gmra.mrb[56].mxu1 %v2428_v14  ;;  %v2412_v19 = vmax.f32 %v2375_v16, 0.0 }
 0x37a   : > { %v2379_v18 = vpop.f32.mrb[30].mxu1  ;;  %v2413_v22 = vmax.f32 %v2377_v17, 0.0 }
 0x37b   : > { %v2414_v20 = vmax.f32 %v2379_v18, 0.0  ;;  %v2381_v21 = vpop.f32.mrb[31].mxu1 }
 0x37c   : > { %v2415_v23 = vmax.f32 %v2381_v21, 0.0 }
 0x37d   : > { %v2430_v24 = vpack.c.bf16 %v2414_v20, %v2412_v19 }
 0x37e   : > { %v2431_v25 = vpack.c.bf16 %v2415_v23, %v2413_v22 }
 0x380   : > { %2655 = vmatprep.mubr.bf16.mxu1 %v2431_v25 }
 0x381   : > { %2656 = vmatmul.mubr.bf16.gmra.mrb[60].mxu1 %v2430_v24 }
 0x382   : > { %4865 = vmatprep.mubr.bf16.mxu1 %v6027_v33  ;;  %v2813_v33 = vld [vmem:[%s566_s22 + $0x38] sm:$0xff]  ;;  %s6991_s22 = sld [smem:[#allocation11_spill]] }
 0x383   : > { %2859 = vperm.xlu1 %5254, %v2813_v33  }
 0x387   : > { %2869 = vperm.xlu1 %5254, %v2815_v9  }
 0x38b   : > { %2879 = vperm.xlu1 %5254, %v2817_v35  }
 0x38f   : > { %2889 = vperm.xlu1 %5254, %v2819_v38  }
 0x393   : > { %2899 = vperm.xlu1 %5254, %v2821_v40  }
 0x41c   : > { %v4727_v42 = vpop.f32.mrb[32].mxu1 }
 0x41d   : > { %v4728_v43 = vpop.f32.mrb[33].mxu1 }
 0x41e   : > { %v4729_v44 = vadd.f32 %v4728_v43, %v4727_v42  ;;  %v4730_v45 = vpop.f32.mrb[34].mxu1 }
 0x41f   : > { %v4731_v52 = vpop.f32.mrb[35].mxu1 }
 0x420   : > { %v4732_v53 = vadd.f32 %v4731_v52, %v4730_v45  ;;  %v2602_v54 = vadd.f32 %v4729_v44, %v6120_v47 }
 0x422   : > { %v2605_v55 = vadd.f32 %v4732_v53, %v6120_v47 }
 0x424   : > { %v4733_v56 = vpop.f32.mrb[36].mxu1  ;;  %v2664_v57 = vpack.c.bf16 %v2605_v55, %v2602_v54 }
 0x425   : > { %v4734_v58 = vpop.f32.mrb[37].mxu1 }
 0x426   : > { %v4735_v59 = vadd.f32 %v4734_v58, %v4733_v56  ;;  %v4736_v60 = vpop.f32.mrb[38].mxu1  ;;  %4849 = vmatprep.subr.bf16.mxu1 %v2664_v57 }
 0x427   : > { %v4737_v61 = vpop.f32.mrb[39].mxu1  ;;  %4850 = vmatpush3.bf16.msra.mxu1 %v2664_v57 }
 0x428   : > { %v4738_v62 = vadd.f32 %v4737_v61, %v4736_v60  ;;  %v2610_v63 = vadd.f32 %v4735_v59, %v6120_v47 }
 0x42a   : > { %v2613_v0 = vadd.f32 %v4738_v62, %v6120_v47 }
 0x42c   : > { %v4739_v5 = vpop.f32.mrb[40].mxu1  ;;  %v2665_v8 = vpack.c.bf16 %v2613_v0, %v2610_v63 }
 0x42d   : > { %v4740_v10 = vpop.f32.mrb[41].mxu1 }
 0x42e   : > { %v4741_v11 = vadd.f32 %v4740_v10, %v4739_v5  ;;  %v4742_v12 = vpop.f32.mrb[42].mxu1  ;;  %4851 = vmatprep.subr.bf16.mxu1 %v2665_v8  ;;  %v2937_v10 = vld [vmem:[%s6959_s8 + $0x18] sm:$0xff] }
 0x42f   : > { %v4743_v13 = vpop.f32.mrb[43].mxu1  ;;  %4852 = vmatpush3.bf16.msra.mxu1 %v2665_v8  ;;  %v2935_v8 = vld [vmem:[%s6959_s8 + $0x8] sm:$0xff] }
 0x430   : > { %v4744_v14 = vadd.f32 %v4743_v13, %v4742_v12  ;;  %v2618_v15 = vadd.f32 %v4741_v11, %v6120_v47 }
 0x432   : > { %v2621_v16 = vadd.f32 %v4744_v14, %v6120_v47  ;;  %v4988_v14 = vpack.c.bf16 %v2937_v10, %v2935_v8 }
 0x434   : > { %v4745_v17 = vpop.f32.mrb[44].mxu1  ;;  %v2666_v18 = vpack.c.bf16 %v2621_v16, %v2618_v15  ;;  %v2934_v15 = vld [vmem:[%s6959_s8] sm:$0xff]  ;;  %v2936_v16 = vld [vmem:[%s6959_s8 + $0x10] sm:$0xff] }
 0x435   : > { %v4746_v19 = vpop.f32.mrb[45].mxu1 }
 0x436   : > { %v4747_v20 = vadd.f32 %v4746_v19, %v4745_v17  ;;  %v4748_v21 = vpop.f32.mrb[46].mxu1  ;;  %4853 = vmatprep.subr.bf16.mxu1 %v2666_v18  ;;  %v2939_v17 = vld [vmem:[%s6959_s8 + $0x28] sm:$0xff] }
 0x437   : > { %v4749_v22 = vpop.f32.mrb[47].mxu1  ;;  %4854 = vmatpush3.bf16.msra.mxu1 %v2666_v18  ;;  %v2941_v18 = vld [vmem:[%s6959_s8 + $0x38] sm:$0xff] }
 0x438   : > { %v4750_v23 = vadd.f32 %v4749_v22, %v4748_v21  ;;  %v2626_v24 = vadd.f32 %v4747_v20, %v6120_v47  ;;  %v4992_v19 = vpack.c.bf16 %v2941_v18, %v2939_v17  ;;  %v2938_v20 = vld [vmem:[%s6959_s8 + $0x20] sm:$0xff]  ;;  %v2940_v21 = vld [vmem:[%s6959_s8 + $0x30] sm:$0xff]  ;;  %v2943_v22 = vld [vmem:[%s6959_s8 + $0x48] sm:$0xff] }
 0x43a   : > { %v2629_v25 = vadd.f32 %v4750_v23, %v6120_v47  ;;  %v2945_v23 = vld [vmem:[%s6959_s8 + $0x58] sm:$0xff] }
 0x43c   : > { %v4751_v26 = vpop.f32.mrb[48].mxu1  ;;  %v2667_v27 = vpack.c.bf16 %v2629_v25, %v2626_v24  ;;  %v4994_v24 = vpack.c.bf16 %v2940_v21, %v2938_v20  ;;  %v4996_v25 = vpack.c.bf16 %v2945_v23, %v2943_v22 }
 0x43d   : > { %v4752_v28 = vpop.f32.mrb[49].mxu1 }
 0x43e   : > { %v4753_v29 = vadd.f32 %v4752_v28, %v4751_v26  ;;  %v4754_v30 = vpop.f32.mrb[50].mxu1  ;;  %4855 = vmatprep.subr.bf16.mxu1 %v2667_v27  ;;  %v2942_v26 = vld [vmem:[%s6959_s8 + $0x40] sm:$0xff] }
 0x43f   : > { %v4755_v31 = vpop.f32.mrb[51].mxu1  ;;  %4856 = vmatpush3.bf16.msra.mxu1 %v2667_v27  ;;  %v2944_v27 = vld [vmem:[%s6959_s8 + $0x50] sm:$0xff] }
 0x440   : > { %v4756_v32 = vadd.f32 %v4755_v31, %v4754_v30  ;;  %v2634_v33 = vadd.f32 %v4753_v29, %v6120_v47  ;;  %v4998_v28 = vpack.c.bf16 %v2944_v27, %v2942_v26  ;;  %v2825_v31 = vpop.permute.xlu0 %2824 }
 0x442   : > { %v2637_v7 = vadd.f32 %v4756_v32, %v6120_v47 }
 0x444   : > { %v4757_v9 = vpop.f32.mrb[52].mxu1  ;;  %v2668_v34 = vpack.c.bf16 %v2637_v7, %v2634_v33 }
 0x445   : > { %v4758_v35 = vpop.f32.mrb[53].mxu1 }
 0x446   : > { %v4759_v37 = vadd.f32 %v4758_v35, %v4757_v9  ;;  %v4760_v38 = vpop.f32.mrb[54].mxu1  ;;  %4857 = vmatprep.subr.bf16.mxu1 %v2668_v34  ;;  %v2835_v9 = vpop.permute.xlu1 %2834 }
 0x447   : > { %v4761_v39 = vpop.f32.mrb[55].mxu1  ;;  %4858 = vmatpush3.bf16.msra.mxu1 %v2668_v34 }
 0x448   : > { %v4762_v40 = vadd.f32 %v4761_v39, %v4760_v38  ;;  %v2642_v42 = vadd.f32 %v4759_v37, %v6120_v47  ;;  %v2830_v37 = vpop.permute.xlu0 %2829 }
 0x44a   : > { %v2645_v43 = vadd.f32 %v4762_v40, %v6120_v47 }
 0x44c   : > { %v4763_v44 = vpop.f32.mrb[56].mxu1  ;;  %v2669_v45 = vpack.c.bf16 %v2645_v43, %v2642_v42  ;;  %v2840_v43 = vpop.permute.xlu1 %2839 }
 0x44d   : > { %v4764_v52 = vpop.f32.mrb[57].mxu1 }
 0x44e   : > { %v4765_v53 = vadd.f32 %v4764_v52, %v4763_v44  ;;  %v4766_v54 = vpop.f32.mrb[58].mxu1  ;;  %4859 = vmatprep.subr.bf16.mxu1 %v2669_v45 }
 0x44f   : > { %v4767_v55 = vpop.f32.mrb[59].mxu1  ;;  %4860 = vmatpush3.bf16.msra.mxu1 %v2669_v45 }
 0x450   : > { %v4768_v56 = vadd.f32 %v4767_v55, %v4766_v54  ;;  %v2650_v57 = vadd.f32 %v4765_v53, %v6120_v47 }
 0x452   : > { %v2653_v58 = vadd.f32 %v4768_v56, %v6120_v47  ;;  %v2845_v56 = vpop.permute.xlu0 %2844 }
 0x454   : > { %v4769_v59 = vpop.f32.mrb[60].mxu1  ;;  %v2670_v60 = vpack.c.bf16 %v2653_v58, %v2650_v57 }
 0x455   : > { %v4770_v61 = vpop.f32.mrb[61].mxu1 }
 0x456   : > { %v4771_v62 = vadd.f32 %v4770_v61, %v4769_v59  ;;  %v4772_v63 = vpop.f32.mrb[62].mxu1  ;;  %4861 = vmatprep.subr.bf16.mxu1 %v2670_v60  ;;  %v2855_v8 = vpop.permute.xlu0 %2854 }
 0x457   : > { %v4773_v0 = vpop.f32.mrb[63].mxu1  ;;  %4862 = vmatpush3.bf16.msra.mxu1 %v2670_v60 }
 0x458   : > { %v4774_v5 = vadd.f32 %v4773_v0, %v4772_v63  ;;  %v2658_v11 = vadd.f32 %v4771_v62, %v6120_v47  ;;  %v2850_v62 = vpop.permute.xlu1 %2849 }
 0x45a   : > { %v2661_v12 = vadd.f32 %v4774_v5, %v6120_v47  ;;  %v4990_v47 = vpack.c.bf16 %v2936_v16, %v2934_v15 }
 0x45c   : > { %v2671_v13 = vpack.c.bf16 %v2661_v12, %v2658_v11  ;;  %v2860_v12 = vpop.permute.xlu1 %2859 }
 0x45e   : > { %4863 = vmatprep.subr.bf16.mxu1 %v2671_v13 }
 0x45f   : > { %4864 = vmatpush3.bf16.msra.mxu1 %v2671_v13 }
 0x460   : > { %4989 = vmatprep.subr.bf16.mxu1 %v4988_v14  ;;  %v2870_v21 = vpop.permute.xlu1 %2869 }
 0x462   : > { %4866 = vmatmul.mubr.bf16.vlgmr.msra.gmra.mrb[64].mxu1 %v6044_v36  ;;  %v5692_v36 = vmov 0.0  }
 0x463   : > { %4869 = vmatprep.mubr.bf16.mxu1 %v6061_v41  ;;  %4991 = vmatpush1.bf16.msra.mxu1 %v4990_v47  ;;  %v2947_v41 = vld [vmem:[%s6959_s8 + $0x68] sm:$0xff]  ;;  %v2865_v47 = vpop.permute.xlu0 %2864 }
 0x464   : > { %4993 = vmatprep.subr.bf16.mxu1 %v4992_v19  ;;  %v2880_v27 = vpop.permute.xlu1 %2879 }
 0x467   : > { %4995 = vmatpush1.bf16.msra.mxu1 %v4994_v24  ;;  %v2875_v24 = vpop.permute.xlu0 %2874 }
 0x468   : > { %4997 = vmatprep.subr.bf16.mxu1 %v4996_v25 }
 0x46a   : > { %4870 = vmatmul.mubr.bf16.gmra.mrb[68].mxu1 %v6078_v46  ;;  %v2949_v46 = vld [vmem:[%s6959_s8 + $0x78] sm:$0xff] }
 0x46b   : > { %4873 = vmatprep.mubr.bf16.mxu1 %v6086_v48  ;;  %4999 = vmatpush1.bf16.msra.mxu1 %v4998_v28  ;;  %v5000_v29 = vpack.c.bf16 %v2949_v46, %v2947_v41  ;;  %v2946_v48 = vld [vmem:[%s6959_s8 + $0x60] sm:$0xff]  ;;  %v2885_v46 = vpop.permute.xlu0 %2884 }
 0x46d   : > { %5001 = vmatprep.subr.bf16.mxu1 %v5000_v29 }
 0x472   : > { %4874 = vmatmul.mubr.bf16.gmra.mrb[72].mxu1 %v6091_v49  ;;  %v2948_v49 = vld [vmem:[%s6959_s8 + $0x70] sm:$0xff] }
 0x473   : > { %4877 = vmatprep.mubr.bf16.mxu1 %v6096_v50  ;;  %v5002_v50 = vpack.c.bf16 %v2948_v49, %v2946_v48  ;;  %v2890_v49 = vpop.permute.xlu1 %2889 }
 0x475   : > { %5003 = vmatpush1.bf16.msra.mxu1 %v5002_v50 }
 0x47a   : > { %4878 = vmatmul.mubr.bf16.gmra.mrb[76].mxu1 %v6101_v51  ;;  %v2802_v51 = vand.u32 127, %v785_v2 }
 0x47b   : > { %3075 = vmatprep.mubr.f32.mxu1 %v5692_v36 }
 0x47c   : > { %vm2803_vm0 = vcmp.eq.s32.totalorder %v2802_v51, 63  ;;  %v2895_v51 = vpop.permute.xlu0 %2894 }
 0x47d   : > { %v6196_v30 = vsel %vm2803_vm0, 1.0, %v5692_v36 }
 0x47e   : > { %v2902_v32 = vmul.f32 %v6196_v30, %v2825_v31  ;;  %v2903_v2 = vmul.f32 %v6196_v30, %v2830_v37  ;;  %v2904_v39 = vmul.f32 %v6196_v30, %v2835_v9  ;;  %v2905_v45 = vmul.f32 %v6196_v30, %v2840_v43  ;;  %v2900_v9 = vpop.permute.xlu1 %2899 }
 0x47f   : > { %v2906_v57 = vmul.f32 %v6196_v30, %v2845_v56  ;;  %v2907_v0 = vmul.f32 %v6196_v30, %v2850_v62  ;;  %v2908_v10 = vmul.f32 %v6196_v30, %v2855_v8  ;;  %v2909_v14 = vmul.f32 %v6196_v30, %v2860_v12 }
 0x480   : > { %v2910_v19 = vmul.f32 %v6196_v30, %v2865_v47  ;;  %v2911_v22 = vmul.f32 %v6196_v30, %v2870_v21  ;;  %v2912_v25 = vmul.f32 %v6196_v30, %v2875_v24  ;;  %v2913_v28 = vmul.f32 %v6196_v30, %v2880_v27 }
 0x481   : > { %v2914_v29 = vmul.f32 %v6196_v30, %v2885_v46  ;;  %v2915_v50 = vmul.f32 %v6196_v30, %v2890_v49  ;;  %v2917_v37 = vmul.f32 %v6196_v30, %v2900_v9 }
 0x535   : > { %v6199_v33 = vpop.f32.mrb[64].mxu1 }
 0x536   : > { %v6201_v7 = vpop.f32.mrb[65].mxu1  ;;  %v2920_v52 = vadd.f32 %v6199_v33, %v2904_v39  ;;  %v2950_v39 = vld [vmem:[%s6960_s9] sm:$0x3] }
 0x537   : > { %v2918_v34 = vadd.f32 %v2902_v32, %v6201_v7  ;;  %v6204_v35 = vpop.f32.mrb[66].mxu1  ;;  %v2916_v32 = vmul.f32 %v6196_v30, %v2895_v51  ;;  %v6302_v30 = vrot.slane %v2950_v39, %v791_v6 }
 0x538   : > { %v6206_v38 = vpop.f32.mrb[67].mxu1  ;;  %v2921_v55 = vadd.f32 %v6204_v35, %v2905_v45 }
 0x539   : > { %4654 = vmatmul.mubr.msk.f32.vlgmr.msra.gmra.mrb[80].mxu1 %vm2962_vm1, %v2918_v34  ;;  %v2919_v40 = vadd.f32 %v2903_v2, %v6206_v38 }
 0x53a   : > { %3081 = vmatprep.mubr.f32.mxu1 %v5692_v36 }
 0x53d   : > { %v6213_v42 = vpop.f32.mrb[68].mxu1  ;;  %4655 = vmatmul.mubr.msk.f32.gmra.mrb[82].mxu1 %vm2962_vm1, %v2919_v40  ;;  %v6297_v40 = vrot.slane %v2950_v39, %v5978_v4 }
 0x53e   : > { %v6216_v44 = vpop.f32.mrb[69].mxu1  ;;  %3087 = vmatprep.mubr.f32.mxu1 %v5692_v36  ;;  %v2924_v15 = vadd.f32 %v6213_v42, %v2908_v10 }
 0x53f   : > { %v6221_v53 = vpop.f32.mrb[70].mxu1  ;;  %v2922_v60 = vadd.f32 %v2906_v57, %v6216_v44 }
 0x540   : > { %v6223_v54 = vpop.f32.mrb[71].mxu1  ;;  %v2925_v18 = vadd.f32 %v6221_v53, %v2909_v14 }
 0x541   : > { %4656 = vmatmul.mubr.msk.f32.gmra.mrb[84].mxu1 %vm2962_vm1, %v2920_v52  ;;  %v2923_v5 = vadd.f32 %v2907_v0, %v6223_v54 }
 0x542   : > { %3093 = vmatprep.mubr.f32.mxu1 %v5692_v36 }
 0x545   : > { %v6229_v58 = vpop.f32.mrb[72].mxu1  ;;  %4657 = vmatmul.mubr.msk.f32.gmra.mrb[86].mxu1 %vm2962_vm1, %v2921_v55 }
 0x546   : > { %v6232_v59 = vpop.f32.mrb[73].mxu1  ;;  %3099 = vmatprep.mubr.f32.mxu1 %v5692_v36  ;;  %v2928_v26 = vadd.f32 %v6229_v58, %v2912_v25 }
 0x547   : > { %v6236_v61 = vpop.f32.mrb[74].mxu1  ;;  %v2926_v20 = vadd.f32 %v2910_v19, %v6232_v59 }
 0x548   : > { %v6238_v63 = vpop.f32.mrb[75].mxu1  ;;  %v2929_v41 = vadd.f32 %v6236_v61, %v2913_v28 }
 0x549   : > { %4658 = vmatmul.mubr.msk.f32.gmra.mrb[88].mxu1 %vm2962_vm1, %v2922_v60  ;;  %v2927_v23 = vadd.f32 %v2911_v22, %v6238_v63 }
 0x54a   : > { %3105 = vmatprep.mubr.f32.mxu1 %v5692_v36 }
 0x54d   : > { %v6245_v11 = vpop.f32.mrb[76].mxu1  ;;  %4659 = vmatmul.mubr.msk.f32.gmra.mrb[90].mxu1 %vm2962_vm1, %v2923_v5 }
 0x54e   : > { %v6248_v13 = vpop.f32.mrb[77].mxu1  ;;  %3111 = vmatprep.mubr.f32.mxu1 %v5692_v36  ;;  %v2932_v34 = vadd.f32 %v6245_v11, %v2916_v32 }
 0x54f   : > { %v6253_v16 = vpop.f32.mrb[78].mxu1  ;;  %v2930_v48 = vadd.f32 %v2914_v29, %v6248_v13 }
 0x550   : > { %v6255_v17 = vpop.f32.mrb[79].mxu1  ;;  %v2933_v2 = vadd.f32 %v6253_v16, %v2917_v37 }
 0x551   : > { %4660 = vmatmul.mubr.msk.f32.gmra.mrb[92].mxu1 %vm2962_vm1, %v2924_v15  ;;  %v2931_v31 = vadd.f32 %v2915_v50, %v6255_v17 }
 0x552   : > { %3117 = vmatprep.mubr.f32.mxu1 %v5692_v36 }
 0x555   : > { %4661 = vmatmul.mubr.msk.f32.gmra.mrb[94].mxu1 %vm2962_vm1, %v2925_v18 }
 0x556   : > { %3123 = vmatprep.mubr.f32.mxu1 %v5692_v36 }
 0x559   : > { %4662 = vmatmul.mubr.msk.f32.gmra.mrb[96].mxu1 %vm2962_vm1, %v2926_v20 }
 0x55a   : > { %3129 = vmatprep.mubr.f32.mxu1 %v5692_v36 }
 0x55d   : > { %4663 = vmatmul.mubr.msk.f32.gmra.mrb[98].mxu1 %vm2962_vm1, %v2927_v23 }
 0x55e   : > { %3135 = vmatprep.mubr.f32.mxu1 %v5692_v36 }
 0x561   : > { %4664 = vmatmul.mubr.msk.f32.gmra.mrb[100].mxu1 %vm2962_vm1, %v2928_v26 }
 0x562   : > { %3141 = vmatprep.mubr.f32.mxu1 %v5692_v36 }
 0x565   : > { %4665 = vmatmul.mubr.msk.f32.gmra.mrb[102].mxu1 %vm2962_vm1, %v2929_v41 }
 0x566   : > { %3147 = vmatprep.mubr.f32.mxu1 %v5692_v36 }
 0x569   : > { %4666 = vmatmul.mubr.msk.f32.gmra.mrb[104].mxu1 %vm2962_vm1, %v2930_v48 }
 0x56a   : > { %3153 = vmatprep.mubr.f32.mxu1 %v5692_v36 }
 0x56d   : > { %4667 = vmatmul.mubr.msk.f32.gmra.mrb[106].mxu1 %vm2962_vm1, %v2931_v31 }
 0x56e   : > { %3159 = vmatprep.mubr.f32.mxu1 %v5692_v36 }
 0x571   : > { %4668 = vmatmul.mubr.msk.f32.gmra.mrb[108].mxu1 %vm2962_vm1, %v2932_v34 }
 0x572   : > { %3165 = vmatprep.mubr.f32.mxu1 %v5692_v36 }
 0x575   : > { %4669 = vmatmul.mubr.msk.f32.gmra.mrb[110].mxu1 %vm2962_vm1, %v2933_v2 }
 0x60c   : > { %v3077_v43 = vpop.f32.mrb[80].mxu1 }
 0x60d   : > { %v3078_v45 = vadd.f32 %v3077_v43, %v6297_v40  ;;  %v3079_v52 = vpop.f32.mrb[81].mxu1 }
 0x60e   : > { %v3080_v57 = vadd.f32 %v3079_v52, %v6302_v30 }
 0x60f   : > { %4913 = vmatprep.mubr.msk.f32.mxu1 %vm2962_vm1, %v3078_v45 }
 0x610   : > { %v3083_v36 = vpop.f32.mrb[82].mxu1 }
 0x611   : > { %v6306_v55 = vadd.f32 %v3083_v36, %v6297_v40  ;;  %v3085_v56 = vpop.f32.mrb[83].mxu1 }
 0x612   : > { %v3086_v60 = vadd.f32 %v3085_v56, %v6302_v30 }
 0x613   : > { %v5255_v62 = vpack.i.bf16 %v6306_v55, %v3078_v45 }
 0x614   : > { %v6311_v0 = vpack.c.bf16 %v3086_v60, %v3080_v57  ;;  %v3089_v5 = vpop.f32.mrb[84].mxu1 }
 0x615   : > { %v3091_v8 = vpop.f32.mrb[85].mxu1  ;;  %5256 = vrot.lane.b32.xlu0 %v5255_v62, %s5693_s20  ;;  %v6315_v6 = vadd.f32 %v3089_v5, %v6297_v40 }
 0x616   : > { %v3092_v14 = vadd.f32 %v3091_v8, %v6302_v30 }
 0x618   : > { %v3095_v3 = vpop.f32.mrb[86].mxu1 }
 0x619   : > { %v6318_v10 = vadd.f32 %v3095_v3, %v6297_v40  ;;  %v3097_v12 = vpop.f32.mrb[87].mxu1 }
 0x61a   : > { %v3098_v15 = vadd.f32 %v3097_v12, %v6302_v30 }
 0x61b   : > { %v5260_v18 = vpack.i.bf16 %v6318_v10, %v6315_v6 }
 0x61c   : > { %v6324_v47 = vpack.c.bf16 %v3098_v15, %v3092_v14  ;;  %v3101_v19 = vpop.f32.mrb[88].mxu1 }
 0x61d   : > { %v3103_v20 = vpop.f32.mrb[89].mxu1  ;;  %5261 = vrot.lane.b32.xlu1 %v5260_v18, %s5693_s20  ;;  %v6328_v22 = vadd.f32 %v3101_v19, %v6297_v40 }
 0x61e   : > { %v3104_v25 = vadd.f32 %v3103_v20, %v6302_v30 }
 0x620   : > { %v3107_v21 = vpop.f32.mrb[90].mxu1 }
 0x621   : > { %v6331_v23 = vadd.f32 %v3107_v21, %v6297_v40  ;;  %v3109_v24 = vpop.f32.mrb[91].mxu1 }
 0x622   : > { %v3110_v26 = vadd.f32 %v3109_v24, %v6302_v30 }
 0x623   : > { %v5265_v27 = vpack.i.bf16 %v6331_v23, %v6328_v22 }
 0x624   : > { %v6337_v28 = vpack.c.bf16 %v3110_v26, %v3104_v25  ;;  %v3113_v41 = vpop.f32.mrb[92].mxu1 }
 0x625   : > { %v3115_v46 = vpop.f32.mrb[93].mxu1  ;;  %5266 = vrot.lane.b32.xlu0 %v5265_v27, %s5693_s20  ;;  %v6341_v48 = vadd.f32 %v3113_v41, %v6297_v40 }
 0x626   : > { %v3116_v51 = vadd.f32 %v3115_v46, %v6302_v30 }
 0x628   : > { %v3119_v29 = vpop.f32.mrb[94].mxu1 }
 0x629   : > { %v6344_v49 = vadd.f32 %v3119_v29, %v6297_v40  ;;  %v3121_v50 = vpop.f32.mrb[95].mxu1 }
 0x62a   : > { %v3122_v31 = vadd.f32 %v3121_v50, %v6302_v30 }
 0x62b   : > { %v5270_v32 = vpack.i.bf16 %v6344_v49, %v6341_v48 }
 0x62c   : > { %v6350_v9 = vpack.c.bf16 %v3122_v31, %v3116_v51  ;;  %v3125_v34 = vpop.f32.mrb[96].mxu1 }
 0x62d   : > { %v3127_v37 = vpop.f32.mrb[97].mxu1  ;;  %5271 = vrot.lane.b32.xlu1 %v5270_v32, %s5693_s20  ;;  %v6354_v39 = vadd.f32 %v3125_v34, %v6297_v40 }
 0x62e   : > { %v3128_v52 = vadd.f32 %v3127_v37, %v6302_v30 }
 0x630   : > { %v3131_v2 = vpop.f32.mrb[98].mxu1 }
 0x631   : > { %v6357_v43 = vadd.f32 %v3131_v2, %v6297_v40  ;;  %v3133_v45 = vpop.f32.mrb[99].mxu1 }
 0x632   : > { %v3134_v36 = vadd.f32 %v3133_v45, %v6302_v30 }
 0x633   : > { %v5275_v56 = vpack.i.bf16 %v6357_v43, %v6354_v39 }
 0x634   : > { %v6363_v57 = vpack.c.bf16 %v3134_v36, %v3128_v52  ;;  %v3137_v60 = vpop.f32.mrb[100].mxu1 }
 0x635   : > { %v3139_v62 = vpop.f32.mrb[101].mxu1  ;;  %5276 = vrot.lane.b32.xlu0 %v5275_v56, %s5693_s20  ;;  %v6367_v8 = vadd.f32 %v3137_v60, %v6297_v40 }
 0x636   : > { %v3140_v14 = vadd.f32 %v3139_v62, %v6302_v30 }
 0x638   : > { %v3143_v5 = vpop.f32.mrb[102].mxu1 }
 0x639   : > { %v6370_v3 = vadd.f32 %v3143_v5, %v6297_v40  ;;  %v3145_v12 = vpop.f32.mrb[103].mxu1 }
 0x63a   : > { %v3146_v15 = vadd.f32 %v3145_v12, %v6302_v30 }
 0x63b   : > { %v5280_v18 = vpack.i.bf16 %v6370_v3, %v6367_v8 }
 0x63c   : > { %v6376_v19 = vpack.c.bf16 %v3146_v15, %v3140_v14  ;;  %v3149_v20 = vpop.f32.mrb[104].mxu1 }
 0x63d   : > { %v3151_v21 = vpop.f32.mrb[105].mxu1  ;;  %5281 = vrot.lane.b32.xlu1 %v5280_v18, %s5693_s20  ;;  %v6380_v25 = vadd.f32 %v3149_v20, %v6297_v40 }
 0x63e   : > { %v3152_v41 = vadd.f32 %v3151_v21, %v6302_v30 }
 0x640   : > { %v3155_v24 = vpop.f32.mrb[106].mxu1 }
 0x641   : > { %v6383_v26 = vadd.f32 %v3155_v24, %v6297_v40  ;;  %v3157_v27 = vpop.f32.mrb[107].mxu1 }
 0x642   : > { %v3158_v46 = vadd.f32 %v3157_v27, %v6302_v30 }
 0x643   : > { %v5285_v29 = vpack.i.bf16 %v6383_v26, %v6380_v25 }
 0x644   : > { %v6389_v50 = vpack.c.bf16 %v3158_v46, %v3152_v41  ;;  %v3161_v51 = vpop.f32.mrb[108].mxu1 }
 0x645   : > { %v3163_v31 = vpop.f32.mrb[109].mxu1  ;;  %5286 = vrot.lane.b32.xlu0 %v5285_v29, %s5693_s20  ;;  %v6393_v34 = vadd.f32 %v3161_v51, %v6297_v40 }
 0x646   : > { %v3164_v45 = vadd.f32 %v3163_v31, %v6302_v30  ;;  %v3450_v31 = vld [vmem:[%s6511_s28 + $0x28] sm:$0xff] }
 0x648   : > { %v3167_v32 = vpop.f32.mrb[110].mxu1 }
 0x649   : > { %v6396_v37 = vadd.f32 %v3167_v32, %v6297_v40  ;;  %v3169_v2 = vpop.f32.mrb[111].mxu1 }
 0x64a   : > { %v3170_v52 = vadd.f32 %v3169_v2, %v6302_v30  ;;  %v3449_v2 = vld [vmem:[%s6511_s28 + $0x20] sm:$0xff] }
 0x64b   : > { %v5290_v36 = vpack.i.bf16 %v6396_v37, %v6393_v34 }
 0x64c   : > { %v6402_v56 = vpack.c.bf16 %v3170_v52, %v3164_v45 }
 0x64d   : > { %5291 = vrot.lane.b32.xlu1 %v5290_v36, %s5693_s20 }
 0x663   : > { %2769 = vxpose.xlu0.b32.start [1/16] (narrow) %v6201_v7, 8 }
 0x667   : > { %2770 = vxpose.xlu0.b32.cont [2/16] (narrow) %v6206_v38, 8 }
 0x66b   : > { %2771 = vxpose.xlu0.b32.cont [3/16] (narrow) %v6199_v33, 8 }
 0x66f   : > { %2772 = vxpose.xlu0.b32.cont [4/16] (narrow) %v6204_v35, 8 }
 0x673   : > { %2773 = vxpose.xlu0.b32.cont [5/16] (narrow) %v6216_v44, 8 }
 0x677   : > { %2774 = vxpose.xlu0.b32.cont [6/16] (narrow) %v6223_v54, 8 }
 0x67b   : > { %2775 = vxpose.xlu0.b32.cont [7/16] (narrow) %v6213_v42, 8 }
 0x67f   : > { %2776 = vxpose.xlu0.b32.cont [8/16] (narrow) %v6221_v53, 8 }
 0x683   : > { %2777 = vxpose.xlu0.b32.cont [9/16] (narrow) %v6232_v59, 8 }
 0x687   : > { %v5257_v40 = vpop.permute.xlu0 %5256  ;;  %2778 = vxpose.xlu0.b32.cont [10/16] (narrow) %v6238_v63, 8 }
 0x688   : > { %v5259_v7 = vunpack.i.h.bf16 %v5257_v40  ;;  %v5258_v30 = vunpack.i.l.bf16 %v5257_v40  ;;  %v3452_v40 = vld [vmem:[%s6511_s28 + $0x38] sm:$0xff] }
 0x68a   : > { %v5004_v35 = vpack.c.bf16 %v5259_v7, %v5258_v30 }
 0x68b   : > { %2779 = vxpose.xlu0.b32.cont [11/16] (narrow) %v6229_v58, 8 }
 0x68c   : > { %5006 = vmatprep.subr.msk.bf16.mxu1 %vm6417_vm2, %v5004_v35 }
 0x68d   : > { %5009 = vmatpush3.bf16.xpose.msk.msra.mxu1 %vm6417_vm2, %v5004_v35  ;;  %v3451_v35 = vld [vmem:[%s6511_s28 + $0x30] sm:$0xff] }
 0x68f   : > { %v5262_v38 = vpop.permute.xlu1 %5261  ;;  %2780 = vxpose.xlu0.b32.cont [12/16] (narrow) %v6236_v61, 8 }
 0x690   : > { %v5264_v42 = vunpack.i.h.bf16 %v5262_v38  ;;  %v5263_v44 = vunpack.i.l.bf16 %v5262_v38 }
 0x692   : > { %v5010_v53 = vpack.c.bf16 %v5264_v42, %v5263_v44 }
 0x693   : > { %2781 = vxpose.xlu0.b32.cont [13/16] (narrow) %v6248_v13, 8 }
 0x694   : > { %5012 = vmatprep.subr.msk.bf16.mxu1 %vm6417_vm2, %v5010_v53 }
 0x695   : > { %5015 = vmatpush3.bf16.xpose.msk.msra.mxu1 %vm6417_vm2, %v5010_v53 }
 0x697   : > { %v5267_v54 = vpop.permute.xlu0 %5266  ;;  %2782 = vxpose.xlu0.b32.cont [14/16] (narrow) %v6255_v17, 8 }
 0x698   : > { %v5269_v58 = vunpack.i.h.bf16 %v5267_v54  ;;  %v5268_v59 = vunpack.i.l.bf16 %v5267_v54  ;;  %v3454_v54 = vld [vmem:[%s6511_s28 + $0x48] sm:$0xff] }
 0x69a   : > { %v5016_v63 = vpack.c.bf16 %v5269_v58, %v5268_v59 }
 0x69b   : > { %2783 = vxpose.xlu0.b32.cont [15/16] (narrow) %v6245_v11, 8 }
 0x69c   : > { %5018 = vmatprep.subr.msk.bf16.mxu1 %vm6417_vm2, %v5016_v63 }
 0x69d   : > { %5021 = vmatpush3.bf16.xpose.msk.msra.mxu1 %vm6417_vm2, %v5016_v63 }
 0x69f   : > { %v5272_v61 = vpop.permute.xlu1 %5271  ;;  %2784 = vxpose.xlu0.b32.end [16/16] (narrow) %v6253_v16, 8 }
 0x6a0   : > { %v5274_v13 = vunpack.i.h.bf16 %v5272_v61  ;;  %v5273_v60 = vunpack.i.l.bf16 %v5272_v61  ;;  %v3453_v61 = vld [vmem:[%s6511_s28 + $0x40] sm:$0xff] }
 0x6a2   : > { %v5022_v62 = vpack.c.bf16 %v5274_v13, %v5273_v60 }
 0x6a4   : > { %5024 = vmatprep.subr.msk.bf16.mxu1 %vm6417_vm2, %v5022_v62 }
 0x6a5   : > { %5027 = vmatpush3.bf16.xpose.msk.msra.mxu1 %vm6417_vm2, %v5022_v62 }
 0x6a7   : > { %v5277_v17 = vpop.permute.xlu0 %5276 }
 0x6a8   : > { %v5279_v11 = vunpack.i.h.bf16 %v5277_v17  ;;  %v5278_v5 = vunpack.i.l.bf16 %v5277_v17 }
 0x6aa   : > { %v5028_v12 = vpack.c.bf16 %v5279_v11, %v5278_v5  ;;  %v3456_v11 = vld [vmem:[%s6511_s28 + $0x58] sm:$0xff] }
 0x6ac   : > { %5030 = vmatprep.subr.msk.bf16.mxu1 %vm6417_vm2, %v5028_v12 }
 0x6ad   : > { %5033 = vmatpush3.bf16.xpose.msk.msra.mxu1 %vm6417_vm2, %v5028_v12 }
 0x6af   : > { %v5282_v16 = vpop.permute.xlu1 %5281 }
 0x6b0   : > { %v5284_v14 = vunpack.i.h.bf16 %v5282_v16  ;;  %v5283_v15 = vunpack.i.l.bf16 %v5282_v16 }
 0x6b2   : > { %v5034_v18 = vpack.c.bf16 %v5284_v14, %v5283_v15  ;;  %v3455_v14 = vld [vmem:[%s6511_s28 + $0x50] sm:$0xff] }
 0x6b4   : > { %5036 = vmatprep.subr.msk.bf16.mxu1 %vm6417_vm2, %v5034_v18 }
 0x6b5   : > { %5039 = vmatpush3.bf16.xpose.msk.msra.mxu1 %vm6417_vm2, %v5034_v18 }
 0x6b7   : > { %v5287_v20 = vpop.permute.xlu0 %5286 }
 0x6b8   : > { %v5289_v21 = vunpack.i.h.bf16 %v5287_v20  ;;  %v5288_v24 = vunpack.i.l.bf16 %v5287_v20 }
 0x6ba   : > { %v5040_v27 = vpack.c.bf16 %v5289_v21, %v5288_v24  ;;  %v3458_v24 = vld [vmem:[%s6511_s28 + $0x68] sm:$0xff] }
 0x6bc   : > { %5042 = vmatprep.subr.msk.bf16.mxu1 %vm6417_vm2, %v5040_v27 }
 0x6bd   : > { %5045 = vmatpush3.bf16.xpose.msk.msra.mxu1 %vm6417_vm2, %v5040_v27 }
 0x6bf   : > { %v5292_v41 = vpop.permute.xlu1 %5291 }
 0x6c0   : > { %v5294_v46 = vunpack.i.h.bf16 %v5292_v41  ;;  %v5293_v29 = vunpack.i.l.bf16 %v5292_v41 }
 0x6c2   : > { %v5046_v51 = vpack.c.bf16 %v5294_v46, %v5293_v29  ;;  %v3457_v29 = vld [vmem:[%s6511_s28 + $0x60] sm:$0xff] }
 0x6c4   : > { %5048 = vmatprep.subr.msk.bf16.mxu1 %vm6417_vm2, %v5046_v51 }
 0x6c5   : > { %5051 = vmatpush3.bf16.xpose.msk.msra.mxu1 %vm6417_vm2, %v5046_v51 }
 0x6c6   : > { %4937 = vmatprep.subr.bf16.mxu1 %v6311_v0 }
 0x6cc   : > { %4914 = vmatmul.mubr.msk.f32.vlgmr.msra.gmra.mrb[112].mxu1 %vm2962_vm1, %v6306_v55 }
 0x6cd   : > { %4916 = vmatprep.mubr.msk.f32.mxu1 %vm2962_vm1, %v6315_v6  ;;  %4938 = vmatpush3.bf16.msra.mxu1 %v6311_v0 }
 0x6ce   : > { %4939 = vmatprep.subr.bf16.mxu1 %v6324_v47 }
 0x6d0   : > { %4917 = vmatmul.mubr.msk.f32.gmra.mrb[114].mxu1 %vm2962_vm1, %v6318_v10 }
 0x6d1   : > { %4919 = vmatprep.mubr.msk.f32.mxu1 %vm2962_vm1, %v6328_v22  ;;  %4940 = vmatpush3.bf16.msra.mxu1 %v6324_v47  ;;  %v3446_v47 = vld [vmem:[%s6511_s28 + $0x8] sm:$0xff] }
 0x6d2   : > { %4941 = vmatprep.subr.bf16.mxu1 %v6337_v28 }
 0x6d4   : > { %4920 = vmatmul.mubr.msk.f32.gmra.mrb[116].mxu1 %vm2962_vm1, %v6331_v23 }
 0x6d5   : > { %4922 = vmatprep.mubr.msk.f32.mxu1 %vm2962_vm1, %v6341_v48  ;;  %4942 = vmatpush3.bf16.msra.mxu1 %v6337_v28  ;;  %v3445_v28 = vld [vmem:[%s6511_s28] sm:$0xff] }
 0x6d6   : > { %4943 = vmatprep.subr.bf16.mxu1 %v6350_v9 }
 0x6d8   : > { %4923 = vmatmul.mubr.msk.f32.gmra.mrb[118].mxu1 %vm2962_vm1, %v6344_v49 }
 0x6d9   : > { %4925 = vmatprep.mubr.msk.f32.mxu1 %vm2962_vm1, %v6354_v39  ;;  %4944 = vmatpush3.bf16.msra.mxu1 %v6350_v9 }
 0x6da   : > { %4945 = vmatprep.subr.bf16.mxu1 %v6363_v57 }
 0x6dc   : > { %4926 = vmatmul.mubr.msk.f32.gmra.mrb[120].mxu1 %vm2962_vm1, %v6357_v43  ;;  %v3448_v43 = vld [vmem:[%s6511_s28 + $0x18] sm:$0xff] }
 0x6dd   : > { %4928 = vmatprep.mubr.msk.f32.mxu1 %vm2962_vm1, %v6367_v8  ;;  %4946 = vmatpush3.bf16.msra.mxu1 %v6363_v57 }
 0x6de   : > { %4947 = vmatprep.subr.bf16.mxu1 %v6376_v19 }
 0x6e0   : > { %4929 = vmatmul.mubr.msk.f32.gmra.mrb[122].mxu1 %vm2962_vm1, %v6370_v3  ;;  %v3447_v3 = vld [vmem:[%s6511_s28 + $0x10] sm:$0xff] }
 0x6e1   : > { %4931 = vmatprep.mubr.msk.f32.mxu1 %vm2962_vm1, %v6380_v25  ;;  %4948 = vmatpush3.bf16.msra.mxu1 %v6376_v19 }
 0x6e2   : > { %4949 = vmatprep.subr.bf16.mxu1 %v6389_v50 }
 0x6e3   : > { %v2785_v55 = vpop.trf.xlu0 }
 0x6e4   : > { %4932 = vmatmul.mubr.msk.f32.gmra.mrb[124].mxu1 %vm2962_vm1, %v6383_v26  ;;  %vm3477_vm3 = vcmp.eq.f32.partialorder %v2785_v55, 0.0 }
 0x6e5   : > { %4934 = vmatprep.mubr.msk.f32.mxu1 %vm2962_vm1, %v6393_v34  ;;  %4950 = vmatpush3.bf16.msra.mxu1 %v6389_v50  ;;  %v3478_v0 = vsel %vm3477_vm3, 1, %v5691_v1 }
 0x6e6   : > { %4951 = vmatprep.subr.bf16.mxu1 %v6402_v56  ;;  %v3482_v6 = vrot.slane %v3478_v0, %v5978_v4 }
 0x6e8   : > { %4935 = vmatmul.mubr.msk.f32.gmra.mrb[126].mxu1 %vm2962_vm1, %v6396_v37  ;;  %vm6516_vm4 = vcmp.eq.s32.totalorder %v3482_v6, 1  ;;  %v3460_v6 = vld [vmem:[%s6511_s28 + $0x78] sm:$0xff] }
 0x6e9   : > { %4952 = vmatpush3.bf16.msra.mxu1 %v6402_v56 }
 0x79f   : > { %v4915_v10 = vpop.f32.mrb[112].mxu1 }
 0x7a0   : > { %v3430_v22 = vmul.f32 0.125, %v4915_v10  ;;  %v3350_v23 = vpop.f32.mrb[113].mxu1 }
 0x7a1   : > { %v3429_v48 = vmul.f32 0.125, %v3350_v23 }
 0x7a2   : > { %v3462_v49 = vadd.f32 %v3446_v47, %v3430_v22 }
 0x7a3   : > { %v4918_v9 = vpop.f32.mrb[114].mxu1  ;;  %v3461_v39 = vadd.f32 %v3445_v28, %v3429_v48  ;;  %v3459_v28 = vld [vmem:[%s6511_s28 + $0x70] sm:$0xff] }
 0x7a4   : > { %v3432_v57 = vmul.f32 0.125, %v4918_v9  ;;  %v3360_v8 = vpop.f32.mrb[115].mxu1  ;;  %v6523_v4 = vsel %vm6516_vm4, -1e+09, %v3462_v49 }
 0x7a5   : > { %v3431_v19 = vmul.f32 0.125, %v3360_v8  ;;  %3502 = vmax.xlane.f32.xlu1 %v6523_v4  ;;  %v6530_v37 = vsel %vm6516_vm4, -1e+09, %v3461_v39 }
 0x7a6   : > { %v3464_v25 = vadd.f32 %v3448_v43, %v3432_v57 }
 0x7a7   : > { %v4921_v26 = vpop.f32.mrb[116].mxu1  ;;  %v3463_v50 = vadd.f32 %v3447_v3, %v3431_v19 }
 0x7a8   : > { %v3434_v32 = vmul.f32 0.125, %v4921_v26  ;;  %v3370_v34 = vpop.f32.mrb[117].mxu1  ;;  %v6537_v33 = vsel %vm6516_vm4, -1e+09, %v3464_v25 }
 0x7a9   : > { %v3433_v45 = vmul.f32 0.125, %v3370_v34  ;;  %3500 = vmax.xlane.f32.xlu1 %v6530_v37  ;;  %v6544_v63 = vsel %vm6516_vm4, -1e+09, %v3463_v50 }
 0x7aa   : > { %v3466_v52 = vadd.f32 %v3450_v31, %v3434_v32 }
 0x7ab   : > { %v4924_v36 = vpop.f32.mrb[118].mxu1  ;;  %v3465_v56 = vadd.f32 %v3449_v2, %v3433_v45 }
 0x7ac   : > { %v3436_v7 = vmul.f32 0.125, %v4924_v36  ;;  %v3380_v30 = vpop.f32.mrb[119].mxu1  ;;  %v6551_v16 = vsel %vm6516_vm4, -1e+09, %v3466_v52 }
 0x7ad   : > { %v3435_v38 = vmul.f32 0.125, %v3380_v30  ;;  %3506 = vmax.xlane.f32.xlu1 %v6537_v33  ;;  %v3488_v46 = vsel %vm6516_vm4, -1e+09, %v3465_v56 }
 0x7ae   : > { %v3468_v42 = vadd.f32 %v3452_v40, %v3436_v7 }
 0x7af   : > { %v4927_v44 = vpop.f32.mrb[120].mxu1  ;;  %v3467_v53 = vadd.f32 %v3451_v35, %v3435_v38 }
 0x7b0   : > { %v3438_v58 = vmul.f32 0.125, %v4927_v44  ;;  %v3390_v59 = vpop.f32.mrb[121].mxu1  ;;  %v3491_v23 = vsel %vm6516_vm4, -1e+09, %v3468_v42 }
 0x7b1   : > { %v3437_v13 = vmul.f32 0.125, %v3390_v59  ;;  %3504 = vmax.xlane.f32.xlu1 %v6544_v63  ;;  %v3490_v39 = vsel %vm6516_vm4, -1e+09, %v3467_v53 }
 0x7b2   : > { %v3470_v60 = vadd.f32 %v3454_v54, %v3438_v58 }
 0x7b3   : > { %v4930_v62 = vpop.f32.mrb[122].mxu1  ;;  %v3469_v17 = vadd.f32 %v3453_v61, %v3437_v13 }
 0x7b4   : > { %v3440_v5 = vmul.f32 0.125, %v4930_v62  ;;  %v3400_v12 = vpop.f32.mrb[123].mxu1  ;;  %v3493_v57 = vsel %vm6516_vm4, -1e+09, %v3470_v60 }
 0x7b5   : > { %v3439_v15 = vmul.f32 0.125, %v3400_v12  ;;  %3510 = vmax.xlane.f32.xlu1 %v6551_v16  ;;  %v6574_v8 = vsel %vm6516_vm4, -1e+09, %v3469_v17 }
 0x7b6   : > { %v3472_v18 = vadd.f32 %v3456_v11, %v3440_v5 }
 0x7b7   : > { %v4933_v20 = vpop.f32.mrb[124].mxu1  ;;  %v3471_v21 = vadd.f32 %v3455_v14, %v3439_v15 }
 0x7b8   : > { %v3442_v27 = vmul.f32 0.125, %v4933_v20  ;;  %v3410_v41 = vpop.f32.mrb[125].mxu1  ;;  %v6579_v3 = vsel %vm6516_vm4, -1e+09, %v3472_v18 }
 0x7b9   : > { %v3441_v51 = vmul.f32 0.125, %v3410_v41  ;;  %3508 = vmax.xlane.f32.xlu1 %v3488_v46  ;;  %v6584_v19 = vsel %vm6516_vm4, -1e+09, %v3471_v21 }
 0x7ba   : > { %v3474_v55 = vadd.f32 %v3458_v24, %v3442_v27 }
 0x7bb   : > { %v4936_v0 = vpop.f32.mrb[126].mxu1  ;;  %v3473_v10 = vadd.f32 %v3457_v29, %v3441_v51 }
 0x7bc   : > { %v3444_v47 = vmul.f32 0.125, %v4936_v0  ;;  %v3420_v22 = vpop.f32.mrb[127].mxu1  ;;  %v6589_v25 = vsel %vm6516_vm4, -1e+09, %v3474_v55 }
 0x7bd   : > { %v3443_v48 = vmul.f32 0.125, %v3420_v22  ;;  %3514 = vmax.xlane.f32.xlu1 %v3491_v23  ;;  %v6594_v26 = vsel %vm6516_vm4, -1e+09, %v3473_v10 }
 0x7be   : > { %v3476_v49 = vadd.f32 %v3460_v6, %v3444_v47 }
 0x7bf   : > { %v3475_v9 = vadd.f32 %v3459_v28, %v3443_v48 }
 0x7c0   : > { %v6567_v43 = vsel %vm6516_vm4, -1e+09, %v3476_v49 }
 0x7c1   : > { %3512 = vmax.xlane.f32.xlu1 %v3490_v39  ;;  %3530 = vmax.xlane.f32.xlu0 %v6567_v43  ;;  %v6599_v50 = vsel %vm6516_vm4, -1e+09, %v3475_v9 }
 0x7c5   : > { %3518 = vmax.xlane.f32.xlu1 %v3493_v57 }
 0x7c9   : > { %3516 = vmax.xlane.f32.xlu1 %v6574_v8 }
 0x7cd   : > { %3522 = vmax.xlane.f32.xlu1 %v6579_v3 }
 0x7d1   : > { %3520 = vmax.xlane.f32.xlu1 %v6584_v19 }
 0x7d5   : > { %3526 = vmax.xlane.f32.xlu1 %v6589_v25 }
 0x7d9   : > { %3524 = vmax.xlane.f32.xlu1 %v6594_v26 }
 0x7dd   : > { %3528 = vmax.xlane.f32.xlu1 %v6599_v50 }
 0x832   : > { %v3503_v31 = vpop.xlane.xlu1 %3502 }
 0x833   : > { %v3533_v32 = vsub.f32 %v6523_v4, %v3503_v31 }
 0x835   : > { %v3550_v34 = vmul.f32 1.442695, %v3533_v32 }
 0x836   : > { %v3501_v2 = vpop.xlane.xlu1 %3500 }
 0x837   : > { %5511 = vpow2.f32 %v3550_v34  ;;  %v3532_v45 = vsub.f32 %v6530_v37, %v3501_v2 }
 0x839   : > { %v3548_v52 = vmul.f32 1.442695, %v3532_v45 }
 0x83a   : > { %v3507_v36 = vpop.xlane.xlu1 %3506 }
 0x83b   : > { %5513 = vpow2.f32 %v3548_v52  ;;  %v3535_v56 = vsub.f32 %v6537_v33, %v3507_v36 }
 0x83d   : > { %v3554_v40 = vmul.f32 1.442695, %v3535_v56 }
 0x83e   : > { %v3505_v7 = vpop.xlane.xlu1 %3504 }
 0x83f   : > { %5515 = vpow2.f32 %v3554_v40  ;;  %v3534_v1 = vsub.f32 %v6544_v63, %v3505_v7 }
 0x841   : > { %v6606_v30 = vpop.eup %5511  ;;  %v3552_v35 = vmul.f32 1.442695, %v3534_v1 }
 0x842   : > { %v3511_v38 = vpop.xlane.xlu1 %3510  ;;  %3582 = vadd.xlane.f32.xlu1 %v6606_v30 }
 0x843   : > { %5517 = vpow2.f32 %v3552_v35  ;;  %v3537_v4 = vsub.f32 %v6551_v16, %v3511_v38 }
 0x845   : > { %v6610_v37 = vpop.eup %5513  ;;  %v3558_v42 = vmul.f32 1.442695, %v3537_v4 }
 0x846   : > { %v3509_v44 = vpop.xlane.xlu1 %3508  ;;  %3580 = vadd.xlane.f32.xlu1 %v6610_v37 }
 0x847   : > { %5519 = vpow2.f32 %v3558_v42  ;;  %v3536_v33 = vsub.f32 %v3488_v46, %v3509_v44 }
 0x849   : > { %v6613_v53 = vpop.eup %5515  ;;  %v3556_v54 = vmul.f32 1.442695, %v3536_v33 }
 0x84a   : > { %v3515_v58 = vpop.xlane.xlu1 %3514  ;;  %3586 = vadd.xlane.f32.xlu1 %v6613_v53 }
 0x84b   : > { %5521 = vpow2.f32 %v3556_v54  ;;  %v3539_v59 = vsub.f32 %v3491_v23, %v3515_v58 }
 0x84d   : > { %v6616_v63 = vpop.eup %5517  ;;  %v3562_v61 = vmul.f32 1.442695, %v3539_v59 }
 0x84e   : > { %v3513_v13 = vpop.xlane.xlu1 %3512  ;;  %3584 = vadd.xlane.f32.xlu1 %v6616_v63  ;;  %v3531_v29 = vpop.xlane.xlu0 %3530 }
 0x84f   : > { %5523 = vpow2.f32 %v3562_v61  ;;  %v3538_v60 = vsub.f32 %v3490_v39, %v3513_v13  ;;  %v3547_v6 = vsub.f32 %v6567_v43, %v3531_v29 }
 0x851   : > { %v6619_v62 = vpop.eup %5519  ;;  %v3560_v17 = vmul.f32 1.442695, %v3538_v60  ;;  %v3578_v28 = vmul.f32 1.442695, %v3547_v6 }
 0x852   : > { %v3519_v11 = vpop.xlane.xlu1 %3518  ;;  %3590 = vadd.xlane.f32.xlu1 %v6619_v62 }
 0x853   : > { %5525 = vpow2.f32 %v3560_v17  ;;  %v3541_v5 = vsub.f32 %v3493_v57, %v3519_v11 }
 0x855   : > { %v6622_v12 = vpop.eup %5521  ;;  %v3566_v16 = vmul.f32 1.442695, %v3541_v5 }
 0x856   : > { %v3517_v14 = vpop.xlane.xlu1 %3516  ;;  %3588 = vadd.xlane.f32.xlu1 %v6622_v12 }
 0x857   : > { %5527 = vpow2.f32 %v3566_v16  ;;  %v3540_v15 = vsub.f32 %v6574_v8, %v3517_v14 }
 0x859   : > { %v6626_v18 = vpop.eup %5523  ;;  %v3564_v20 = vmul.f32 1.442695, %v3540_v15 }
 0x85a   : > { %v3523_v21 = vpop.xlane.xlu1 %3522  ;;  %3594 = vadd.xlane.f32.xlu1 %v6626_v18 }
 0x85b   : > { %5529 = vpow2.f32 %v3564_v20  ;;  %v3543_v24 = vsub.f32 %v6579_v3, %v3523_v21 }
 0x85d   : > { %v6630_v27 = vpop.eup %5525  ;;  %v3570_v41 = vmul.f32 1.442695, %v3543_v24 }
 0x85e   : > { %v3521_v46 = vpop.xlane.xlu1 %3520  ;;  %3592 = vadd.xlane.f32.xlu1 %v6630_v27 }
 0x85f   : > { %5531 = vpow2.f32 %v3570_v41  ;;  %v3542_v51 = vsub.f32 %v6584_v19, %v3521_v46 }
 0x861   : > { %v6634_v55 = vpop.eup %5527  ;;  %v3568_v0 = vmul.f32 1.442695, %v3542_v51 }
 0x862   : > { %v3527_v10 = vpop.xlane.xlu1 %3526  ;;  %3598 = vadd.xlane.f32.xlu1 %v6634_v55 }
 0x863   : > { %5533 = vpow2.f32 %v3568_v0  ;;  %v3545_v47 = vsub.f32 %v6589_v25, %v3527_v10 }
 0x865   : > { %v6639_v22 = vpop.eup %5529  ;;  %v3574_v23 = vmul.f32 1.442695, %v3545_v47 }
 0x866   : > { %v3525_v48 = vpop.xlane.xlu1 %3524  ;;  %3596 = vadd.xlane.f32.xlu1 %v6639_v22 }
 0x867   : > { %5535 = vpow2.f32 %v3574_v23  ;;  %v3544_v49 = vsub.f32 %v6594_v26, %v3525_v48 }
 0x868   : > { %5537 = vpow2.f32 %v3578_v28 }
 0x869   : > { %v6643_v9 = vpop.eup %5531  ;;  %v3572_v39 = vmul.f32 1.442695, %v3544_v49 }
 0x86a   : > { %3602 = vadd.xlane.f32.xlu0 %v6643_v9  ;;  %v3529_v43 = vpop.xlane.xlu1 %3528 }
 0x86b   : > { %5539 = vpow2.f32 %v3572_v39  ;;  %v3546_v57 = vsub.f32 %v6599_v50, %v3529_v43 }
 0x86d   : > { %v6647_v8 = vpop.eup %5533  ;;  %v3576_v3 = vmul.f32 1.442695, %v3546_v57 }
 0x86e   : > { %3600 = vadd.xlane.f32.xlu1 %v6647_v8 }
 0x86f   : > { %5541 = vpow2.f32 %v3576_v3 }
 0x871   : > { %v6650_v19 = vpop.eup %5535 }
 0x872   : > { %3606 = vadd.xlane.f32.xlu0 %v6650_v19  ;;  %v6653_v25 = vpop.eup %5537 }
 0x875   : > { %v6655_v26 = vpop.eup %5539 }
 0x876   : > { %3610 = vadd.xlane.f32.xlu0 %v6653_v25  ;;  %3604 = vadd.xlane.f32.xlu1 %v6655_v26 }
 0x879   : > { %v6659_v31 = vpop.eup %5541 }
 0x87a   : > { %3608 = vadd.xlane.f32.xlu1 %v6659_v31 }
 0x8cf   : > { %v3583_v50 = vpop.xlane.xlu1 %3582 }
 0x8d0   : > { %5543 = vrcp.f32 %v3583_v50 }
 0x8d3   : > { %v3581_v32 = vpop.xlane.xlu1 %3580 }
 0x8d4   : > { %5545 = vrcp.f32 %v3581_v32 }
 0x8d7   : > { %v3587_v34 = vpop.xlane.xlu1 %3586 }
 0x8d8   : > { %5547 = vrcp.f32 %v3587_v34 }
 0x8da   : > { %v5544_v45 = vpop.eup %5543 }
 0x8db   : > { %v3585_v2 = vpop.xlane.xlu1 %3584  ;;  %v3629_v40 = vmul.f32 %v5544_v45, %v6606_v30 }
 0x8dc   : > { %5549 = vrcp.f32 %v3585_v2 }
 0x8de   : > { %v5546_v52 = vpop.eup %5545 }
 0x8df   : > { %v3591_v36 = vpop.xlane.xlu1 %3590  ;;  %v3628_v56 = vmul.f32 %v5546_v52, %v6610_v37 }
 0x8e0   : > { %5551 = vrcp.f32 %v3591_v36 }
 0x8e1   : > { %v3644_v7 = vpack.c.bf16 %v3629_v40, %v3628_v56 }
 0x8e2   : > { %v5548_v35 = vpop.eup %5547 }
 0x8e3   : > { %4953 = vmatprep.mubr.bf16.mxu1 %v3644_v7  ;;  %v3589_v1 = vpop.xlane.xlu1 %3588  ;;  %v3631_v4 = vmul.f32 %v5548_v35, %v6613_v53 }
 0x8e4   : > { %5553 = vrcp.f32 %v3589_v1 }
 0x8e6   : > { %v5550_v38 = vpop.eup %5549 }
 0x8e7   : > { %v3630_v42 = vmul.f32 %v5550_v38, %v6616_v63  ;;  %v3595_v44 = vpop.xlane.xlu1 %3594 }
 0x8e8   : > { %5555 = vrcp.f32 %v3595_v44 }
 0x8e9   : > { %v3645_v33 = vpack.c.bf16 %v3631_v4, %v3630_v42 }
 0x8ea   : > { %v5552_v58 = vpop.eup %5551 }
 0x8eb   : > { %4954 = vmatmul.mubr.bf16.vlgmr.msra.gmra.mrb[128].mxu1 %v3645_v33  ;;  %v3593_v54 = vpop.xlane.xlu1 %3592  ;;  %v3633_v61 = vmul.f32 %v5552_v58, %v6619_v62 }
 0x8ec   : > { %5557 = vrcp.f32 %v3593_v54 }
 0x8ee   : > { %v5554_v37 = vpop.eup %5553 }
 0x8ef   : > { %v3599_v30 = vpop.xlane.xlu1 %3598  ;;  %v3632_v59 = vmul.f32 %v5554_v37, %v6622_v12 }
 0x8f0   : > { %5559 = vrcp.f32 %v3599_v30 }
 0x8f1   : > { %v3646_v13 = vpack.c.bf16 %v3633_v61, %v3632_v59 }
 0x8f2   : > { %v5556_v53 = vpop.eup %5555 }
 0x8f3   : > { %4957 = vmatprep.mubr.bf16.mxu1 %v3646_v13  ;;  %v3597_v60 = vpop.xlane.xlu1 %3596  ;;  %v3635_v5 = vmul.f32 %v5556_v53, %v6626_v18 }
 0x8f4   : > { %5561 = vrcp.f32 %v3597_v60 }
 0x8f6   : > { %v5558_v63 = vpop.eup %5557 }
 0x8f7   : > { %v3603_v17 = vpop.xlane.xlu0 %3602  ;;  %v3634_v11 = vmul.f32 %v5558_v63, %v6630_v27 }
 0x8f8   : > { %5563 = vrcp.f32 %v3603_v17 }
 0x8f9   : > { %v3647_v16 = vpack.c.bf16 %v3635_v5, %v3634_v11 }
 0x8fa   : > { %v5560_v15 = vpop.eup %5559 }
 0x8fb   : > { %4958 = vmatmul.mubr.bf16.gmra.mrb[132].mxu1 %v3647_v16  ;;  %v3601_v14 = vpop.xlane.xlu1 %3600  ;;  %v3637_v21 = vmul.f32 %v5560_v15, %v6634_v55 }
 0x8fc   : > { %5565 = vrcp.f32 %v3601_v14 }
 0x8fe   : > { %v5562_v12 = vpop.eup %5561 }
 0x8ff   : > { %v3607_v62 = vpop.xlane.xlu0 %3606  ;;  %v3636_v20 = vmul.f32 %v5562_v12, %v6639_v22 }
 0x900   : > { %5567 = vrcp.f32 %v3607_v62 }
 0x901   : > { %v3648_v24 = vpack.c.bf16 %v3637_v21, %v3636_v20 }
 0x902   : > { %v5564_v27 = vpop.eup %5563 }
 0x903   : > { %v3611_v41 = vpop.xlane.xlu0 %3610  ;;  %4961 = vmatprep.mubr.bf16.mxu1 %v3648_v24  ;;  %v3605_v46 = vpop.xlane.xlu1 %3604  ;;  %v3639_v0 = vmul.f32 %v5564_v27, %v6643_v9 }
 0x904   : > { %5569 = vrcp.f32 %v3605_v46 }
 0x905   : > { %5571 = vrcp.f32 %v3611_v41 }
 0x906   : > { %v5566_v18 = vpop.eup %5565 }
 0x907   : > { %v3609_v29 = vpop.xlane.xlu1 %3608  ;;  %v3638_v51 = vmul.f32 %v5566_v18, %v6647_v8 }
 0x908   : > { %5573 = vrcp.f32 %v3609_v29 }
 0x909   : > { %v3649_v6 = vpack.c.bf16 %v3639_v0, %v3638_v51 }
 0x90a   : > { %v5568_v10 = vpop.eup %5567 }
 0x90b   : > { %4962 = vmatmul.mubr.bf16.gmra.mrb[136].mxu1 %v3649_v6  ;;  %v3641_v23 = vmul.f32 %v5568_v10, %v6650_v19 }
 0x90e   : > { %v5570_v47 = vpop.eup %5569 }
 0x90f   : > { %v5572_v55 = vpop.eup %5571  ;;  %v3640_v22 = vmul.f32 %v5570_v47, %v6655_v26 }
 0x910   : > { %v3643_v39 = vmul.f32 %v5572_v55, %v6653_v25 }
 0x911   : > { %v3650_v48 = vpack.c.bf16 %v3641_v23, %v3640_v22 }
 0x912   : > { %v5574_v28 = vpop.eup %5573 }
 0x913   : > { %v3642_v49 = vmul.f32 %v5574_v28, %v6659_v31  ;;  %4965 = vmatprep.mubr.bf16.mxu1 %v3650_v48 }
 0x915   : > { %v3651_v43 = vpack.c.bf16 %v3643_v39, %v3642_v49 }
 0x917   : > { %4966 = vmatmul.mubr.bf16.gmra.mrb[140].mxu1 %v3651_v43 }
 0x9be   : > { %v4955_v9 = vpop.f32.mrb[128].mxu1 }
 0x9bf   : > { %v3771_v57 = vsel %vm2962_vm1, %v4955_v9, 0.0  ;;  %v3694_v8 = vpop.f32.mrb[129].mxu1 }
 0x9c0   : > { %v3757_v3 = vsel %vm2962_vm1, %v3694_v8, 0.0  ;;  %v4956_v50 = vpop.f32.mrb[130].mxu1  ;;  %v3772_v32 = vrot.slane %v3771_v57, 4 }
 0x9c1   : > { %v3758_v26 = vrot.slane %v3757_v3, 4  ;;  %v3778_v19 = vsel %vm2962_vm1, %v4956_v50, 0.0  ;;  %v3697_v34 = vpop.f32.mrb[131].mxu1 }
 0x9c2   : > { %v3764_v2 = vsel %vm2962_vm1, %v3697_v34, 0.0  ;;  %v3779_v25 = vrot.slane %v3778_v19, 4  ;;  %v3773_v52 = vadd.f32 %v3772_v32, %v3771_v57 }
 0x9c3   : > { %v3759_v31 = vadd.f32 %v3758_v26, %v3757_v3  ;;  %v3765_v45 = vrot.slane %v3764_v2, 4 }
 0x9c4   : > { %v3780_v7 = vadd.f32 %v3779_v25, %v3778_v19  ;;  %v3774_v1 = vrot.slane %v3773_v52, 2 }
 0x9c5   : > { %v3766_v36 = vadd.f32 %v3765_v45, %v3764_v2  ;;  %v3760_v56 = vrot.slane %v3759_v31, 2 }
 0x9c6   : > { %v3781_v4 = vrot.slane %v3780_v7, 2  ;;  %v3775_v44 = vadd.f32 %v3774_v1, %v3773_v52 }
 0x9c7   : > { %v3767_v40 = vrot.slane %v3766_v36, 2  ;;  %v3761_v38 = vadd.f32 %v3760_v56, %v3759_v31 }
 0x9c8   : > { %v3782_v30 = vadd.f32 %v3781_v4, %v3780_v7  ;;  %v3776_v53 = vrot.slane %v3775_v44, 1 }
 0x9c9   : > { %v3768_v35 = vadd.f32 %v3767_v40, %v3766_v36  ;;  %v3762_v33 = vrot.slane %v3761_v38, 1 }
 0x9ca   : > { %v3783_v20 = vrot.slane %v3782_v30, 1  ;;  %v3777_v46 = vadd.f32 %v3776_v53, %v3775_v44 }
 0x9cb   : > { %v3769_v42 = vrot.slane %v3768_v35, 1  ;;  %v3763_v5 = vadd.f32 %v3762_v33, %v3761_v38 }
 0x9cc   : > { %v3784_v47 = vadd.f32 %v3783_v20, %v3782_v30  ;;  %v6693_v28 = vmul.f32 0.125, %v3777_v46 }
 0x9cd   : > { %v3770_v59 = vadd.f32 %v3769_v42, %v3768_v35  ;;  %v6688_v29 = vmul.f32 0.125, %v3763_v5 }
 0x9ce   : > { %v4959_v54 = vpop.f32.mrb[132].mxu1  ;;  %v6697_v8 = vmul.f32 0.125, %v3784_v47 }
 0x9cf   : > { %v3799_v58 = vsel %vm2962_vm1, %v4959_v54, 0.0  ;;  %v3710_v37 = vpop.f32.mrb[133].mxu1  ;;  %v6686_v21 = vmul.f32 0.125, %v3770_v59 }
 0x9d0   : > { %v3800_v61 = vrot.slane %v3799_v58, 4  ;;  %v3785_v13 = vsel %vm2962_vm1, %v3710_v37, 0.0  ;;  %v4960_v60 = vpop.f32.mrb[134].mxu1 }
 0x9d1   : > { %v3786_v63 = vrot.slane %v3785_v13, 4  ;;  %v3806_v17 = vsel %vm2962_vm1, %v4960_v60, 0.0  ;;  %v3713_v11 = vpop.f32.mrb[135].mxu1  ;;  %v3903_v55 = vsel %vm3902_vm5, %v6686_v21, %v6688_v29 }
 0x9d2   : > { %v3801_v16 = vadd.f32 %v3800_v61, %v3799_v58  ;;  %v3807_v14 = vrot.slane %v3806_v17, 4  ;;  %v3792_v15 = vsel %vm2962_vm1, %v3713_v11, 0.0  ;;  %v3905_v57 = vsel %vm3904_vm6, %v6693_v28, %v3903_v55 }
 0x9d3   : > { %v3787_v12 = vadd.f32 %v3786_v63, %v3785_v13  ;;  %v3793_v62 = vrot.slane %v3792_v15, 4  ;;  %v3907_v34 = vsel %vm3906_vm7, %v6697_v8, %v3905_v57 }
 0x9d4   : > { %v3802_v24 = vrot.slane %v3801_v16, 2  ;;  %v3808_v41 = vadd.f32 %v3807_v14, %v3806_v17 }
 0x9d5   : > { %v3788_v27 = vrot.slane %v3787_v12, 2  ;;  %v3794_v18 = vadd.f32 %v3793_v62, %v3792_v15 }
 0x9d6   : > { %v3803_v51 = vadd.f32 %v3802_v24, %v3801_v16  ;;  %v3809_v0 = vrot.slane %v3808_v41, 2 }
 0x9d7   : > { %v3789_v6 = vadd.f32 %v3788_v27, %v3787_v12  ;;  %v3795_v10 = vrot.slane %v3794_v18, 2 }
 0x9d8   : > { %v3804_v22 = vrot.slane %v3803_v51, 1  ;;  %v3810_v23 = vadd.f32 %v3809_v0, %v3808_v41 }
 0x9d9   : > { %v3790_v48 = vrot.slane %v3789_v6, 1  ;;  %v3796_v49 = vadd.f32 %v3795_v10, %v3794_v18 }
 0x9da   : > { %v3811_v39 = vrot.slane %v3810_v23, 1  ;;  %v3805_v3 = vadd.f32 %v3804_v22, %v3803_v51 }
 0x9db   : > { %v3791_v43 = vadd.f32 %v3790_v48, %v3789_v6  ;;  %v3797_v9 = vrot.slane %v3796_v49, 1 }
 0x9dc   : > { %v3812_v32 = vadd.f32 %v3811_v39, %v3810_v23  ;;  %v6708_v52 = vmul.f32 0.125, %v3805_v3 }
 0x9dd   : > { %v6699_v50 = vmul.f32 0.125, %v3791_v43  ;;  %v3798_v26 = vadd.f32 %v3797_v9, %v3796_v49 }
 0x9de   : > { %v4963_v19 = vpop.f32.mrb[136].mxu1  ;;  %v6712_v38 = vmul.f32 0.125, %v3812_v32 }
 0x9df   : > { %v6703_v2 = vmul.f32 0.125, %v3798_v26  ;;  %v3827_v31 = vsel %vm2962_vm1, %v4963_v19, 0.0  ;;  %v3726_v45 = vpop.f32.mrb[137].mxu1  ;;  %v3909_v25 = vsel %vm3908_vm8, %v6699_v50, %v3907_v34 }
 0x9e0   : > { %v3828_v36 = vrot.slane %v3827_v31, 4  ;;  %v3813_v56 = vsel %vm2962_vm1, %v3726_v45, 0.0  ;;  %v4964_v40 = vpop.f32.mrb[138].mxu1 }
 0x9e1   : > { %v3814_v7 = vrot.slane %v3813_v56, 4  ;;  %v3834_v1 = vsel %vm2962_vm1, %v4964_v40, 0.0  ;;  %v3729_v35 = vpop.f32.mrb[139].mxu1  ;;  %v3911_v4 = vsel %vm3910_vm9, %v6703_v2, %v3909_v25 }
 0x9e2   : > { %v3829_v42 = vadd.f32 %v3828_v36, %v3827_v31  ;;  %v3835_v44 = vrot.slane %v3834_v1, 4  ;;  %v3820_v33 = vsel %vm2962_vm1, %v3729_v35, 0.0  ;;  %v3913_v54 = vsel %vm3912_vm10, %v6708_v52, %v3911_v4 }
 0x9e3   : > { %v3815_v58 = vadd.f32 %v3814_v7, %v3813_v56  ;;  %v3821_v37 = vrot.slane %v3820_v33, 4  ;;  %v3915_v30 = vsel %vm3914_vm11, %v6712_v38, %v3913_v54 }
 0x9e4   : > { %v3836_v59 = vadd.f32 %v3835_v44, %v3834_v1  ;;  %v3925_v61 = vsel %vm2962_vm1, %v3915_v30, 0.0  ;;  %v3830_v13 = vrot.slane %v3829_v42, 2 }
 0x9e5   : > { %v3816_v60 = vrot.slane %v3815_v58, 2  ;;  %v3822_v53 = vadd.f32 %v3821_v37, %v3820_v33  ;;  %3926 = vadd.xlane.f32.xlu1 %v3925_v61 }
 0x9e6   : > { %v3837_v11 = vrot.slane %v3836_v59, 2  ;;  %v3831_v5 = vadd.f32 %v3830_v13, %v3829_v42 }
 0x9e7   : > { %v3817_v63 = vadd.f32 %v3816_v60, %v3815_v58  ;;  %v3823_v17 = vrot.slane %v3822_v53, 2 }
 0x9e8   : > { %v3838_v24 = vadd.f32 %v3837_v11, %v3836_v59  ;;  %v3832_v18 = vrot.slane %v3831_v5, 1 }
 0x9e9   : > { %v3824_v16 = vadd.f32 %v3823_v17, %v3822_v53  ;;  %v3818_v14 = vrot.slane %v3817_v63, 1 }
 0x9ea   : > { %v4967_v15 = vpop.f32.mrb[140].mxu1  ;;  %v3839_v39 = vrot.slane %v3838_v24, 1  ;;  %v3833_v3 = vadd.f32 %v3832_v18, %v3831_v5 }
 0x9eb   : > { %v3825_v12 = vrot.slane %v3824_v16, 1  ;;  %v3855_v62 = vsel %vm2962_vm1, %v4967_v15, 0.0  ;;  %v3742_v20 = vpop.f32.mrb[141].mxu1  ;;  %v3819_v47 = vadd.f32 %v3818_v14, %v3817_v63 }
 0x9ec   : > { %v3856_v41 = vrot.slane %v3855_v62, 4  ;;  %v3841_v46 = vsel %vm2962_vm1, %v3742_v20, 0.0  ;;  %v4968_v27 = vpop.f32.mrb[142].mxu1  ;;  %v3840_v36 = vadd.f32 %v3839_v39, %v3838_v24  ;;  %v6733_v1 = vmul.f32 0.125, %v3833_v3 }
 0x9ed   : > { %v3826_v51 = vadd.f32 %v3825_v12, %v3824_v16  ;;  %v3842_v0 = vrot.slane %v3841_v46, 4  ;;  %v3862_v6 = vsel %vm2962_vm1, %v4968_v27, 0.0  ;;  %v3745_v10 = vpop.f32.mrb[143].mxu1  ;;  %v6728_v19 = vmul.f32 0.125, %v3819_v47 }
 0x9ee   : > { %v3857_v55 = vadd.f32 %v3856_v41, %v3855_v62  ;;  %v3863_v22 = vrot.slane %v3862_v6, 4  ;;  %v3848_v23 = vsel %vm2962_vm1, %v3745_v10, 0.0  ;;  %v6737_v58 = vmul.f32 0.125, %v3840_v36 }
 0x9ef   : > { %v3843_v48 = vadd.f32 %v3842_v0, %v3841_v46  ;;  %v3849_v49 = vrot.slane %v3848_v23, 4  ;;  %v6726_v43 = vmul.f32 0.125, %v3826_v51 }
 0x9f0   : > { %v3858_v9 = vrot.slane %v3857_v55, 2  ;;  %v3864_v57 = vadd.f32 %v3863_v22, %v3862_v6 }
 0x9f1   : > { %v3844_v32 = vrot.slane %v3843_v48, 2  ;;  %v3850_v26 = vadd.f32 %v3849_v49, %v3848_v23  ;;  %v3916_v56 = vsel %vm3902_vm5, %v6726_v43, %v6728_v19 }
 0x9f2   : > { %v3859_v34 = vadd.f32 %v3858_v9, %v3857_v55  ;;  %v3865_v31 = vrot.slane %v3864_v57, 2  ;;  %v3917_v54 = vsel %vm3904_vm6, %v6733_v1, %v3916_v56 }
 0x9f3   : > { %v3845_v45 = vadd.f32 %v3844_v32, %v3843_v48  ;;  %v3851_v25 = vrot.slane %v3850_v26, 2  ;;  %v3918_v13 = vsel %vm3906_vm7, %v6737_v58, %v3917_v54 }
 0x9f4   : > { %v3860_v40 = vrot.slane %v3859_v34, 1  ;;  %v3866_v7 = vadd.f32 %v3865_v31, %v3864_v57 }
 0x9f5   : > { %v3846_v35 = vrot.slane %v3845_v45, 1  ;;  %v3852_v4 = vadd.f32 %v3851_v25, %v3850_v26 }
 0x9f6   : > { %v3867_v42 = vrot.slane %v3866_v7, 1  ;;  %v3861_v37 = vadd.f32 %v3860_v40, %v3859_v34 }
 0x9f7   : > { %v3847_v44 = vadd.f32 %v3846_v35, %v3845_v45  ;;  %v3853_v33 = vrot.slane %v3852_v4, 1 }
 0x9f8   : > { %v3868_v59 = vadd.f32 %v3867_v42, %v3866_v7  ;;  %v6747_v63 = vmul.f32 0.125, %v3861_v37 }
 0x9f9   : > { %v6739_v30 = vmul.f32 0.125, %v3847_v44  ;;  %v3854_v61 = vadd.f32 %v3853_v33, %v3852_v4 }
 0x9fa   : > { %v6749_v17 = vmul.f32 0.125, %v3868_v59 }
 0x9fb   : > { %v6743_v60 = vmul.f32 0.125, %v3854_v61  ;;  %v3919_v53 = vsel %vm3908_vm8, %v6739_v30, %v3918_v13 }
 0x9fd   : > { %v3920_v11 = vsel %vm3910_vm9, %v6743_v60, %v3919_v53 }
 0x9fe   : > { %v3921_v5 = vsel %vm3912_vm10, %v6747_v63, %v3920_v11 }
 0x9ff   : > { %v3922_v16 = vsel %vm3914_vm11, %v6749_v17, %v3921_v5 }
 0xa00   : > { %v3928_v14 = vsel %vm2962_vm1, %v3922_v16, 0.0 }
 0xa01   : > { %3929 = vadd.xlane.f32.xlu0 %v3928_v14 }
 0xa72   : > { %v3927_v15 = vpop.xlane.xlu1 %3926 }
 0xa73   : > { %v3932_v12 = vmul.f32 0.015625, %v3927_v15 }
 0xa75   : > { %v3936_v62 = vrot.slane %v3932_v12, 1  ;;  %v3937_v20 = vrot.slane %v3932_v12, 2  ;;  %v3938_v24 = vrot.slane %v3932_v12, 3  ;;  %v3939_v41 = vrot.slane %v3932_v12, 4 }
 0xa76   : > { %v3940_v46 = vrot.slane %v3932_v12, 5  ;;  %v3941_v27 = vrot.slane %v3932_v12, 6  ;;  %v3942_v18 = vrot.slane %v3932_v12, 7  ;;  %v6759_v51 = vsub.f32 %v6688_v29, %v3932_v12  ;;  %v4150_v12 = vld [vmem:[%s6989_s29] sm:$0xff] }
 0xa77   : > { %v6762_v0 = vsub.f32 %v6686_v21, %v3936_v62  ;;  %v6765_v6 = vsub.f32 %v6693_v28, %v3937_v20  ;;  %v6768_v10 = vsub.f32 %v6697_v8, %v3938_v24  ;;  %v6771_v47 = vsub.f32 %v6699_v50, %v3939_v41  ;;  %v4151_v62 = vld [vmem:[%s6989_s29 + $0x8] sm:$0xff]  ;;  %v4152_v41 = vld [vmem:[%s6989_s29 + $0x10] sm:$0xff] }
 0xa78   : > { %v6774_v55 = vsub.f32 %v6703_v2, %v3940_v46  ;;  %v6777_v22 = vsub.f32 %v6708_v52, %v3941_v27  ;;  %v6780_v29 = vsub.f32 %v6712_v38, %v3942_v18  ;;  %v3982_v2 = vmul.f32 %v6759_v51, %v6759_v51  ;;  %v4153_v46 = vld [vmem:[%s6989_s29 + $0x18] sm:$0xff] }
 0xa79   : > { %v3983_v21 = vmul.f32 %v6762_v0, %v6762_v0  ;;  %v3984_v28 = vmul.f32 %v6765_v6, %v6765_v6  ;;  %v3985_v8 = vmul.f32 %v6768_v10, %v6768_v10  ;;  %v3986_v50 = vmul.f32 %v6771_v47, %v6771_v47 }
 0xa7a   : > { %v3987_v52 = vmul.f32 %v6774_v55, %v6774_v55  ;;  %v3988_v48 = vmul.f32 %v6777_v22, %v6777_v22  ;;  %v3989_v49 = vmul.f32 %v6780_v29, %v6780_v29  ;;  %v5052_v24 = vpack.c.bf16 %v4151_v62, %v4150_v12 }
 0xa7b   : > { %v4014_v38 = vrot.slane %v3983_v21, 7  ;;  %v4016_v23 = vrot.slane %v3984_v28, 6  ;;  %v4018_v9 = vrot.slane %v3985_v8, 5  ;;  %v4020_v3 = vrot.slane %v3986_v50, 4 }
 0xa7c   : > { %v4022_v26 = vrot.slane %v3987_v52, 3  ;;  %v4024_v31 = vrot.slane %v3988_v48, 2  ;;  %v4026_v25 = vrot.slane %v3989_v49, 1  ;;  %v5056_v28 = vpack.c.bf16 %v4153_v46, %v4152_v41  ;;  %5053 = vmatprep.subr.bf16.mxu0 %v5052_v24 }
 0xa7d   : > { %v4015_v39 = vsel %vm3902_vm5, %v4014_v38, %v3982_v2  ;;  %5055 = vmatpush3.bf16.msra.mxu0 %v5052_v24 }
 0xa7e   : > { %v4017_v57 = vsel %vm3904_vm6, %v4016_v23, %v4015_v39  ;;  %5057 = vmatprep.subr.bf16.mxu0 %v5056_v28 }
 0xa7f   : > { %v4019_v32 = vsel %vm3906_vm7, %v4018_v9, %v4017_v57 }
 0xa80   : > { %v4021_v34 = vsel %vm3908_vm8, %v4020_v3, %v4019_v32  ;;  %v4154_v3 = vld [vmem:[%s6989_s29 + $0x20] sm:$0xff]  ;;  %v4155_v32 = vld [vmem:[%s6989_s29 + $0x28] sm:$0xff] }
 0xa81   : > { %v4023_v45 = vsel %vm3910_vm9, %v4022_v26, %v4021_v34  ;;  %5059 = vmatpush3.bf16.msra.mxu0 %v5056_v28  ;;  %v4156_v26 = vld [vmem:[%s6989_s29 + $0x30] sm:$0xff]  ;;  %v5060_v34 = vpack.c.bf16 %v4155_v32, %v4154_v3 }
 0xa82   : > { %v4025_v36 = vsel %vm3912_vm10, %v4024_v31, %v4023_v45  ;;  %v4157_v31 = vld [vmem:[%s6989_s29 + $0x38] sm:$0xff] }
 0xa83   : > { %v4027_v56 = vsel %vm3914_vm11, %v4026_v25, %v4025_v36  ;;  %v5064_v45 = vpack.c.bf16 %v4157_v31, %v4156_v26  ;;  %5061 = vmatprep.subr.bf16.mxu0 %v5060_v34 }
 0xa84   : > { %v4044_v40 = vsel %vm2962_vm1, %v4027_v56, 0.0 }
 0xa85   : > { %4045 = vadd.xlane.f32.xlu1 %v4044_v40  ;;  %5063 = vmatpush3.bf16.msra.mxu0 %v5060_v34 }
 0xa86   : > { %5065 = vmatprep.subr.bf16.mxu0 %v5064_v45 }
 0xa89   : > { %5067 = vmatpush3.bf16.msra.mxu0 %v5064_v45 }
 0xa8e   : > { %v3930_v7 = vpop.xlane.xlu0 %3929 }
 0xa8f   : > { %v3933_v35 = vmul.f32 0.015625, %v3930_v7 }
 0xa91   : > { %v3943_v4 = vrot.slane %v3933_v35, 1  ;;  %v3944_v42 = vrot.slane %v3933_v35, 2  ;;  %v3945_v44 = vrot.slane %v3933_v35, 3  ;;  %v3946_v33 = vrot.slane %v3933_v35, 4 }
 0xa92   : > { %v3947_v54 = vrot.slane %v3933_v35, 5  ;;  %v3948_v37 = vrot.slane %v3933_v35, 6  ;;  %v3949_v59 = vrot.slane %v3933_v35, 7  ;;  %v6807_v61 = vsub.f32 %v6728_v19, %v3933_v35 }
 0xa93   : > { %v6810_v13 = vsub.f32 %v6726_v43, %v3943_v4  ;;  %v6813_v53 = vsub.f32 %v6733_v1, %v3944_v42  ;;  %v6816_v11 = vsub.f32 %v6737_v58, %v3945_v44  ;;  %v6819_v5 = vsub.f32 %v6739_v30, %v3946_v33  ;;  %v6881_v44 = vld [vmem:[%s6990_s30] ss:$0 sm:$0xff] }
 0xa94   : > { %v6822_v16 = vsub.f32 %v6743_v60, %v3947_v54  ;;  %v6825_v14 = vsub.f32 %v6747_v63, %v3948_v37  ;;  %v6828_v19 = vsub.f32 %v6749_v17, %v3949_v59  ;;  %v3990_v60 = vmul.f32 %v6807_v61, %v6807_v61 }
 0xa95   : > { %v3991_v43 = vmul.f32 %v6810_v13, %v6810_v13  ;;  %v3992_v1 = vmul.f32 %v6813_v53, %v6813_v53  ;;  %v3993_v58 = vmul.f32 %v6816_v11, %v6816_v11  ;;  %v3994_v30 = vmul.f32 %v6819_v5, %v6819_v5 }
 0xa96   : > { %v3995_v63 = vmul.f32 %v6822_v16, %v6822_v16  ;;  %v3996_v20 = vmul.f32 %v6825_v14, %v6825_v14  ;;  %v3997_v27 = vmul.f32 %v6828_v19, %v6828_v19 }
 0xa97   : > { %v4028_v17 = vrot.slane %v3991_v43, 7  ;;  %v4030_v15 = vrot.slane %v3992_v1, 6  ;;  %v4032_v21 = vrot.slane %v3993_v58, 5  ;;  %v4034_v50 = vrot.slane %v3994_v30, 4 }
 0xa98   : > { %v4036_v52 = vrot.slane %v3995_v63, 3  ;;  %v4038_v23 = vrot.slane %v3996_v20, 2  ;;  %v4040_v49 = vrot.slane %v3997_v27, 1 }
 0xa99   : > { %v4029_v18 = vsel %vm3902_vm5, %v4028_v17, %v3990_v60 }
 0xa9a   : > { %v4031_v8 = vsel %vm3904_vm6, %v4030_v15, %v4029_v18 }
 0xa9b   : > { %v4033_v2 = vsel %vm3906_vm7, %v4032_v21, %v4031_v8 }
 0xa9c   : > { %v4035_v38 = vsel %vm3908_vm8, %v4034_v50, %v4033_v2 }
 0xa9d   : > { %v4037_v48 = vsel %vm3910_vm9, %v4036_v52, %v4035_v38 }
 0xa9e   : > { %v4039_v39 = vsel %vm3912_vm10, %v4038_v23, %v4037_v48 }
 0xa9f   : > { %v4041_v9 = vsel %vm3914_vm11, %v4040_v49, %v4039_v39 }
 0xaa0   : > { %v4047_v57 = vsel %vm2962_vm1, %v4041_v9, 0.0 }
 0xaa1   : > { %4048 = vadd.xlane.f32.xlu0 %v4047_v57 }
 0xb12   : > { %v4046_v25 = vpop.xlane.xlu1 %4045 }
 0xb13   : > { %v4050_v36 = vmul.f32 0.015625, %v4046_v25 }
 0xb15   : > { %v4052_v56 = vadd.f32 1e-05, %v4050_v36 }
 0xb17   : > { %5575 = vrsqrt.f32 %v4052_v56 }
 0xb21   : > { %v5576_v40 = vpop.eup %5575 }
 0xb22   : > { %v4058_v7 = vrot.slane %v5576_v40, 1  ;;  %v4059_v35 = vrot.slane %v5576_v40, 2  ;;  %v4060_v4 = vrot.slane %v5576_v40, 3  ;;  %v4061_v42 = vrot.slane %v5576_v40, 4 }
 0xb23   : > { %v4062_v33 = vrot.slane %v5576_v40, 5  ;;  %v4063_v54 = vrot.slane %v5576_v40, 6  ;;  %v4064_v37 = vrot.slane %v5576_v40, 7  ;;  %v4088_v59 = vmul.f32 %v5576_v40, %v6759_v51 }
 0xb24   : > { %v4089_v43 = vmul.f32 %v4058_v7, %v6762_v0  ;;  %v4090_v1 = vmul.f32 %v4059_v35, %v6765_v6  ;;  %v4091_v58 = vmul.f32 %v4060_v4, %v6768_v10  ;;  %v4092_v30 = vmul.f32 %v4061_v42, %v6771_v47 }
 0xb25   : > { %v4093_v60 = vmul.f32 %v4062_v33, %v6774_v55  ;;  %v4094_v63 = vmul.f32 %v4063_v54, %v6777_v22  ;;  %v4095_v17 = vmul.f32 %v4064_v37, %v6780_v29  ;;  %v4111_v15 = vmul.f32 %v6881_v44, %v4088_v59  ;;  %v4703_v55 = vld [vmem:[%s6991_s22] ss:$0 sm:$0xff] }
 0xb26   : > { %v4112_v12 = vmul.f32 %v6881_v44, %v4089_v43  ;;  %v4113_v51 = vmul.f32 %v6881_v44, %v4090_v1  ;;  %v4114_v0 = vmul.f32 %v6881_v44, %v4091_v58  ;;  %v4115_v6 = vmul.f32 %v6881_v44, %v4092_v30 }
 0xb27   : > { %v4116_v10 = vmul.f32 %v6881_v44, %v4093_v60  ;;  %v4117_v47 = vmul.f32 %v6881_v44, %v4094_v63  ;;  %v4118_v22 = vmul.f32 %v6881_v44, %v4095_v17  ;;  %v4134_v41 = vadd.f32 %v4703_v55, %v4111_v15 }
 0xb28   : > { %v4135_v29 = vadd.f32 %v4703_v55, %v4112_v12  ;;  %v4136_v62 = vadd.f32 %v4703_v55, %v4113_v51  ;;  %v4137_v20 = vadd.f32 %v4703_v55, %v4114_v0  ;;  %v4138_v24 = vadd.f32 %v4703_v55, %v4115_v6 }
 0xb29   : > { %v4139_v46 = vadd.f32 %v4703_v55, %v4116_v10  ;;  %v4140_v21 = vadd.f32 %v4703_v55, %v4117_v47  ;;  %v4141_v28 = vadd.f32 %v4703_v55, %v4118_v22 }
 0xb2a   : > { %v4181_v27 = vrot.slane %v4135_v29, 7  ;;  %v4183_v18 = vrot.slane %v4136_v62, 6  ;;  %v4185_v50 = vrot.slane %v4137_v20, 5  ;;  %v4187_v52 = vrot.slane %v4138_v24, 4 }
 0xb2b   : > { %v4189_v48 = vrot.slane %v4139_v46, 3  ;;  %v4191_v9 = vrot.slane %v4140_v21, 2  ;;  %v4193_v3 = vrot.slane %v4141_v28, 1 }
 0xb2c   : > { %v4182_v8 = vsel %vm3902_vm5, %v4181_v27, %v4134_v41 }
 0xb2d   : > { %v4184_v2 = vsel %vm3904_vm6, %v4183_v18, %v4182_v8  ;;  %v4704_v18 = vld [vmem:[#allocation2] ss:$0 sm:$0xff] }
 0xb2e   : > { %v4049_v38 = vpop.xlane.xlu0 %4048  ;;  %v4186_v23 = vsel %vm3906_vm7, %v4185_v50, %v4184_v2 }
 0xb2f   : > { %v4051_v49 = vmul.f32 0.015625, %v4049_v38  ;;  %v4188_v39 = vsel %vm3908_vm8, %v4187_v52, %v4186_v23 }
 0xb30   : > { %v4190_v57 = vsel %vm3910_vm9, %v4189_v48, %v4188_v39 }
 0xb31   : > { %v4053_v32 = vadd.f32 1e-05, %v4051_v49  ;;  %v4192_v26 = vsel %vm3912_vm10, %v4191_v9, %v4190_v57 }
 0xb32   : > { %v4194_v34 = vsel %vm3914_vm11, %v4193_v3, %v4192_v26 }
 0xb33   : > { %5577 = vrsqrt.f32 %v4053_v32  ;;  %4985 = vmatprep.mubr.msk.f32.mxu0 %vm2962_vm1, %v4194_v34 }
 0xb3d   : > { %v5578_v31 = vpop.eup %5577 }
 0xb3e   : > { %v4065_v45 = vrot.slane %v5578_v31, 1  ;;  %v4066_v25 = vrot.slane %v5578_v31, 2  ;;  %v4067_v36 = vrot.slane %v5578_v31, 3  ;;  %v4068_v56 = vrot.slane %v5578_v31, 4 }
 0xb3f   : > { %v4069_v40 = vrot.slane %v5578_v31, 5  ;;  %v4070_v7 = vrot.slane %v5578_v31, 6  ;;  %v4071_v35 = vrot.slane %v5578_v31, 7  ;;  %v4096_v4 = vmul.f32 %v5578_v31, %v6807_v61 }
 0xb40   : > { %v4097_v42 = vmul.f32 %v4065_v45, %v6810_v13  ;;  %v4098_v33 = vmul.f32 %v4066_v25, %v6813_v53  ;;  %v4099_v54 = vmul.f32 %v4067_v36, %v6816_v11  ;;  %v4100_v37 = vmul.f32 %v4068_v56, %v6819_v5 }
 0xb41   : > { %v4101_v59 = vmul.f32 %v4069_v40, %v6822_v16  ;;  %v4102_v43 = vmul.f32 %v4070_v7, %v6825_v14  ;;  %v4103_v1 = vmul.f32 %v4071_v35, %v6828_v19  ;;  %v4119_v58 = vmul.f32 %v6881_v44, %v4096_v4 }
 0xb42   : > { %v4120_v30 = vmul.f32 %v6881_v44, %v4097_v42  ;;  %v4121_v61 = vmul.f32 %v6881_v44, %v4098_v33  ;;  %v4122_v13 = vmul.f32 %v6881_v44, %v4099_v54  ;;  %v4123_v53 = vmul.f32 %v6881_v44, %v4100_v37 }
 0xb43   : > { %v4124_v11 = vmul.f32 %v6881_v44, %v4101_v59  ;;  %v4125_v5 = vmul.f32 %v6881_v44, %v4102_v43  ;;  %v4126_v16 = vmul.f32 %v6881_v44, %v4103_v1  ;;  %v4142_v17 = vadd.f32 %v4703_v55, %v4119_v58 }
 0xb44   : > { %v4143_v60 = vadd.f32 %v4703_v55, %v4120_v30  ;;  %v4144_v14 = vadd.f32 %v4703_v55, %v4121_v61  ;;  %v4145_v63 = vadd.f32 %v4703_v55, %v4122_v13  ;;  %v4146_v19 = vadd.f32 %v4703_v55, %v4123_v53 }
 0xb45   : > { %v4147_v15 = vadd.f32 %v4703_v55, %v4124_v11  ;;  %v4148_v0 = vadd.f32 %v4703_v55, %v4125_v5  ;;  %v4149_v6 = vadd.f32 %v4703_v55, %v4126_v16 }
 0xb46   : > { %v4195_v12 = vrot.slane %v4143_v60, 7  ;;  %v4197_v51 = vrot.slane %v4144_v14, 6  ;;  %v4199_v47 = vrot.slane %v4145_v63, 5  ;;  %v4201_v29 = vrot.slane %v4146_v19, 4 }
 0xb47   : > { %v4203_v20 = vrot.slane %v4147_v15, 3  ;;  %v4205_v24 = vrot.slane %v4148_v0, 2  ;;  %v4207_v46 = vrot.slane %v4149_v6, 1 }
 0xb48   : > { %v4196_v10 = vsel %vm3902_vm5, %v4195_v12, %v4142_v17 }
 0xb49   : > { %v4198_v22 = vsel %vm3904_vm6, %v4197_v51, %v4196_v10 }
 0xb4a   : > { %v4200_v62 = vsel %vm3906_vm7, %v4199_v47, %v4198_v22 }
 0xb4b   : > { %v4202_v44 = vsel %vm3908_vm8, %v4201_v29, %v4200_v62 }
 0xb4c   : > { %v4204_v41 = vsel %vm3910_vm9, %v4203_v20, %v4202_v44 }
 0xb4d   : > { %v4206_v27 = vsel %vm3912_vm10, %v4205_v24, %v4204_v41 }
 0xb4e   : > { %v4208_v55 = vsel %vm3914_vm11, %v4207_v46, %v4206_v27 }
 0xb4f   : > { %4986 = vmatmul.mubr.msk.f32.vlgmr.msra.gmra.mrb[32].mxu0 %vm2962_vm1, %v4208_v55 }
 0xc22   : > { %v4987_v21 = vpop.f32.mrb[32].mxu0 }
 0xc23   : > { %v4285_v28 = vadd.f32 %v4987_v21, %v4704_v18  ;;  %v4279_v8 = vpop.f32.mrb[33].mxu0 }
 0xc24   : > { %v4280_v50 = vadd.f32 %v4704_v18, %v4279_v8 }
 0xc25   : > { %v4289_v2 = vsub.f32 0.0, %v4285_v28 }
 0xc26   : > { %v4288_v52 = vsub.f32 0.0, %v4280_v50 }
 0xc27   : > { %v4292_v38 = vmul.f32 1.442695, %v4289_v2 }
 0xc28   : > { %v4290_v23 = vmul.f32 1.442695, %v4288_v52 }
 0xc29   : > { %5579 = vpow2.f32 %v4292_v38 }
 0xc2a   : > { %5581 = vpow2.f32 %v4290_v23 }
 0xc33   : > { %v5580_v48 = vpop.eup %5579 }
 0xc34   : > { %v5582_v49 = vpop.eup %5581  ;;  %v4295_v39 = vadd.f32 1.0, %v5580_v48 }
 0xc35   : > { %v4294_v9 = vadd.f32 1.0, %v5582_v49 }
 0xc37   : > { %5583 = vrcp.f32 %v4294_v9 }
 0xc38   : > { %5585 = vrcp.f32 %v4295_v39 }
 0xc41   : > { %v5584_v57 = vpop.eup %5583 }
 0xc42   : > { %v5586_v3 = vpop.eup %5585  ;;  %4301 = vst.msk [vmem:[%s572_s19] sm:$0xff] %vm4300_vm12, %v5584_v57 }
 0xc43   : > { %4302 = vst.msk [vmem:[%s572_s19 + $0x8] sm:$0xff] %vm4300_vm12, %v5586_v3 }
 0xc44 PF: > { %s6993_s18 = sld [smem:[#allocation9_spill]]  ;;  %s6994_s15 = smov %s5675_s16 }
 0xc45   : > { %s6995_s16 = smov %s5679_s17  ;;  %s6996_s17 = smov %s5842_s11 }
 0xc4a   : > { %p27_p9 = scmp.ge.s32.totalorder %s6993_s18, 4  }
 0xc4c   :  { %29 = sbr.rel (!%p27_p9) target bundleno = 9 (0x9), region = 129 }
 0xc53   :  { %4325 = vsyncpa [#allocation4], 1 }
 0xc54   :  { %4327 = vsyncpa [#allocation4 + $0x1], 1 }
 0xc55   :  { %4328 = vsyncpa [#allocation6], 1 }

</bundles_post_ra>
